<compile_context>
chip_gen: v7x
topology: tpu7x:2x2x1
jax: 0.10.0
libtpu: 0.0.40
codegen_flags: <defaults>
</compile_context>

<pallas_src>
import functools

import jax
import jax.numpy as jnp
from jax import lax
from jax.experimental import pallas as pl
from jax.experimental.pallas import tpu as pltpu

LANES = 128
SUBLANES = 8


def _resblock_kernel(x_ref, w1_ref, b1_ref, w2_ref, b2_ref, o_ref,
                     sx_ref, sm_ref, *, mb_h):
    """One grid step = one batch element (NHWC).

    x_ref  : (1, H, W, C)        input at real channel count
    w1_ref : (3, 3, Cp, Cp)      conv1 weight, channel-padded HWIO
    b1_ref : (1, Cp)             conv1 bias (channel-padded)
    w2_ref : (3, 3, Cp, Cp)      conv2 weight, channel-padded HWIO
    b2_ref : (1, Cp)             conv2 bias (channel-padded)
    o_ref  : (1, H, W, C)        output at real channel count
    sx_ref : (3, H+2, W, Cp)     kw-shifted slabs of the padded input
    sm_ref : (3, H+2, W, Cp)     kw-shifted slabs of the padded conv1 output

    Slab kw, row r, col c  ==  zero-padded image row r, col c + kw.
    """
    _, H, W, C = x_ref.shape
    Cp = w1_ref.shape[-1]

    # Per-step zeroing of both slab sets (halo rows/cols + lanes >= C). Cheap
    # memset; makes every grid step independent so the batch axis can be
    # 'parallel' (v7x: 2 TensorCores).
    sx_ref[...] = jnp.zeros_like(sx_ref)
    sm_ref[...] = jnp.zeros_like(sm_ref)

    # Scatter x into the three kw-shifted slabs (lanes >= C stay zero, which
    # matches the zero-padded weights/bias).
    x0 = x_ref[0]                                         # (H, W, C)
    sx_ref[1, 1:H + 1, :, :C] = x0                        # padded cols 1..W
    sx_ref[0, 1:H + 1, 1:W, :C] = x0[:, 0:W - 1, :]       # padded cols 0..W-1
    sx_ref[2, 1:H + 1, 0:W - 1, :C] = x0[:, 1:W, :]       # padded cols 2..W+1

    def conv_band(s_ref, w_ref, h0, mb):
        """3x3 conv of output rows [h0, h0+mb): 9 aligned-tap MXU matmuls."""
        m = mb * W
        acc = jnp.zeros((m, Cp), jnp.float32)
        for kh in range(3):
            for kw in range(3):
                # Leading-dim slice of a shifted slab; reshape is layout-free
                # when W % 8 == 0 (correct, merely slower, otherwise).
                patch = s_ref[kw, h0 + kh:h0 + kh + mb, :, :].reshape(m, Cp)
                acc = acc + jnp.dot(patch, w_ref[kh, kw],
                                    preferred_element_type=jnp.float32)
        return acc

    # ---- conv1 + ReLU, by H-bands; bands scatter straight into the mid slabs.
    for h0 in range(0, H, mb_h):
        mb = min(mb_h, H - h0)
        acc = conv_band(sx_ref, w1_ref, h0, mb)
        midb = jnp.maximum(acc + b1_ref[...], 0.0).reshape(mb, W, Cp)
        r0 = h0 + 1                                       # slab-row offset
        sm_ref[1, r0:r0 + mb, :, :] = midb
        sm_ref[0, r0:r0 + mb, 1:W, :] = midb[:, 0:W - 1, :]
        sm_ref[2, r0:r0 + mb, 0:W - 1, :] = midb[:, 1:W, :]

    # ---- conv2 + residual, by H-bands; store at real C lanes.
    for h0 in range(0, H, mb_h):
        mb = min(mb_h, H - h0)
        acc = conv_band(sm_ref, w2_ref, h0, mb)
        res = (acc + b2_ref[...]).reshape(mb, W, Cp)[:, :, :C]
        o_ref[0, h0:h0 + mb, :, :] = x_ref[0, h0:h0 + mb, :, :] + res


def resblock_forward(x_nchw, w1, b1, w2, b2):
    """ResBlock forward. x_nchw: (N, C, H, W) f32; conv weights HWIO (3,3,C,C)."""
    N, C, H, W = x_nchw.shape
    Cp = ((C + LANES - 1) // LANES) * LANES               # lane-dense K for MXU

    x = jnp.transpose(x_nchw, (0, 2, 3, 1))               # NHWC (real C; no pads)

    pc = Cp - C                                            # pad weights/bias once
    w1p = jnp.pad(w1, ((0, 0), (0, 0), (0, pc), (0, pc)))
    w2p = jnp.pad(w2, ((0, 0), (0, 0), (0, pc), (0, pc)))
    b1p = jnp.pad(b1, (0, pc)).reshape(1, Cp)
    b2p = jnp.pad(b2, (0, pc)).reshape(1, Cp)

    # Band height: keep the per-band matmul M-dim near 128 rows (acc ~16 vregs).
    mb_h = max(1, min(H, max(1, 128 // W)))

    # Explicit VMEM accounting (tiled sizes, double-buffered I/O and weights,
    # scratch x1), capped under the v7x 64 MiB budget.  NOTE: the tiny-C input
    # block is (8,128)-tile padded, so it costs ~128/C more VMEM than its real
    # bytes — acceptable here, fold C into W if tiny-C cases ever dominate.
    def _tile_bytes(r, c):
        return (((r + SUBLANES - 1) // SUBLANES) * SUBLANES
                * ((c + LANES - 1) // LANES) * LANES * 4)
    x_blk = H * _tile_bytes(W, C)
    o_blk = x_blk
    w_blk = 9 * _tile_bytes(Cp, Cp)
    b_blk = _tile_bytes(1, Cp)
    scratch = 2 * 3 * (H + 2) * _tile_bytes(W, Cp)
    est = 2 * (x_blk + o_blk) + 2 * 2 * w_blk + 2 * 2 * b_blk + scratch
    vmem_limit = int(min(max(est + (4 << 20), 16 << 20), 56 << 20))

    kernel = functools.partial(_resblock_kernel, mb_h=mb_h)
    out = pl.pallas_call(
        kernel,
        out_shape=jax.ShapeDtypeStruct((N, H, W, C), jnp.float32),
        grid_spec=pltpu.PrefetchScalarGridSpec(
            num_scalar_prefetch=0,
            grid=(N,),
            in_specs=[
                pl.BlockSpec((1, H, W, C), lambda i: (i, 0, 0, 0)),
                pl.BlockSpec((3, 3, Cp, Cp), lambda i: (0, 0, 0, 0)),
                pl.BlockSpec((1, Cp), lambda i: (0, 0)),
                pl.BlockSpec((3, 3, Cp, Cp), lambda i: (0, 0, 0, 0)),
                pl.BlockSpec((1, Cp), lambda i: (0, 0)),
            ],
            out_specs=pl.BlockSpec((1, H, W, C), lambda i: (i, 0, 0, 0)),
            scratch_shapes=[
                pltpu.VMEM((3, H + 2, W, Cp), jnp.float32),   # shifted x slabs
                pltpu.VMEM((3, H + 2, W, Cp), jnp.float32),   # shifted mid slabs
            ],
        ),
        compiler_params=pltpu.CompilerParams(
            dimension_semantics=("parallel",),
            vmem_limit_bytes=vmem_limit,
        ),
    )(x, w1p, b1p, w2p, b2p)

    return jnp.transpose(out, (0, 3, 1, 2))                # NHWC -> NCHW


def _reference_resblock(x_nchw, w1, b1, w2, b2):
    """Pure-JAX reference (lax conv) for correctness checking."""
    x = jnp.transpose(x_nchw, (0, 2, 3, 1))
    dn = ('NHWC', 'HWIO', 'NHWC')
    y = lax.conv_general_dilated(x, w1, (1, 1), 'SAME', dimension_numbers=dn) + b1
    y = jnp.maximum(y, 0.0)
    y = lax.conv_general_dilated(y, w2, (1, 1), 'SAME', dimension_numbers=dn) + b2
    return jnp.transpose(x + y, (0, 3, 1, 2))


if __name__ == "__main__":
    # Small shapes consistent with ResBlock(in_channels=4, out_channels=4, k=3)
    N, C, H, W = 2, 4, 16, 16

    key = jax.random.PRNGKey(0)
    kx, kw1, kb1, kw2, kb2 = jax.random.split(key, 5)

    x = jax.random.normal(kx, (N, C, H, W), dtype=jnp.float32)
    w1 = 0.1 * jax.random.normal(kw1, (3, 3, C, C), dtype=jnp.float32)
    b1 = 0.1 * jax.random.normal(kb1, (C,), dtype=jnp.float32)
    w2 = 0.1 * jax.random.normal(kw2, (3, 3, C, C), dtype=jnp.float32)
    b2 = 0.1 * jax.random.normal(kb2, (C,), dtype=jnp.float32)

    out = jax.block_until_ready(resblock_forward(x, w1, b1, w2, b2))
    ref = jax.block_until_ready(_reference_resblock(x, w1, b1, w2, b2))

    assert out.shape == (N, C, H, W)
    assert jnp.allclose(out, ref, rtol=1e-4, atol=1e-4), "mismatch vs reference"

    print("KERNEL_OK")
</pallas_src>

<mosaic_0001>
module attributes {stable_mosaic.version = 11 : i64} {
  func.func @_resblock_kernel(%arg0: i32, %arg1: memref<1x16x16x4xf32, #tpu.memory_space<vmem>>, %arg2: memref<3x3x128x128xf32, #tpu.memory_space<vmem>>, %arg3: memref<1x128xf32, #tpu.memory_space<vmem>>, %arg4: memref<3x3x128x128xf32, #tpu.memory_space<vmem>>, %arg5: memref<1x128xf32, #tpu.memory_space<vmem>>, %arg6: memref<1x16x16x4xf32, #tpu.memory_space<vmem>>, %arg7: memref<3x18x16x128xf32, #tpu.memory_space<vmem>>, %arg8: memref<3x18x16x128xf32, #tpu.memory_space<vmem>>) attributes {dimension_semantics = [#tpu.dimension_semantics<parallel>], iteration_bounds = array<i64: 2>, scalar_prefetch = 0 : i64, scratch_operands = 2 : i64, tpu.core_type = #tpu.core_type<tc>, window_params = [{transform_indices = @transform_0, window_bounds = array<i64: 1, 16, 16, 4>}, {pipeline_mode = #tpu.pipeline_mode<synchronous>, transform_indices = @transform_1, window_bounds = array<i64: 3, 3, 128, 128>}, {pipeline_mode = #tpu.pipeline_mode<synchronous>, transform_indices = @transform_2, window_bounds = array<i64: 1, 128>}, {pipeline_mode = #tpu.pipeline_mode<synchronous>, transform_indices = @transform_3, window_bounds = array<i64: 3, 3, 128, 128>}, {pipeline_mode = #tpu.pipeline_mode<synchronous>, transform_indices = @transform_4, window_bounds = array<i64: 1, 128>}, {transform_indices = @transform_5, window_bounds = array<i64: 1, 16, 16, 4>}]} {
    %cst = arith.constant 0.000000e+00 : f32
    %0 = vector.broadcast %cst : f32 to vector<3x18x16x128xf32>
    %c0 = arith.constant 0 : index
    %c0_0 = arith.constant 0 : index
    %c0_1 = arith.constant 0 : index
    %c0_2 = arith.constant 0 : index
    %1 = vector.load %arg7[%c0, %c0_0, %c0_1, %c0_2] : memref<3x18x16x128xf32, #tpu.memory_space<vmem>>, vector<3x18x16x128xf32>
    tpu.vector_store %arg7[%c0, %c0_0, %c0_1, %c0_2], %0 {strides = array<i32>} : memref<3x18x16x128xf32, #tpu.memory_space<vmem>>, vector<3x18x16x128xf32>,
    %cst_3 = arith.constant 0.000000e+00 : f32
    %2 = vector.broadcast %cst_3 : f32 to vector<3x18x16x128xf32>
    %c0_4 = arith.constant 0 : index
    %c0_5 = arith.constant 0 : index
    %c0_6 = arith.constant 0 : index
    %c0_7 = arith.constant 0 : index
    %3 = vector.load %arg8[%c0_4, %c0_5, %c0_6, %c0_7] : memref<3x18x16x128xf32, #tpu.memory_space<vmem>>, vector<3x18x16x128xf32>
    tpu.vector_store %arg8[%c0_4, %c0_5, %c0_6, %c0_7], %2 {strides = array<i32>} : memref<3x18x16x128xf32, #tpu.memory_space<vmem>>, vector<3x18x16x128xf32>,
    %c0_8 = arith.constant 0 : index
    %c0_9 = arith.constant 0 : index
    %c0_10 = arith.constant 0 : index
    %c0_11 = arith.constant 0 : index
    %4 = vector.load %arg1[%c0_8, %c0_9, %c0_10, %c0_11] : memref<1x16x16x4xf32, #tpu.memory_space<vmem>>, vector<1x16x16x4xf32>
    %5 = vector.shape_cast %4 : vector<1x16x16x4xf32> to vector<16x16x4xf32>
    %c1 = arith.constant 1 : index
    %c1_12 = arith.constant 1 : index
    %c0_13 = arith.constant 0 : index
    %c0_14 = arith.constant 0 : index
    %6 = vector.load %arg7[%c1, %c1_12, %c0_13, %c0_14] : memref<3x18x16x128xf32, #tpu.memory_space<vmem>>, vector<1x16x16x4xf32>
    %7 = vector.shape_cast %6 : vector<1x16x16x4xf32> to vector<16x16x4xf32>
    %8 = vector.shape_cast %5 : vector<16x16x4xf32> to vector<1x16x16x4xf32>
    tpu.vector_store %arg7[%c1, %c1_12, %c0_13, %c0_14], %8 {strides = array<i32>} : memref<3x18x16x128xf32, #tpu.memory_space<vmem>>, vector<1x16x16x4xf32>,
    %9 = vector.extract_strided_slice %5 {offsets = [0, 0, 0], sizes = [16, 15, 4], strides = [1, 1, 1]} : vector<16x16x4xf32> to vector<16x15x4xf32>
    %c0_15 = arith.constant 0 : index
    %c1_16 = arith.constant 1 : index
    %c1_17 = arith.constant 1 : index
    %c0_18 = arith.constant 0 : index
    %10 = vector.load %arg7[%c0_15, %c1_16, %c1_17, %c0_18] : memref<3x18x16x128xf32, #tpu.memory_space<vmem>>, vector<1x16x15x4xf32>
    %11 = vector.shape_cast %10 : vector<1x16x15x4xf32> to vector<16x15x4xf32>
    %12 = vector.shape_cast %9 : vector<16x15x4xf32> to vector<1x16x15x4xf32>
    tpu.vector_store %arg7[%c0_15, %c1_16, %c1_17, %c0_18], %12 {strides = array<i32>} : memref<3x18x16x128xf32, #tpu.memory_space<vmem>>, vector<1x16x15x4xf32>,
    %13 = vector.extract_strided_slice %5 {offsets = [0, 1, 0], sizes = [16, 15, 4], strides = [1, 1, 1]} : vector<16x16x4xf32> to vector<16x15x4xf32>
    %c2 = arith.constant 2 : index
    %c1_19 = arith.constant 1 : index
    %c0_20 = arith.constant 0 : index
    %c0_21 = arith.constant 0 : index
    %14 = vector.load %arg7[%c2, %c1_19, %c0_20, %c0_21] : memref<3x18x16x128xf32, #tpu.memory_space<vmem>>, vector<1x16x15x4xf32>
    %15 = vector.shape_cast %14 : vector<1x16x15x4xf32> to vector<16x15x4xf32>
    %16 = vector.shape_cast %13 : vector<16x15x4xf32> to vector<1x16x15x4xf32>
    tpu.vector_store %arg7[%c2, %c1_19, %c0_20, %c0_21], %16 {strides = array<i32>} : memref<3x18x16x128xf32, #tpu.memory_space<vmem>>, vector<1x16x15x4xf32>,
    %cst_22 = arith.constant 0.000000e+00 : f32
    %17 = vector.broadcast %cst_22 : f32 to vector<128x128xf32>
    %c0_23 = arith.constant 0 : index
    %c0_24 = arith.constant 0 : index
    %c0_25 = arith.constant 0 : index
    %c0_26 = arith.constant 0 : index
    %18 = vector.load %arg7[%c0_23, %c0_24, %c0_25, %c0_26] : memref<3x18x16x128xf32, #tpu.memory_space<vmem>>, vector<1x8x16x128xf32>
    %19 = vector.shape_cast %18 : vector<1x8x16x128xf32> to vector<8x16x128xf32>
    %20 = vector.shape_cast %19 : vector<8x16x128xf32> to vector<128x128xf32>
    %c0_27 = arith.constant 0 : index
    %c0_28 = arith.constant 0 : index
    %c0_29 = arith.constant 0 : index
    %c0_30 = arith.constant 0 : index
    %21 = vector.load %arg2[%c0_27, %c0_28, %c0_29, %c0_30] : memref<3x3x128x128xf32, #tpu.memory_space<vmem>>, vector<1x1x128x128xf32>
    %22 = vector.shape_cast %21 : vector<1x1x128x128xf32> to vector<128x128xf32>
    %cst_31 = arith.constant dense<0.000000e+00> : vector<128x128xf32>
    %23 = tpu.matmul %20, %22, %cst_31 {dimension_numbers = #tpu.dot_dimension_numbers<[1], [0], [0], [1], [0, 0, 1, 1], [], []>} : vector<128x128xf32>, vector<128x128xf32>, vector<128x128xf32> -> vector<128x128xf32>
    %24 = arith.addf %17, %23 : vector<128x128xf32>
    %c1_32 = arith.constant 1 : index
    %c0_33 = arith.constant 0 : index
    %c0_34 = arith.constant 0 : index
    %c0_35 = arith.constant 0 : index
    %25 = vector.load %arg7[%c1_32, %c0_33, %c0_34, %c0_35] : memref<3x18x16x128xf32, #tpu.memory_space<vmem>>, vector<1x8x16x128xf32>
    %26 = vector.shape_cast %25 : vector<1x8x16x128xf32> to vector<8x16x128xf32>
    %27 = vector.shape_cast %26 : vector<8x16x128xf32> to vector<128x128xf32>
    %c0_36 = arith.constant 0 : index
    %c1_37 = arith.constant 1 : index
    %c0_38 = arith.constant 0 : index
    %c0_39 = arith.constant 0 : index
    %28 = vector.load %arg2[%c0_36, %c1_37, %c0_38, %c0_39] : memref<3x3x128x128xf32, #tpu.memory_space<vmem>>, vector<1x1x128x128xf32>
    %29 = vector.shape_cast %28 : vector<1x1x128x128xf32> to vector<128x128xf32>
    %cst_40 = arith.constant dense<0.000000e+00> : vector<128x128xf32>
    %30 = tpu.matmul %27, %29, %cst_40 {dimension_numbers = #tpu.dot_dimension_numbers<[1], [0], [0], [1], [0, 0, 1, 1], [], []>} : vector<128x128xf32>, vector<128x128xf32>, vector<128x128xf32> -> vector<128x128xf32>
    %31 = arith.addf %24, %30 : vector<128x128xf32>
    %c2_41 = arith.constant 2 : index
    %c0_42 = arith.constant 0 : index
    %c0_43 = arith.constant 0 : index
    %c0_44 = arith.constant 0 : index
    %32 = vector.load %arg7[%c2_41, %c0_42, %c0_43, %c0_44] : memref<3x18x16x128xf32, #tpu.memory_space<vmem>>, vector<1x8x16x128xf32>
    %33 = vector.shape_cast %32 : vector<1x8x16x128xf32> to vector<8x16x128xf32>
    %34 = vector.shape_cast %33 : vector<8x16x128xf32> to vector<128x128xf32>
    %c0_45 = arith.constant 0 : index
    %c2_46 = arith.constant 2 : index
    %c0_47 = arith.constant 0 : index
    %c0_48 = arith.constant 0 : index
    %35 = vector.load %arg2[%c0_45, %c2_46, %c0_47, %c0_48] : memref<3x3x128x128xf32, #tpu.memory_space<vmem>>, vector<1x1x128x128xf32>
    %36 = vector.shape_cast %35 : vector<1x1x128x128xf32> to vector<128x128xf32>
    %cst_49 = arith.constant dense<0.000000e+00> : vector<128x128xf32>
    %37 = tpu.matmul %34, %36, %cst_49 {dimension_numbers = #tpu.dot_dimension_numbers<[1], [0], [0], [1], [0, 0, 1, 1], [], []>} : vector<128x128xf32>, vector<128x128xf32>, vector<128x128xf32> -> vector<128x128xf32>
    %38 = arith.addf %31, %37 : vector<128x128xf32>
    %c0_50 = arith.constant 0 : index
    %c1_51 = arith.constant 1 : index
    %c0_52 = arith.constant 0 : index
    %c0_53 = arith.constant 0 : index
    %39 = vector.load %arg7[%c0_50, %c1_51, %c0_52, %c0_53] : memref<3x18x16x128xf32, #tpu.memory_space<vmem>>, vector<1x8x16x128xf32>
    %40 = vector.shape_cast %39 : vector<1x8x16x128xf32> to vector<8x16x128xf32>
    %41 = vector.shape_cast %40 : vector<8x16x128xf32> to vector<128x128xf32>
    %c1_54 = arith.constant 1 : index
    %c0_55 = arith.constant 0 : index
    %c0_56 = arith.constant 0 : index
    %c0_57 = arith.constant 0 : index
    %42 = vector.load %arg2[%c1_54, %c0_55, %c0_56, %c0_57] : memref<3x3x128x128xf32, #tpu.memory_space<vmem>>, vector<1x1x128x128xf32>
    %43 = vector.shape_cast %42 : vector<1x1x128x128xf32> to vector<128x128xf32>
    %cst_58 = arith.constant dense<0.000000e+00> : vector<128x128xf32>
    %44 = tpu.matmul %41, %43, %cst_58 {dimension_numbers = #tpu.dot_dimension_numbers<[1], [0], [0], [1], [0, 0, 1, 1], [], []>} : vector<128x128xf32>, vector<128x128xf32>, vector<128x128xf32> -> vector<128x128xf32>
    %45 = arith.addf %38, %44 : vector<128x128xf32>
    %c1_59 = arith.constant 1 : index
    %c1_60 = arith.constant 1 : index
    %c0_61 = arith.constant 0 : index
    %c0_62 = arith.constant 0 : index
    %46 = vector.load %arg7[%c1_59, %c1_60, %c0_61, %c0_62] : memref<3x18x16x128xf32, #tpu.memory_space<vmem>>, vector<1x8x16x128xf32>
    %47 = vector.shape_cast %46 : vector<1x8x16x128xf32> to vector<8x16x128xf32>
    %48 = vector.shape_cast %47 : vector<8x16x128xf32> to vector<128x128xf32>
    %c1_63 = arith.constant 1 : index
    %c1_64 = arith.constant 1 : index
    %c0_65 = arith.constant 0 : index
    %c0_66 = arith.constant 0 : index
    %49 = vector.load %arg2[%c1_63, %c1_64, %c0_65, %c0_66] : memref<3x3x128x128xf32, #tpu.memory_space<vmem>>, vector<1x1x128x128xf32>
    %50 = vector.shape_cast %49 : vector<1x1x128x128xf32> to vector<128x128xf32>
    %cst_67 = arith.constant dense<0.000000e+00> : vector<128x128xf32>
    %51 = tpu.matmul %48, %50, %cst_67 {dimension_numbers = #tpu.dot_dimension_numbers<[1], [0], [0], [1], [0, 0, 1, 1], [], []>} : vector<128x128xf32>, vector<128x128xf32>, vector<128x128xf32> -> vector<128x128xf32>
    %52 = arith.addf %45, %51 : vector<128x128xf32>
    %c2_68 = arith.constant 2 : index
    %c1_69 = arith.constant 1 : index
    %c0_70 = arith.constant 0 : index
    %c0_71 = arith.constant 0 : index
    %53 = vector.load %arg7[%c2_68, %c1_69, %c0_70, %c0_71] : memref<3x18x16x128xf32, #tpu.memory_space<vmem>>, vector<1x8x16x128xf32>
    %54 = vector.shape_cast %53 : vector<1x8x16x128xf32> to vector<8x16x128xf32>
    %55 = vector.shape_cast %54 : vector<8x16x128xf32> to vector<128x128xf32>
    %c1_72 = arith.constant 1 : index
    %c2_73 = arith.constant 2 : index
    %c0_74 = arith.constant 0 : index
    %c0_75 = arith.constant 0 : index
    %56 = vector.load %arg2[%c1_72, %c2_73, %c0_74, %c0_75] : memref<3x3x128x128xf32, #tpu.memory_space<vmem>>, vector<1x1x128x128xf32>
    %57 = vector.shape_cast %56 : vector<1x1x128x128xf32> to vector<128x128xf32>
    %cst_76 = arith.constant dense<0.000000e+00> : vector<128x128xf32>
    %58 = tpu.matmul %55, %57, %cst_76 {dimension_numbers = #tpu.dot_dimension_numbers<[1], [0], [0], [1], [0, 0, 1, 1], [], []>} : vector<128x128xf32>, vector<128x128xf32>, vector<128x128xf32> -> vector<128x128xf32>
    %59 = arith.addf %52, %58 : vector<128x128xf32>
    %c0_77 = arith.constant 0 : index
    %c2_78 = arith.constant 2 : index
    %c0_79 = arith.constant 0 : index
    %c0_80 = arith.constant 0 : index
    %60 = vector.load %arg7[%c0_77, %c2_78, %c0_79, %c0_80] : memref<3x18x16x128xf32, #tpu.memory_space<vmem>>, vector<1x8x16x128xf32>
    %61 = vector.shape_cast %60 : vector<1x8x16x128xf32> to vector<8x16x128xf32>
    %62 = vector.shape_cast %61 : vector<8x16x128xf32> to vector<128x128xf32>
    %c2_81 = arith.constant 2 : index
    %c0_82 = arith.constant 0 : index
    %c0_83 = arith.constant 0 : index
    %c0_84 = arith.constant 0 : index
    %63 = vector.load %arg2[%c2_81, %c0_82, %c0_83, %c0_84] : memref<3x3x128x128xf32, #tpu.memory_space<vmem>>, vector<1x1x128x128xf32>
    %64 = vector.shape_cast %63 : vector<1x1x128x128xf32> to vector<128x128xf32>
    %cst_85 = arith.constant dense<0.000000e+00> : vector<128x128xf32>
    %65 = tpu.matmul %62, %64, %cst_85 {dimension_numbers = #tpu.dot_dimension_numbers<[1], [0], [0], [1], [0, 0, 1, 1], [], []>} : vector<128x128xf32>, vector<128x128xf32>, vector<128x128xf32> -> vector<128x128xf32>
    %66 = arith.addf %59, %65 : vector<128x128xf32>
    %c1_86 = arith.constant 1 : index
    %c2_87 = arith.constant 2 : index
    %c0_88 = arith.constant 0 : index
    %c0_89 = arith.constant 0 : index
    %67 = vector.load %arg7[%c1_86, %c2_87, %c0_88, %c0_89] : memref<3x18x16x128xf32, #tpu.memory_space<vmem>>, vector<1x8x16x128xf32>
    %68 = vector.shape_cast %67 : vector<1x8x16x128xf32> to vector<8x16x128xf32>
    %69 = vector.shape_cast %68 : vector<8x16x128xf32> to vector<128x128xf32>
    %c2_90 = arith.constant 2 : index
    %c1_91 = arith.constant 1 : index
    %c0_92 = arith.constant 0 : index
    %c0_93 = arith.constant 0 : index
    %70 = vector.load %arg2[%c2_90, %c1_91, %c0_92, %c0_93] : memref<3x3x128x128xf32, #tpu.memory_space<vmem>>, vector<1x1x128x128xf32>
    %71 = vector.shape_cast %70 : vector<1x1x128x128xf32> to vector<128x128xf32>
    %cst_94 = arith.constant dense<0.000000e+00> : vector<128x128xf32>
    %72 = tpu.matmul %69, %71, %cst_94 {dimension_numbers = #tpu.dot_dimension_numbers<[1], [0], [0], [1], [0, 0, 1, 1], [], []>} : vector<128x128xf32>, vector<128x128xf32>, vector<128x128xf32> -> vector<128x128xf32>
    %73 = arith.addf %66, %72 : vector<128x128xf32>
    %c2_95 = arith.constant 2 : index
    %c2_96 = arith.constant 2 : index
    %c0_97 = arith.constant 0 : index
    %c0_98 = arith.constant 0 : index
    %74 = vector.load %arg7[%c2_95, %c2_96, %c0_97, %c0_98] : memref<3x18x16x128xf32, #tpu.memory_space<vmem>>, vector<1x8x16x128xf32>
    %75 = vector.shape_cast %74 : vector<1x8x16x128xf32> to vector<8x16x128xf32>
    %76 = vector.shape_cast %75 : vector<8x16x128xf32> to vector<128x128xf32>
    %c2_99 = arith.constant 2 : index
    %c2_100 = arith.constant 2 : index
    %c0_101 = arith.constant 0 : index
    %c0_102 = arith.constant 0 : index
    %77 = vector.load %arg2[%c2_99, %c2_100, %c0_101, %c0_102] : memref<3x3x128x128xf32, #tpu.memory_space<vmem>>, vector<1x1x128x128xf32>
    %78 = vector.shape_cast %77 : vector<1x1x128x128xf32> to vector<128x128xf32>
    %cst_103 = arith.constant dense<0.000000e+00> : vector<128x128xf32>
    %79 = tpu.matmul %76, %78, %cst_103 {dimension_numbers = #tpu.dot_dimension_numbers<[1], [0], [0], [1], [0, 0, 1, 1], [], []>} : vector<128x128xf32>, vector<128x128xf32>, vector<128x128xf32> -> vector<128x128xf32>
    %80 = arith.addf %73, %79 : vector<128x128xf32>
    %c0_104 = arith.constant 0 : index
    %c0_105 = arith.constant 0 : index
    %81 = vector.load %arg3[%c0_104, %c0_105] : memref<1x128xf32, #tpu.memory_space<vmem>>, vector<1x128xf32>
    %82 = vector.broadcast %81 : vector<1x128xf32> to vector<128x128xf32>
    %83 = arith.addf %80, %82 : vector<128x128xf32>
    %cst_106 = arith.constant 0.000000e+00 : f32
    %84 = vector.broadcast %cst_106 : f32 to vector<128x128xf32>
    %85 = arith.maximumf %83, %84 : vector<128x128xf32>
    %86 = vector.shape_cast %85 : vector<128x128xf32> to vector<8x16x128xf32>
    %c1_107 = arith.constant 1 : index
    %c1_108 = arith.constant 1 : index
    %c0_109 = arith.constant 0 : index
    %c0_110 = arith.constant 0 : index
    %87 = vector.load %arg8[%c1_107, %c1_108, %c0_109, %c0_110] : memref<3x18x16x128xf32, #tpu.memory_space<vmem>>, vector<1x8x16x128xf32>
    %88 = vector.shape_cast %87 : vector<1x8x16x128xf32> to vector<8x16x128xf32>
    %89 = vector.shape_cast %86 : vector<8x16x128xf32> to vector<1x8x16x128xf32>
    tpu.vector_store %arg8[%c1_107, %c1_108, %c0_109, %c0_110], %89 {strides = array<i32>} : memref<3x18x16x128xf32, #tpu.memory_space<vmem>>, vector<1x8x16x128xf32>,
    %90 = vector.extract_strided_slice %86 {offsets = [0, 0, 0], sizes = [8, 15, 128], strides = [1, 1, 1]} : vector<8x16x128xf32> to vector<8x15x128xf32>
    %c0_111 = arith.constant 0 : index
    %c1_112 = arith.constant 1 : index
    %c1_113 = arith.constant 1 : index
    %c0_114 = arith.constant 0 : index
    %91 = vector.load %arg8[%c0_111, %c1_112, %c1_113, %c0_114] : memref<3x18x16x128xf32, #tpu.memory_space<vmem>>, vector<1x8x15x128xf32>
    %92 = vector.shape_cast %91 : vector<1x8x15x128xf32> to vector<8x15x128xf32>
    %93 = vector.shape_cast %90 : vector<8x15x128xf32> to vector<1x8x15x128xf32>
    tpu.vector_store %arg8[%c0_111, %c1_112, %c1_113, %c0_114], %93 {strides = array<i32>} : memref<3x18x16x128xf32, #tpu.memory_space<vmem>>, vector<1x8x15x128xf32>,
    %94 = vector.extract_strided_slice %86 {offsets = [0, 1, 0], sizes = [8, 15, 128], strides = [1, 1, 1]} : vector<8x16x128xf32> to vector<8x15x128xf32>
    %c2_115 = arith.constant 2 : index
    %c1_116 = arith.constant 1 : index
    %c0_117 = arith.constant 0 : index
    %c0_118 = arith.constant 0 : index
    %95 = vector.load %arg8[%c2_115, %c1_116, %c0_117, %c0_118] : memref<3x18x16x128xf32, #tpu.memory_space<vmem>>, vector<1x8x15x128xf32>
    %96 = vector.shape_cast %95 : vector<1x8x15x128xf32> to vector<8x15x128xf32>
    %97 = vector.shape_cast %94 : vector<8x15x128xf32> to vector<1x8x15x128xf32>
    tpu.vector_store %arg8[%c2_115, %c1_116, %c0_117, %c0_118], %97 {strides = array<i32>} : memref<3x18x16x128xf32, #tpu.memory_space<vmem>>, vector<1x8x15x128xf32>,
    %cst_119 = arith.constant 0.000000e+00 : f32
    %98 = vector.broadcast %cst_119 : f32 to vector<128x128xf32>
    %c0_120 = arith.constant 0 : index
    %c8 = arith.constant 8 : index
    %c0_121 = arith.constant 0 : index
    %c0_122 = arith.constant 0 : index
    %99 = vector.load %arg7[%c0_120, %c8, %c0_121, %c0_122] : memref<3x18x16x128xf32, #tpu.memory_space<vmem>>, vector<1x8x16x128xf32>
    %100 = vector.shape_cast %99 : vector<1x8x16x128xf32> to vector<8x16x128xf32>
    %101 = vector.shape_cast %100 : vector<8x16x128xf32> to vector<128x128xf32>
    %c0_123 = arith.constant 0 : index
    %c0_124 = arith.constant 0 : index
    %c0_125 = arith.constant 0 : index
    %c0_126 = arith.constant 0 : index
    %102 = vector.load %arg2[%c0_123, %c0_124, %c0_125, %c0_126] : memref<3x3x128x128xf32, #tpu.memory_space<vmem>>, vector<1x1x128x128xf32>
    %103 = vector.shape_cast %102 : vector<1x1x128x128xf32> to vector<128x128xf32>
    %cst_127 = arith.constant dense<0.000000e+00> : vector<128x128xf32>
    %104 = tpu.matmul %101, %103, %cst_127 {dimension_numbers = #tpu.dot_dimension_numbers<[1], [0], [0], [1], [0, 0, 1, 1], [], []>} : vector<128x128xf32>, vector<128x128xf32>, vector<128x128xf32> -> vector<128x128xf32>
    %105 = arith.addf %98, %104 : vector<128x128xf32>
    %c1_128 = arith.constant 1 : index
    %c8_129 = arith.constant 8 : index
    %c0_130 = arith.constant 0 : index
    %c0_131 = arith.constant 0 : index
    %106 = vector.load %arg7[%c1_128, %c8_129, %c0_130, %c0_131] : memref<3x18x16x128xf32, #tpu.memory_space<vmem>>, vector<1x8x16x128xf32>
    %107 = vector.shape_cast %106 : vector<1x8x16x128xf32> to vector<8x16x128xf32>
    %108 = vector.shape_cast %107 : vector<8x16x128xf32> to vector<128x128xf32>
    %c0_132 = arith.constant 0 : index
    %c1_133 = arith.constant 1 : index
    %c0_134 = arith.constant 0 : index
    %c0_135 = arith.constant 0 : index
    %109 = vector.load %arg2[%c0_132, %c1_133, %c0_134, %c0_135] : memref<3x3x128x128xf32, #tpu.memory_space<vmem>>, vector<1x1x128x128xf32>
    %110 = vector.shape_cast %109 : vector<1x1x128x128xf32> to vector<128x128xf32>
    %cst_136 = arith.constant dense<0.000000e+00> : vector<128x128xf32>
    %111 = tpu.matmul %108, %110, %cst_136 {dimension_numbers = #tpu.dot_dimension_numbers<[1], [0], [0], [1], [0, 0, 1, 1], [], []>} : vector<128x128xf32>, vector<128x128xf32>, vector<128x128xf32> -> vector<128x128xf32>
    %112 = arith.addf %105, %111 : vector<128x128xf32>
    %c2_137 = arith.constant 2 : index
    %c8_138 = arith.constant 8 : index
    %c0_139 = arith.constant 0 : index
    %c0_140 = arith.constant 0 : index
    %113 = vector.load %arg7[%c2_137, %c8_138, %c0_139, %c0_140] : memref<3x18x16x128xf32, #tpu.memory_space<vmem>>, vector<1x8x16x128xf32>
    %114 = vector.shape_cast %113 : vector<1x8x16x128xf32> to vector<8x16x128xf32>
    %115 = vector.shape_cast %114 : vector<8x16x128xf32> to vector<128x128xf32>
    %c0_141 = arith.constant 0 : index
    %c2_142 = arith.constant 2 : index
    %c0_143 = arith.constant 0 : index
    %c0_144 = arith.constant 0 : index
    %116 = vector.load %arg2[%c0_141, %c2_142, %c0_143, %c0_144] : memref<3x3x128x128xf32, #tpu.memory_space<vmem>>, vector<1x1x128x128xf32>
    %117 = vector.shape_cast %116 : vector<1x1x128x128xf32> to vector<128x128xf32>
    %cst_145 = arith.constant dense<0.000000e+00> : vector<128x128xf32>
    %118 = tpu.matmul %115, %117, %cst_145 {dimension_numbers = #tpu.dot_dimension_numbers<[1], [0], [0], [1], [0, 0, 1, 1], [], []>} : vector<128x128xf32>, vector<128x128xf32>, vector<128x128xf32> -> vector<128x128xf32>
    %119 = arith.addf %112, %118 : vector<128x128xf32>
    %c0_146 = arith.constant 0 : index
    %c9 = arith.constant 9 : index
    %c0_147 = arith.constant 0 : index
    %c0_148 = arith.constant 0 : index
    %120 = vector.load %arg7[%c0_146, %c9, %c0_147, %c0_148] : memref<3x18x16x128xf32, #tpu.memory_space<vmem>>, vector<1x8x16x128xf32>
    %121 = vector.shape_cast %120 : vector<1x8x16x128xf32> to vector<8x16x128xf32>
    %122 = vector.shape_cast %121 : vector<8x16x128xf32> to vector<128x128xf32>
    %c1_149 = arith.constant 1 : index
    %c0_150 = arith.constant 0 : index
    %c0_151 = arith.constant 0 : index
    %c0_152 = arith.constant 0 : index
    %123 = vector.load %arg2[%c1_149, %c0_150, %c0_151, %c0_152] : memref<3x3x128x128xf32, #tpu.memory_space<vmem>>, vector<1x1x128x128xf32>
    %124 = vector.shape_cast %123 : vector<1x1x128x128xf32> to vector<128x128xf32>
    %cst_153 = arith.constant dense<0.000000e+00> : vector<128x128xf32>
    %125 = tpu.matmul %122, %124, %cst_153 {dimension_numbers = #tpu.dot_dimension_numbers<[1], [0], [0], [1], [0, 0, 1, 1], [], []>} : vector<128x128xf32>, vector<128x128xf32>, vector<128x128xf32> -> vector<128x128xf32>
    %126 = arith.addf %119, %125 : vector<128x128xf32>
    %c1_154 = arith.constant 1 : index
    %c9_155 = arith.constant 9 : index
    %c0_156 = arith.constant 0 : index
    %c0_157 = arith.constant 0 : index
    %127 = vector.load %arg7[%c1_154, %c9_155, %c0_156, %c0_157] : memref<3x18x16x128xf32, #tpu.memory_space<vmem>>, vector<1x8x16x128xf32>
    %128 = vector.shape_cast %127 : vector<1x8x16x128xf32> to vector<8x16x128xf32>
    %129 = vector.shape_cast %128 : vector<8x16x128xf32> to vector<128x128xf32>
    %c1_158 = arith.constant 1 : index
    %c1_159 = arith.constant 1 : index
    %c0_160 = arith.constant 0 : index
    %c0_161 = arith.constant 0 : index
    %130 = vector.load %arg2[%c1_158, %c1_159, %c0_160, %c0_161] : memref<3x3x128x128xf32, #tpu.memory_space<vmem>>, vector<1x1x128x128xf32>
    %131 = vector.shape_cast %130 : vector<1x1x128x128xf32> to vector<128x128xf32>
    %cst_162 = arith.constant dense<0.000000e+00> : vector<128x128xf32>
    %132 = tpu.matmul %129, %131, %cst_162 {dimension_numbers = #tpu.dot_dimension_numbers<[1], [0], [0], [1], [0, 0, 1, 1], [], []>} : vector<128x128xf32>, vector<128x128xf32>, vector<128x128xf32> -> vector<128x128xf32>
    %133 = arith.addf %126, %132 : vector<128x128xf32>
    %c2_163 = arith.constant 2 : index
    %c9_164 = arith.constant 9 : index
    %c0_165 = arith.constant 0 : index
    %c0_166 = arith.constant 0 : index
    %134 = vector.load %arg7[%c2_163, %c9_164, %c0_165, %c0_166] : memref<3x18x16x128xf32, #tpu.memory_space<vmem>>, vector<1x8x16x128xf32>
    %135 = vector.shape_cast %134 : vector<1x8x16x128xf32> to vector<8x16x128xf32>
    %136 = vector.shape_cast %135 : vector<8x16x128xf32> to vector<128x128xf32>
    %c1_167 = arith.constant 1 : index
    %c2_168 = arith.constant 2 : index
    %c0_169 = arith.constant 0 : index
    %c0_170 = arith.constant 0 : index
    %137 = vector.load %arg2[%c1_167, %c2_168, %c0_169, %c0_170] : memref<3x3x128x128xf32, #tpu.memory_space<vmem>>, vector<1x1x128x128xf32>
    %138 = vector.shape_cast %137 : vector<1x1x128x128xf32> to vector<128x128xf32>
    %cst_171 = arith.constant dense<0.000000e+00> : vector<128x128xf32>
    %139 = tpu.matmul %136, %138, %cst_171 {dimension_numbers = #tpu.dot_dimension_numbers<[1], [0], [0], [1], [0, 0, 1, 1], [], []>} : vector<128x128xf32>, vector<128x128xf32>, vector<128x128xf32> -> vector<128x128xf32>
    %140 = arith.addf %133, %139 : vector<128x128xf32>
    %c0_172 = arith.constant 0 : index
    %c10 = arith.constant 10 : index
    %c0_173 = arith.constant 0 : index
    %c0_174 = arith.constant 0 : index
    %141 = vector.load %arg7[%c0_172, %c10, %c0_173, %c0_174] : memref<3x18x16x128xf32, #tpu.memory_space<vmem>>, vector<1x8x16x128xf32>
    %142 = vector.shape_cast %141 : vector<1x8x16x128xf32> to vector<8x16x128xf32>
    %143 = vector.shape_cast %142 : vector<8x16x128xf32> to vector<128x128xf32>
    %c2_175 = arith.constant 2 : index
    %c0_176 = arith.constant 0 : index
    %c0_177 = arith.constant 0 : index
    %c0_178 = arith.constant 0 : index
    %144 = vector.load %arg2[%c2_175, %c0_176, %c0_177, %c0_178] : memref<3x3x128x128xf32, #tpu.memory_space<vmem>>, vector<1x1x128x128xf32>
    %145 = vector.shape_cast %144 : vector<1x1x128x128xf32> to vector<128x128xf32>
    %cst_179 = arith.constant dense<0.000000e+00> : vector<128x128xf32>
    %146 = tpu.matmul %143, %145, %cst_179 {dimension_numbers = #tpu.dot_dimension_numbers<[1], [0], [0], [1], [0, 0, 1, 1], [], []>} : vector<128x128xf32>, vector<128x128xf32>, vector<128x128xf32> -> vector<128x128xf32>
    %147 = arith.addf %140, %146 : vector<128x128xf32>
    %c1_180 = arith.constant 1 : index
    %c10_181 = arith.constant 10 : index
    %c0_182 = arith.constant 0 : index
    %c0_183 = arith.constant 0 : index
    %148 = vector.load %arg7[%c1_180, %c10_181, %c0_182, %c0_183] : memref<3x18x16x128xf32, #tpu.memory_space<vmem>>, vector<1x8x16x128xf32>
    %149 = vector.shape_cast %148 : vector<1x8x16x128xf32> to vector<8x16x128xf32>
    %150 = vector.shape_cast %149 : vector<8x16x128xf32> to vector<128x128xf32>
    %c2_184 = arith.constant 2 : index
    %c1_185 = arith.constant 1 : index
    %c0_186 = arith.constant 0 : index
    %c0_187 = arith.constant 0 : index
    %151 = vector.load %arg2[%c2_184, %c1_185, %c0_186, %c0_187] : memref<3x3x128x128xf32, #tpu.memory_space<vmem>>, vector<1x1x128x128xf32>
    %152 = vector.shape_cast %151 : vector<1x1x128x128xf32> to vector<128x128xf32>
    %cst_188 = arith.constant dense<0.000000e+00> : vector<128x128xf32>
    %153 = tpu.matmul %150, %152, %cst_188 {dimension_numbers = #tpu.dot_dimension_numbers<[1], [0], [0], [1], [0, 0, 1, 1], [], []>} : vector<128x128xf32>, vector<128x128xf32>, vector<128x128xf32> -> vector<128x128xf32>
    %154 = arith.addf %147, %153 : vector<128x128xf32>
    %c2_189 = arith.constant 2 : index
    %c10_190 = arith.constant 10 : index
    %c0_191 = arith.constant 0 : index
    %c0_192 = arith.constant 0 : index
    %155 = vector.load %arg7[%c2_189, %c10_190, %c0_191, %c0_192] : memref<3x18x16x128xf32, #tpu.memory_space<vmem>>, vector<1x8x16x128xf32>
    %156 = vector.shape_cast %155 : vector<1x8x16x128xf32> to vector<8x16x128xf32>
    %157 = vector.shape_cast %156 : vector<8x16x128xf32> to vector<128x128xf32>
    %c2_193 = arith.constant 2 : index
    %c2_194 = arith.constant 2 : index
    %c0_195 = arith.constant 0 : index
    %c0_196 = arith.constant 0 : index
    %158 = vector.load %arg2[%c2_193, %c2_194, %c0_195, %c0_196] : memref<3x3x128x128xf32, #tpu.memory_space<vmem>>, vector<1x1x128x128xf32>
    %159 = vector.shape_cast %158 : vector<1x1x128x128xf32> to vector<128x128xf32>
    %cst_197 = arith.constant dense<0.000000e+00> : vector<128x128xf32>
    %160 = tpu.matmul %157, %159, %cst_197 {dimension_numbers = #tpu.dot_dimension_numbers<[1], [0], [0], [1], [0, 0, 1, 1], [], []>} : vector<128x128xf32>, vector<128x128xf32>, vector<128x128xf32> -> vector<128x128xf32>
    %161 = arith.addf %154, %160 : vector<128x128xf32>
    %c0_198 = arith.constant 0 : index
    %c0_199 = arith.constant 0 : index
    %162 = vector.load %arg3[%c0_198, %c0_199] : memref<1x128xf32, #tpu.memory_space<vmem>>, vector<1x128xf32>
    %163 = vector.broadcast %162 : vector<1x128xf32> to vector<128x128xf32>
    %164 = arith.addf %161, %163 : vector<128x128xf32>
    %cst_200 = arith.constant 0.000000e+00 : f32
    %165 = vector.broadcast %cst_200 : f32 to vector<128x128xf32>
    %166 = arith.maximumf %164, %165 : vector<128x128xf32>
    %167 = vector.shape_cast %166 : vector<128x128xf32> to vector<8x16x128xf32>
    %c1_201 = arith.constant 1 : index
    %c9_202 = arith.constant 9 : index
    %c0_203 = arith.constant 0 : index
    %c0_204 = arith.constant 0 : index
    %168 = vector.load %arg8[%c1_201, %c9_202, %c0_203, %c0_204] : memref<3x18x16x128xf32, #tpu.memory_space<vmem>>, vector<1x8x16x128xf32>
    %169 = vector.shape_cast %168 : vector<1x8x16x128xf32> to vector<8x16x128xf32>
    %170 = vector.shape_cast %167 : vector<8x16x128xf32> to vector<1x8x16x128xf32>
    tpu.vector_store %arg8[%c1_201, %c9_202, %c0_203, %c0_204], %170 {strides = array<i32>} : memref<3x18x16x128xf32, #tpu.memory_space<vmem>>, vector<1x8x16x128xf32>,
    %171 = vector.extract_strided_slice %167 {offsets = [0, 0, 0], sizes = [8, 15, 128], strides = [1, 1, 1]} : vector<8x16x128xf32> to vector<8x15x128xf32>
    %c0_205 = arith.constant 0 : index
    %c9_206 = arith.constant 9 : index
    %c1_207 = arith.constant 1 : index
    %c0_208 = arith.constant 0 : index
    %172 = vector.load %arg8[%c0_205, %c9_206, %c1_207, %c0_208] : memref<3x18x16x128xf32, #tpu.memory_space<vmem>>, vector<1x8x15x128xf32>
    %173 = vector.shape_cast %172 : vector<1x8x15x128xf32> to vector<8x15x128xf32>
    %174 = vector.shape_cast %171 : vector<8x15x128xf32> to vector<1x8x15x128xf32>
    tpu.vector_store %arg8[%c0_205, %c9_206, %c1_207, %c0_208], %174 {strides = array<i32>} : memref<3x18x16x128xf32, #tpu.memory_space<vmem>>, vector<1x8x15x128xf32>,
    %175 = vector.extract_strided_slice %167 {offsets = [0, 1, 0], sizes = [8, 15, 128], strides = [1, 1, 1]} : vector<8x16x128xf32> to vector<8x15x128xf32>
    %c2_209 = arith.constant 2 : index
    %c9_210 = arith.constant 9 : index
    %c0_211 = arith.constant 0 : index
    %c0_212 = arith.constant 0 : index
    %176 = vector.load %arg8[%c2_209, %c9_210, %c0_211, %c0_212] : memref<3x18x16x128xf32, #tpu.memory_space<vmem>>, vector<1x8x15x128xf32>
    %177 = vector.shape_cast %176 : vector<1x8x15x128xf32> to vector<8x15x128xf32>
    %178 = vector.shape_cast %175 : vector<8x15x128xf32> to vector<1x8x15x128xf32>
    tpu.vector_store %arg8[%c2_209, %c9_210, %c0_211, %c0_212], %178 {strides = array<i32>} : memref<3x18x16x128xf32, #tpu.memory_space<vmem>>, vector<1x8x15x128xf32>,
    %cst_213 = arith.constant 0.000000e+00 : f32
    %179 = vector.broadcast %cst_213 : f32 to vector<128x128xf32>
    %c0_214 = arith.constant 0 : index
    %c0_215 = arith.constant 0 : index
    %c0_216 = arith.constant 0 : index
    %c0_217 = arith.constant 0 : index
    %180 = vector.load %arg8[%c0_214, %c0_215, %c0_216, %c0_217] : memref<3x18x16x128xf32, #tpu.memory_space<vmem>>, vector<1x8x16x128xf32>
    %181 = vector.shape_cast %180 : vector<1x8x16x128xf32> to vector<8x16x128xf32>
    %182 = vector.shape_cast %181 : vector<8x16x128xf32> to vector<128x128xf32>
    %c0_218 = arith.constant 0 : index
    %c0_219 = arith.constant 0 : index
    %c0_220 = arith.constant 0 : index
    %c0_221 = arith.constant 0 : index
    %183 = vector.load %arg4[%c0_218, %c0_219, %c0_220, %c0_221] : memref<3x3x128x128xf32, #tpu.memory_space<vmem>>, vector<1x1x128x128xf32>
    %184 = vector.shape_cast %183 : vector<1x1x128x128xf32> to vector<128x128xf32>
    %cst_222 = arith.constant dense<0.000000e+00> : vector<128x128xf32>
    %185 = tpu.matmul %182, %184, %cst_222 {dimension_numbers = #tpu.dot_dimension_numbers<[1], [0], [0], [1], [0, 0, 1, 1], [], []>} : vector<128x128xf32>, vector<128x128xf32>, vector<128x128xf32> -> vector<128x128xf32>
    %186 = arith.addf %179, %185 : vector<128x128xf32>
    %c1_223 = arith.constant 1 : index
    %c0_224 = arith.constant 0 : index
    %c0_225 = arith.constant 0 : index
    %c0_226 = arith.constant 0 : index
    %187 = vector.load %arg8[%c1_223, %c0_224, %c0_225, %c0_226] : memref<3x18x16x128xf32, #tpu.memory_space<vmem>>, vector<1x8x16x128xf32>
    %188 = vector.shape_cast %187 : vector<1x8x16x128xf32> to vector<8x16x128xf32>
    %189 = vector.shape_cast %188 : vector<8x16x128xf32> to vector<128x128xf32>
    %c0_227 = arith.constant 0 : index
    %c1_228 = arith.constant 1 : index
    %c0_229 = arith.constant 0 : index
    %c0_230 = arith.constant 0 : index
    %190 = vector.load %arg4[%c0_227, %c1_228, %c0_229, %c0_230] : memref<3x3x128x128xf32, #tpu.memory_space<vmem>>, vector<1x1x128x128xf32>
    %191 = vector.shape_cast %190 : vector<1x1x128x128xf32> to vector<128x128xf32>
    %cst_231 = arith.constant dense<0.000000e+00> : vector<128x128xf32>
    %192 = tpu.matmul %189, %191, %cst_231 {dimension_numbers = #tpu.dot_dimension_numbers<[1], [0], [0], [1], [0, 0, 1, 1], [], []>} : vector<128x128xf32>, vector<128x128xf32>, vector<128x128xf32> -> vector<128x128xf32>
    %193 = arith.addf %186, %192 : vector<128x128xf32>
    %c2_232 = arith.constant 2 : index
    %c0_233 = arith.constant 0 : index
    %c0_234 = arith.constant 0 : index
    %c0_235 = arith.constant 0 : index
    %194 = vector.load %arg8[%c2_232, %c0_233, %c0_234, %c0_235] : memref<3x18x16x128xf32, #tpu.memory_space<vmem>>, vector<1x8x16x128xf32>
    %195 = vector.shape_cast %194 : vector<1x8x16x128xf32> to vector<8x16x128xf32>
    %196 = vector.shape_cast %195 : vector<8x16x128xf32> to vector<128x128xf32>
    %c0_236 = arith.constant 0 : index
    %c2_237 = arith.constant 2 : index
    %c0_238 = arith.constant 0 : index
    %c0_239 = arith.constant 0 : index
    %197 = vector.load %arg4[%c0_236, %c2_237, %c0_238, %c0_239] : memref<3x3x128x128xf32, #tpu.memory_space<vmem>>, vector<1x1x128x128xf32>
    %198 = vector.shape_cast %197 : vector<1x1x128x128xf32> to vector<128x128xf32>
    %cst_240 = arith.constant dense<0.000000e+00> : vector<128x128xf32>
    %199 = tpu.matmul %196, %198, %cst_240 {dimension_numbers = #tpu.dot_dimension_numbers<[1], [0], [0], [1], [0, 0, 1, 1], [], []>} : vector<128x128xf32>, vector<128x128xf32>, vector<128x128xf32> -> vector<128x128xf32>
    %200 = arith.addf %193, %199 : vector<128x128xf32>
    %c0_241 = arith.constant 0 : index
    %c1_242 = arith.constant 1 : index
    %c0_243 = arith.constant 0 : index
    %c0_244 = arith.constant 0 : index
    %201 = vector.load %arg8[%c0_241, %c1_242, %c0_243, %c0_244] : memref<3x18x16x128xf32, #tpu.memory_space<vmem>>, vector<1x8x16x128xf32>
    %202 = vector.shape_cast %201 : vector<1x8x16x128xf32> to vector<8x16x128xf32>
    %203 = vector.shape_cast %202 : vector<8x16x128xf32> to vector<128x128xf32>
    %c1_245 = arith.constant 1 : index
    %c0_246 = arith.constant 0 : index
    %c0_247 = arith.constant 0 : index
    %c0_248 = arith.constant 0 : index
    %204 = vector.load %arg4[%c1_245, %c0_246, %c0_247, %c0_248] : memref<3x3x128x128xf32, #tpu.memory_space<vmem>>, vector<1x1x128x128xf32>
    %205 = vector.shape_cast %204 : vector<1x1x128x128xf32> to vector<128x128xf32>
    %cst_249 = arith.constant dense<0.000000e+00> : vector<128x128xf32>
    %206 = tpu.matmul %203, %205, %cst_249 {dimension_numbers = #tpu.dot_dimension_numbers<[1], [0], [0], [1], [0, 0, 1, 1], [], []>} : vector<128x128xf32>, vector<128x128xf32>, vector<128x128xf32> -> vector<128x128xf32>
    %207 = arith.addf %200, %206 : vector<128x128xf32>
    %c1_250 = arith.constant 1 : index
    %c1_251 = arith.constant 1 : index
    %c0_252 = arith.constant 0 : index
    %c0_253 = arith.constant 0 : index
    %208 = vector.load %arg8[%c1_250, %c1_251, %c0_252, %c0_253] : memref<3x18x16x128xf32, #tpu.memory_space<vmem>>, vector<1x8x16x128xf32>
    %209 = vector.shape_cast %208 : vector<1x8x16x128xf32> to vector<8x16x128xf32>
    %210 = vector.shape_cast %209 : vector<8x16x128xf32> to vector<128x128xf32>
    %c1_254 = arith.constant 1 : index
    %c1_255 = arith.constant 1 : index
    %c0_256 = arith.constant 0 : index
    %c0_257 = arith.constant 0 : index
    %211 = vector.load %arg4[%c1_254, %c1_255, %c0_256, %c0_257] : memref<3x3x128x128xf32, #tpu.memory_space<vmem>>, vector<1x1x128x128xf32>
    %212 = vector.shape_cast %211 : vector<1x1x128x128xf32> to vector<128x128xf32>
    %cst_258 = arith.constant dense<0.000000e+00> : vector<128x128xf32>
    %213 = tpu.matmul %210, %212, %cst_258 {dimension_numbers = #tpu.dot_dimension_numbers<[1], [0], [0], [1], [0, 0, 1, 1], [], []>} : vector<128x128xf32>, vector<128x128xf32>, vector<128x128xf32> -> vector<128x128xf32>
    %214 = arith.addf %207, %213 : vector<128x128xf32>
    %c2_259 = arith.constant 2 : index
    %c1_260 = arith.constant 1 : index
    %c0_261 = arith.constant 0 : index
    %c0_262 = arith.constant 0 : index
    %215 = vector.load %arg8[%c2_259, %c1_260, %c0_261, %c0_262] : memref<3x18x16x128xf32, #tpu.memory_space<vmem>>, vector<1x8x16x128xf32>
    %216 = vector.shape_cast %215 : vector<1x8x16x128xf32> to vector<8x16x128xf32>
    %217 = vector.shape_cast %216 : vector<8x16x128xf32> to vector<128x128xf32>
    %c1_263 = arith.constant 1 : index
    %c2_264 = arith.constant 2 : index
    %c0_265 = arith.constant 0 : index
    %c0_266 = arith.constant 0 : index
    %218 = vector.load %arg4[%c1_263, %c2_264, %c0_265, %c0_266] : memref<3x3x128x128xf32, #tpu.memory_space<vmem>>, vector<1x1x128x128xf32>
    %219 = vector.shape_cast %218 : vector<1x1x128x128xf32> to vector<128x128xf32>
    %cst_267 = arith.constant dense<0.000000e+00> : vector<128x128xf32>
    %220 = tpu.matmul %217, %219, %cst_267 {dimension_numbers = #tpu.dot_dimension_numbers<[1], [0], [0], [1], [0, 0, 1, 1], [], []>} : vector<128x128xf32>, vector<128x128xf32>, vector<128x128xf32> -> vector<128x128xf32>
    %221 = arith.addf %214, %220 : vector<128x128xf32>
    %c0_268 = arith.constant 0 : index
    %c2_269 = arith.constant 2 : index
    %c0_270 = arith.constant 0 : index
    %c0_271 = arith.constant 0 : index
    %222 = vector.load %arg8[%c0_268, %c2_269, %c0_270, %c0_271] : memref<3x18x16x128xf32, #tpu.memory_space<vmem>>, vector<1x8x16x128xf32>
    %223 = vector.shape_cast %222 : vector<1x8x16x128xf32> to vector<8x16x128xf32>
    %224 = vector.shape_cast %223 : vector<8x16x128xf32> to vector<128x128xf32>
    %c2_272 = arith.constant 2 : index
    %c0_273 = arith.constant 0 : index
    %c0_274 = arith.constant 0 : index
    %c0_275 = arith.constant 0 : index
    %225 = vector.load %arg4[%c2_272, %c0_273, %c0_274, %c0_275] : memref<3x3x128x128xf32, #tpu.memory_space<vmem>>, vector<1x1x128x128xf32>
    %226 = vector.shape_cast %225 : vector<1x1x128x128xf32> to vector<128x128xf32>
    %cst_276 = arith.constant dense<0.000000e+00> : vector<128x128xf32>
    %227 = tpu.matmul %224, %226, %cst_276 {dimension_numbers = #tpu.dot_dimension_numbers<[1], [0], [0], [1], [0, 0, 1, 1], [], []>} : vector<128x128xf32>, vector<128x128xf32>, vector<128x128xf32> -> vector<128x128xf32>
    %228 = arith.addf %221, %227 : vector<128x128xf32>
    %c1_277 = arith.constant 1 : index
    %c2_278 = arith.constant 2 : index
    %c0_279 = arith.constant 0 : index
    %c0_280 = arith.constant 0 : index
    %229 = vector.load %arg8[%c1_277, %c2_278, %c0_279, %c0_280] : memref<3x18x16x128xf32, #tpu.memory_space<vmem>>, vector<1x8x16x128xf32>
    %230 = vector.shape_cast %229 : vector<1x8x16x128xf32> to vector<8x16x128xf32>
    %231 = vector.shape_cast %230 : vector<8x16x128xf32> to vector<128x128xf32>
    %c2_281 = arith.constant 2 : index
    %c1_282 = arith.constant 1 : index
    %c0_283 = arith.constant 0 : index
    %c0_284 = arith.constant 0 : index
    %232 = vector.load %arg4[%c2_281, %c1_282, %c0_283, %c0_284] : memref<3x3x128x128xf32, #tpu.memory_space<vmem>>, vector<1x1x128x128xf32>
    %233 = vector.shape_cast %232 : vector<1x1x128x128xf32> to vector<128x128xf32>
    %cst_285 = arith.constant dense<0.000000e+00> : vector<128x128xf32>
    %234 = tpu.matmul %231, %233, %cst_285 {dimension_numbers = #tpu.dot_dimension_numbers<[1], [0], [0], [1], [0, 0, 1, 1], [], []>} : vector<128x128xf32>, vector<128x128xf32>, vector<128x128xf32> -> vector<128x128xf32>
    %235 = arith.addf %228, %234 : vector<128x128xf32>
    %c2_286 = arith.constant 2 : index
    %c2_287 = arith.constant 2 : index
    %c0_288 = arith.constant 0 : index
    %c0_289 = arith.constant 0 : index
    %236 = vector.load %arg8[%c2_286, %c2_287, %c0_288, %c0_289] : memref<3x18x16x128xf32, #tpu.memory_space<vmem>>, vector<1x8x16x128xf32>
    %237 = vector.shape_cast %236 : vector<1x8x16x128xf32> to vector<8x16x128xf32>
    %238 = vector.shape_cast %237 : vector<8x16x128xf32> to vector<128x128xf32>
    %c2_290 = arith.constant 2 : index
    %c2_291 = arith.constant 2 : index
    %c0_292 = arith.constant 0 : index
    %c0_293 = arith.constant 0 : index
    %239 = vector.load %arg4[%c2_290, %c2_291, %c0_292, %c0_293] : memref<3x3x128x128xf32, #tpu.memory_space<vmem>>, vector<1x1x128x128xf32>
    %240 = vector.shape_cast %239 : vector<1x1x128x128xf32> to vector<128x128xf32>
    %cst_294 = arith.constant dense<0.000000e+00> : vector<128x128xf32>
    %241 = tpu.matmul %238, %240, %cst_294 {dimension_numbers = #tpu.dot_dimension_numbers<[1], [0], [0], [1], [0, 0, 1, 1], [], []>} : vector<128x128xf32>, vector<128x128xf32>, vector<128x128xf32> -> vector<128x128xf32>
    %242 = arith.addf %235, %241 : vector<128x128xf32>
    %c0_295 = arith.constant 0 : index
    %c0_296 = arith.constant 0 : index
    %243 = vector.load %arg5[%c0_295, %c0_296] : memref<1x128xf32, #tpu.memory_space<vmem>>, vector<1x128xf32>
    %244 = vector.broadcast %243 : vector<1x128xf32> to vector<128x128xf32>
    %245 = arith.addf %242, %244 : vector<128x128xf32>
    %246 = vector.shape_cast %245 : vector<128x128xf32> to vector<8x16x128xf32>
    %247 = vector.extract_strided_slice %246 {offsets = [0, 0, 0], sizes = [8, 16, 4], strides = [1, 1, 1]} : vector<8x16x128xf32> to vector<8x16x4xf32>
    %c0_297 = arith.constant 0 : index
    %c0_298 = arith.constant 0 : index
    %c0_299 = arith.constant 0 : index
    %c0_300 = arith.constant 0 : index
    %248 = vector.load %arg1[%c0_297, %c0_298, %c0_299, %c0_300] : memref<1x16x16x4xf32, #tpu.memory_space<vmem>>, vector<1x8x16x4xf32>
    %249 = vector.shape_cast %248 : vector<1x8x16x4xf32> to vector<8x16x4xf32>
    %250 = arith.addf %249, %247 : vector<8x16x4xf32>
    %c0_301 = arith.constant 0 : index
    %c0_302 = arith.constant 0 : index
    %c0_303 = arith.constant 0 : index
    %c0_304 = arith.constant 0 : index
    %251 = vector.load %arg6[%c0_301, %c0_302, %c0_303, %c0_304] : memref<1x16x16x4xf32, #tpu.memory_space<vmem>>, vector<1x8x16x4xf32>
    %252 = vector.shape_cast %251 : vector<1x8x16x4xf32> to vector<8x16x4xf32>
    %253 = vector.shape_cast %250 : vector<8x16x4xf32> to vector<1x8x16x4xf32>
    tpu.vector_store %arg6[%c0_301, %c0_302, %c0_303, %c0_304], %253 {strides = array<i32>} : memref<1x16x16x4xf32, #tpu.memory_space<vmem>>, vector<1x8x16x4xf32>,
    %cst_305 = arith.constant 0.000000e+00 : f32
    %254 = vector.broadcast %cst_305 : f32 to vector<128x128xf32>
    %c0_306 = arith.constant 0 : index
    %c8_307 = arith.constant 8 : index
    %c0_308 = arith.constant 0 : index
    %c0_309 = arith.constant 0 : index
    %255 = vector.load %arg8[%c0_306, %c8_307, %c0_308, %c0_309] : memref<3x18x16x128xf32, #tpu.memory_space<vmem>>, vector<1x8x16x128xf32>
    %256 = vector.shape_cast %255 : vector<1x8x16x128xf32> to vector<8x16x128xf32>
    %257 = vector.shape_cast %256 : vector<8x16x128xf32> to vector<128x128xf32>
    %c0_310 = arith.constant 0 : index
    %c0_311 = arith.constant 0 : index
    %c0_312 = arith.constant 0 : index
    %c0_313 = arith.constant 0 : index
    %258 = vector.load %arg4[%c0_310, %c0_311, %c0_312, %c0_313] : memref<3x3x128x128xf32, #tpu.memory_space<vmem>>, vector<1x1x128x128xf32>
    %259 = vector.shape_cast %258 : vector<1x1x128x128xf32> to vector<128x128xf32>
    %cst_314 = arith.constant dense<0.000000e+00> : vector<128x128xf32>
    %260 = tpu.matmul %257, %259, %cst_314 {dimension_numbers = #tpu.dot_dimension_numbers<[1], [0], [0], [1], [0, 0, 1, 1], [], []>} : vector<128x128xf32>, vector<128x128xf32>, vector<128x128xf32> -> vector<128x128xf32>
    %261 = arith.addf %254, %260 : vector<128x128xf32>
    %c1_315 = arith.constant 1 : index
    %c8_316 = arith.constant 8 : index
    %c0_317 = arith.constant 0 : index
    %c0_318 = arith.constant 0 : index
    %262 = vector.load %arg8[%c1_315, %c8_316, %c0_317, %c0_318] : memref<3x18x16x128xf32, #tpu.memory_space<vmem>>, vector<1x8x16x128xf32>
    %263 = vector.shape_cast %262 : vector<1x8x16x128xf32> to vector<8x16x128xf32>
    %264 = vector.shape_cast %263 : vector<8x16x128xf32> to vector<128x128xf32>
    %c0_319 = arith.constant 0 : index
    %c1_320 = arith.constant 1 : index
    %c0_321 = arith.constant 0 : index
    %c0_322 = arith.constant 0 : index
    %265 = vector.load %arg4[%c0_319, %c1_320, %c0_321, %c0_322] : memref<3x3x128x128xf32, #tpu.memory_space<vmem>>, vector<1x1x128x128xf32>
    %266 = vector.shape_cast %265 : vector<1x1x128x128xf32> to vector<128x128xf32>
    %cst_323 = arith.constant dense<0.000000e+00> : vector<128x128xf32>
    %267 = tpu.matmul %264, %266, %cst_323 {dimension_numbers = #tpu.dot_dimension_numbers<[1], [0], [0], [1], [0, 0, 1, 1], [], []>} : vector<128x128xf32>, vector<128x128xf32>, vector<128x128xf32> -> vector<128x128xf32>
    %268 = arith.addf %261, %267 : vector<128x128xf32>
    %c2_324 = arith.constant 2 : index
    %c8_325 = arith.constant 8 : index
    %c0_326 = arith.constant 0 : index
    %c0_327 = arith.constant 0 : index
    %269 = vector.load %arg8[%c2_324, %c8_325, %c0_326, %c0_327] : memref<3x18x16x128xf32, #tpu.memory_space<vmem>>, vector<1x8x16x128xf32>
    %270 = vector.shape_cast %269 : vector<1x8x16x128xf32> to vector<8x16x128xf32>
    %271 = vector.shape_cast %270 : vector<8x16x128xf32> to vector<128x128xf32>
    %c0_328 = arith.constant 0 : index
    %c2_329 = arith.constant 2 : index
    %c0_330 = arith.constant 0 : index
    %c0_331 = arith.constant 0 : index
    %272 = vector.load %arg4[%c0_328, %c2_329, %c0_330, %c0_331] : memref<3x3x128x128xf32, #tpu.memory_space<vmem>>, vector<1x1x128x128xf32>
    %273 = vector.shape_cast %272 : vector<1x1x128x128xf32> to vector<128x128xf32>
    %cst_332 = arith.constant dense<0.000000e+00> : vector<128x128xf32>
    %274 = tpu.matmul %271, %273, %cst_332 {dimension_numbers = #tpu.dot_dimension_numbers<[1], [0], [0], [1], [0, 0, 1, 1], [], []>} : vector<128x128xf32>, vector<128x128xf32>, vector<128x128xf32> -> vector<128x128xf32>
    %275 = arith.addf %268, %274 : vector<128x128xf32>
    %c0_333 = arith.constant 0 : index
    %c9_334 = arith.constant 9 : index
    %c0_335 = arith.constant 0 : index
    %c0_336 = arith.constant 0 : index
    %276 = vector.load %arg8[%c0_333, %c9_334, %c0_335, %c0_336] : memref<3x18x16x128xf32, #tpu.memory_space<vmem>>, vector<1x8x16x128xf32>
    %277 = vector.shape_cast %276 : vector<1x8x16x128xf32> to vector<8x16x128xf32>
    %278 = vector.shape_cast %277 : vector<8x16x128xf32> to vector<128x128xf32>
    %c1_337 = arith.constant 1 : index
    %c0_338 = arith.constant 0 : index
    %c0_339 = arith.constant 0 : index
    %c0_340 = arith.constant 0 : index
    %279 = vector.load %arg4[%c1_337, %c0_338, %c0_339, %c0_340] : memref<3x3x128x128xf32, #tpu.memory_space<vmem>>, vector<1x1x128x128xf32>
    %280 = vector.shape_cast %279 : vector<1x1x128x128xf32> to vector<128x128xf32>
    %cst_341 = arith.constant dense<0.000000e+00> : vector<128x128xf32>
    %281 = tpu.matmul %278, %280, %cst_341 {dimension_numbers = #tpu.dot_dimension_numbers<[1], [0], [0], [1], [0, 0, 1, 1], [], []>} : vector<128x128xf32>, vector<128x128xf32>, vector<128x128xf32> -> vector<128x128xf32>
    %282 = arith.addf %275, %281 : vector<128x128xf32>
    %c1_342 = arith.constant 1 : index
    %c9_343 = arith.constant 9 : index
    %c0_344 = arith.constant 0 : index
    %c0_345 = arith.constant 0 : index
    %283 = vector.load %arg8[%c1_342, %c9_343, %c0_344, %c0_345] : memref<3x18x16x128xf32, #tpu.memory_space<vmem>>, vector<1x8x16x128xf32>
    %284 = vector.shape_cast %283 : vector<1x8x16x128xf32> to vector<8x16x128xf32>
    %285 = vector.shape_cast %284 : vector<8x16x128xf32> to vector<128x128xf32>
    %c1_346 = arith.constant 1 : index
    %c1_347 = arith.constant 1 : index
    %c0_348 = arith.constant 0 : index
    %c0_349 = arith.constant 0 : index
    %286 = vector.load %arg4[%c1_346, %c1_347, %c0_348, %c0_349] : memref<3x3x128x128xf32, #tpu.memory_space<vmem>>, vector<1x1x128x128xf32>
    %287 = vector.shape_cast %286 : vector<1x1x128x128xf32> to vector<128x128xf32>
    %cst_350 = arith.constant dense<0.000000e+00> : vector<128x128xf32>
    %288 = tpu.matmul %285, %287, %cst_350 {dimension_numbers = #tpu.dot_dimension_numbers<[1], [0], [0], [1], [0, 0, 1, 1], [], []>} : vector<128x128xf32>, vector<128x128xf32>, vector<128x128xf32> -> vector<128x128xf32>
    %289 = arith.addf %282, %288 : vector<128x128xf32>
    %c2_351 = arith.constant 2 : index
    %c9_352 = arith.constant 9 : index
    %c0_353 = arith.constant 0 : index
    %c0_354 = arith.constant 0 : index
    %290 = vector.load %arg8[%c2_351, %c9_352, %c0_353, %c0_354] : memref<3x18x16x128xf32, #tpu.memory_space<vmem>>, vector<1x8x16x128xf32>
    %291 = vector.shape_cast %290 : vector<1x8x16x128xf32> to vector<8x16x128xf32>
    %292 = vector.shape_cast %291 : vector<8x16x128xf32> to vector<128x128xf32>
    %c1_355 = arith.constant 1 : index
    %c2_356 = arith.constant 2 : index
    %c0_357 = arith.constant 0 : index
    %c0_358 = arith.constant 0 : index
    %293 = vector.load %arg4[%c1_355, %c2_356, %c0_357, %c0_358] : memref<3x3x128x128xf32, #tpu.memory_space<vmem>>, vector<1x1x128x128xf32>
    %294 = vector.shape_cast %293 : vector<1x1x128x128xf32> to vector<128x128xf32>
    %cst_359 = arith.constant dense<0.000000e+00> : vector<128x128xf32>
    %295 = tpu.matmul %292, %294, %cst_359 {dimension_numbers = #tpu.dot_dimension_numbers<[1], [0], [0], [1], [0, 0, 1, 1], [], []>} : vector<128x128xf32>, vector<128x128xf32>, vector<128x128xf32> -> vector<128x128xf32>
    %296 = arith.addf %289, %295 : vector<128x128xf32>
    %c0_360 = arith.constant 0 : index
    %c10_361 = arith.constant 10 : index
    %c0_362 = arith.constant 0 : index
    %c0_363 = arith.constant 0 : index
    %297 = vector.load %arg8[%c0_360, %c10_361, %c0_362, %c0_363] : memref<3x18x16x128xf32, #tpu.memory_space<vmem>>, vector<1x8x16x128xf32>
    %298 = vector.shape_cast %297 : vector<1x8x16x128xf32> to vector<8x16x128xf32>
    %299 = vector.shape_cast %298 : vector<8x16x128xf32> to vector<128x128xf32>
    %c2_364 = arith.constant 2 : index
    %c0_365 = arith.constant 0 : index
    %c0_366 = arith.constant 0 : index
    %c0_367 = arith.constant 0 : index
    %300 = vector.load %arg4[%c2_364, %c0_365, %c0_366, %c0_367] : memref<3x3x128x128xf32, #tpu.memory_space<vmem>>, vector<1x1x128x128xf32>
    %301 = vector.shape_cast %300 : vector<1x1x128x128xf32> to vector<128x128xf32>
    %cst_368 = arith.constant dense<0.000000e+00> : vector<128x128xf32>
    %302 = tpu.matmul %299, %301, %cst_368 {dimension_numbers = #tpu.dot_dimension_numbers<[1], [0], [0], [1], [0, 0, 1, 1], [], []>} : vector<128x128xf32>, vector<128x128xf32>, vector<128x128xf32> -> vector<128x128xf32>
    %303 = arith.addf %296, %302 : vector<128x128xf32>
    %c1_369 = arith.constant 1 : index
    %c10_370 = arith.constant 10 : index
    %c0_371 = arith.constant 0 : index
    %c0_372 = arith.constant 0 : index
    %304 = vector.load %arg8[%c1_369, %c10_370, %c0_371, %c0_372] : memref<3x18x16x128xf32, #tpu.memory_space<vmem>>, vector<1x8x16x128xf32>
    %305 = vector.shape_cast %304 : vector<1x8x16x128xf32> to vector<8x16x128xf32>
    %306 = vector.shape_cast %305 : vector<8x16x128xf32> to vector<128x128xf32>
    %c2_373 = arith.constant 2 : index
    %c1_374 = arith.constant 1 : index
    %c0_375 = arith.constant 0 : index
    %c0_376 = arith.constant 0 : index
    %307 = vector.load %arg4[%c2_373, %c1_374, %c0_375, %c0_376] : memref<3x3x128x128xf32, #tpu.memory_space<vmem>>, vector<1x1x128x128xf32>
    %308 = vector.shape_cast %307 : vector<1x1x128x128xf32> to vector<128x128xf32>
    %cst_377 = arith.constant dense<0.000000e+00> : vector<128x128xf32>
    %309 = tpu.matmul %306, %308, %cst_377 {dimension_numbers = #tpu.dot_dimension_numbers<[1], [0], [0], [1], [0, 0, 1, 1], [], []>} : vector<128x128xf32>, vector<128x128xf32>, vector<128x128xf32> -> vector<128x128xf32>
    %310 = arith.addf %303, %309 : vector<128x128xf32>
    %c2_378 = arith.constant 2 : index
    %c10_379 = arith.constant 10 : index
    %c0_380 = arith.constant 0 : index
    %c0_381 = arith.constant 0 : index
    %311 = vector.load %arg8[%c2_378, %c10_379, %c0_380, %c0_381] : memref<3x18x16x128xf32, #tpu.memory_space<vmem>>, vector<1x8x16x128xf32>
    %312 = vector.shape_cast %311 : vector<1x8x16x128xf32> to vector<8x16x128xf32>
    %313 = vector.shape_cast %312 : vector<8x16x128xf32> to vector<128x128xf32>
    %c2_382 = arith.constant 2 : index
    %c2_383 = arith.constant 2 : index
    %c0_384 = arith.constant 0 : index
    %c0_385 = arith.constant 0 : index
    %314 = vector.load %arg4[%c2_382, %c2_383, %c0_384, %c0_385] : memref<3x3x128x128xf32, #tpu.memory_space<vmem>>, vector<1x1x128x128xf32>
    %315 = vector.shape_cast %314 : vector<1x1x128x128xf32> to vector<128x128xf32>
    %cst_386 = arith.constant dense<0.000000e+00> : vector<128x128xf32>
    %316 = tpu.matmul %313, %315, %cst_386 {dimension_numbers = #tpu.dot_dimension_numbers<[1], [0], [0], [1], [0, 0, 1, 1], [], []>} : vector<128x128xf32>, vector<128x128xf32>, vector<128x128xf32> -> vector<128x128xf32>
    %317 = arith.addf %310, %316 : vector<128x128xf32>
    %c0_387 = arith.constant 0 : index
    %c0_388 = arith.constant 0 : index
    %318 = vector.load %arg5[%c0_387, %c0_388] : memref<1x128xf32, #tpu.memory_space<vmem>>, vector<1x128xf32>
    %319 = vector.broadcast %318 : vector<1x128xf32> to vector<128x128xf32>
    %320 = arith.addf %317, %319 : vector<128x128xf32>
    %321 = vector.shape_cast %320 : vector<128x128xf32> to vector<8x16x128xf32>
    %322 = vector.extract_strided_slice %321 {offsets = [0, 0, 0], sizes = [8, 16, 4], strides = [1, 1, 1]} : vector<8x16x128xf32> to vector<8x16x4xf32>
    %c0_389 = arith.constant 0 : index
    %c8_390 = arith.constant 8 : index
    %c0_391 = arith.constant 0 : index
    %c0_392 = arith.constant 0 : index
    %323 = vector.load %arg1[%c0_389, %c8_390, %c0_391, %c0_392] : memref<1x16x16x4xf32, #tpu.memory_space<vmem>>, vector<1x8x16x4xf32>
    %324 = vector.shape_cast %323 : vector<1x8x16x4xf32> to vector<8x16x4xf32>
    %325 = arith.addf %324, %322 : vector<8x16x4xf32>
    %c0_393 = arith.constant 0 : index
    %c8_394 = arith.constant 8 : index
    %c0_395 = arith.constant 0 : index
    %c0_396 = arith.constant 0 : index
    %326 = vector.load %arg6[%c0_393, %c8_394, %c0_395, %c0_396] : memref<1x16x16x4xf32, #tpu.memory_space<vmem>>, vector<1x8x16x4xf32>
    %327 = vector.shape_cast %326 : vector<1x8x16x4xf32> to vector<8x16x4xf32>
    %328 = vector.shape_cast %325 : vector<8x16x4xf32> to vector<1x8x16x4xf32>
    tpu.vector_store %arg6[%c0_393, %c8_394, %c0_395, %c0_396], %328 {strides = array<i32>} : memref<1x16x16x4xf32, #tpu.memory_space<vmem>>, vector<1x8x16x4xf32>,
    return
  }
  func.func @transform_0(%arg0: i32) -> (i32, i32, i32, i32) {
    %c0_i32 = arith.constant 0 : i32
    %c0_i32_0 = arith.constant 0 : i32
    %c0_i32_1 = arith.constant 0 : i32
    %c0_i32_2 = arith.constant 0 : i32
    return %arg0, %c0_i32, %c0_i32_0, %c0_i32_1 : i32, i32, i32, i32
  }
  func.func @transform_1(%arg0: i32) -> (i32, i32, i32, i32) {
    %c0_i32 = arith.constant 0 : i32
    %c0_i32_0 = arith.constant 0 : i32
    %c0_i32_1 = arith.constant 0 : i32
    %c0_i32_2 = arith.constant 0 : i32
    %c0_i32_3 = arith.constant 0 : i32
    return %c0_i32, %c0_i32_0, %c0_i32_1, %c0_i32_2 : i32, i32, i32, i32
  }
  func.func @transform_2(%arg0: i32) -> (i32, i32) {
    %c0_i32 = arith.constant 0 : i32
    %c0_i32_0 = arith.constant 0 : i32
    %c0_i32_1 = arith.constant 0 : i32
    return %c0_i32, %c0_i32_0 : i32, i32
  }
  func.func @transform_3(%arg0: i32) -> (i32, i32, i32, i32) {
    %c0_i32 = arith.constant 0 : i32
    %c0_i32_0 = arith.constant 0 : i32
    %c0_i32_1 = arith.constant 0 : i32
    %c0_i32_2 = arith.constant 0 : i32
    %c0_i32_3 = arith.constant 0 : i32
    return %c0_i32, %c0_i32_0, %c0_i32_1, %c0_i32_2 : i32, i32, i32, i32
  }
  func.func @transform_4(%arg0: i32) -> (i32, i32) {
    %c0_i32 = arith.constant 0 : i32
    %c0_i32_0 = arith.constant 0 : i32
    %c0_i32_1 = arith.constant 0 : i32
    return %c0_i32, %c0_i32_0 : i32, i32
  }
  func.func @transform_5(%arg0: i32) -> (i32, i32, i32, i32) {
    %c0_i32 = arith.constant 0 : i32
    %c0_i32_0 = arith.constant 0 : i32
    %c0_i32_1 = arith.constant 0 : i32
    %c0_i32_2 = arith.constant 0 : i32
    return %arg0, %c0_i32, %c0_i32_0, %c0_i32_1 : i32, i32, i32, i32
  }
}

</mosaic_0001>

<bundles_post_ra>
// kernel: tpu_custom_call.1
= control target key start
LH: loop header
LB: loop body
LE: loop exit
PB: predicated region body
PF: predicated region fallthrough
CT: control target
= control target key end

     0   :  { %10 = vsyncpa [#allocation5], 0  ;;  %s14696_s0 = inlined_call_operand.vmem [shape: f32[2,16,16,4], index: 0, kind: input, shape index: {}]   ;;  %s14697_s1 = inlined_call_operand.hbm [shape: f32[3,3,128,128], index: 1, kind: input, shape index: {}]   ;;  %s14698_s2 = inlined_call_operand.vmem [shape: f32[1,128], index: 2, kind: input, shape index: {}]   ;;  %s14699_s3 = inlined_call_operand.hbm [shape: f32[3,3,128,128], index: 3, kind: input, shape index: {}]   ;;  %s14700_s4 = inlined_call_operand.vmem [shape: f32[1,128], index: 4, kind: input, shape index: {}]   ;;  %s14701_s5 = inlined_call_operand.vmem [shape: f32[2,16,16,4], index: 5, kind: output, shape index: {}]  }
   0x1   :  { %11 = vsyncpa [#allocation7], 0  ;;  %s12895_s18 = smov 0  }
   0x2 LB: > { %s12901_s19 = sadd.s32 4294967295, %s12858_s18   ;;  %p7869_p0 = scmp.ge.s32.totalorder %s12858_s18, 1  ;;  %s12858_s18 = sphi %s12895_s18, %s17_s18  }
   0x3   : > { %p158_p1 = scmp.lt.s32.totalorder %s12858_s18, 3  ;;  %s12860_s20 = smov [#allocation4]  }
   0x4   : > { %s170_s21 = sshll.u32 %s12860_s20, 4  ;;  %p14702_p3 = scmp.eq.s32.totalorder %s12901_s19, 0  ;;  %s171_s21 = int_to_ptr.vmem [resolvable:$true] %s170_s21 }
   0x5   : > { %p12905_p2 = pnand %p7869_p0, %p158_p1  ;;  %s12861_s23 = smov [#allocation6]  }
   0x6   : > { %s186_s24 = sshll.u32 %s12861_s23, 4  ;;  %s12788_s28 = scalar_lea.hbm %s14697_s1, 18432  ;;  %s12918_s24 = int_to_ptr.vmem [resolvable:$true] %s186_s24 }
   0x7   : > { %s14705_s22 = scalar_select %p12905_p2, 1, 0 }
   0x8   : > { %p12760_p4 = pneg %p12905_p2  ;;  %p12789_p6 = scmp.ne.s32.totalorder %s14697_s1, %s12788_s28 }
   0x9   : > { %p12795_p10 = scmp.lt.u32.totalorder %s12788_s28, %s14697_s1 }
   0xa   : > { %p12914_p5 = pnand %p14702_p3, %p12760_p4 }
   0xc   : > { %p12790_p7 = pneg %p12914_p5 }
   0xe   : > { %p12791_p8 = pnand %p12790_p7, %p12789_p6 }
  0x10   : > { %p12792_p9 = pneg %p12791_p8 }
  0x12   : > { %p12797_p11 = pnand %p12795_p10, %p12792_p9 }
  0x14   : > { %12800 = shalt.err (!%p12797_p11)
}
  0x15   : > { %s12801_s8 = scalar_lea.vmem %s171_s21, 18432  ;;  %p12809_p1 = scmp.lt.s32.totalorder %s171_s21, %s171_s21 }
  0x16   : > { %p12802_p12 = scmp.ne.s32.totalorder %s171_s21, %s12801_s8  ;;  %p12810_p4 = scmp.lt.s32.totalorder %s12801_s8, %s12801_s8 }
  0x18   : > { %p12804_p13 = pnand %p12802_p12, %p12790_p7  ;;  %p12811_p3 = por %p12810_p4, %p12809_p1 }
  0x1a   : > { %p12805_p0 = pneg %p12804_p13 }
  0x1c   : > { %p12812_p2 = pnand %p12811_p3, %p12805_p0 }
  0x1e   : > { %12815 = shalt.err (!%p12812_p2)
}
  0x1f   : > { %s12862_s9 = smov 128   ;;  %s12863_s10 = smov 8  }
  0x20   : > { %12763 = dma.hbm_to_vmem [thread:$0]  (!%p12914_p5), %s14697_s1, 18432, %s171_s21, [#allocation5], %s12862_s9, %s12862_s9, %s12863_s10  }
  0x21   : > { %s12816_s15 = scalar_lea.hbm %s14699_s3, 18432 }
  0x22   : > { %p12817_p6 = scmp.ne.s32.totalorder %s14699_s3, %s12816_s15  ;;  %p12823_p8 = scmp.lt.u32.totalorder %s12816_s15, %s14699_s3 }
  0x24   : > { %p12819_p2 = pnand %p12817_p6, %p12790_p7 }
  0x26   : > { %p12820_p3 = pneg %p12819_p2 }
  0x28   : > { %p12825_p9 = pnand %p12823_p8, %p12820_p3 }
  0x2a   : > { %12828 = shalt.err (!%p12825_p9)
}
  0x2b   : > { %s12829_s21 = scalar_lea.vmem %s12918_s24, 18432  ;;  %p12837_p13 = scmp.lt.s32.totalorder %s12918_s24, %s12918_s24 }
  0x2c   : > { %p12830_p10 = scmp.ne.s32.totalorder %s12918_s24, %s12829_s21  ;;  %p12838_p0 = scmp.lt.s32.totalorder %s12829_s21, %s12829_s21 }
  0x2e   : > { %p12832_p11 = pnand %p12830_p10, %p12790_p7  ;;  %p12839_p1 = por %p12838_p0, %p12837_p13 }
  0x30   : > { %p12833_p12 = pneg %p12832_p11 }
  0x32   : > { %p12840_p4 = pnand %p12839_p1, %p12833_p12 }
  0x34   : > { %12843 = shalt.err (!%p12840_p4)
}
  0x35   : > { %12766 = dma.hbm_to_vmem [thread:$0]  (!%p12914_p5), %s14699_s3, 18432, %s12918_s24, [#allocation7], %s12862_s9, %s12862_s9, %s12863_s10  }
  0x36   : > { %p14707_p6 = scmp.ne.s32.totalorder %s14705_s22, 0 }
  0x38   : > { %213 = sbr.rel (%p14707_p6) target bundleno = 1184 (0x4a0), region = 40 }
  0x3f   : > { %p14708_p2 = scmp.eq.s32.totalorder %s12901_s19, 0 }
  0x41   : > { %12849 = dma.done.wait (%p14708_p2), [#allocation5], 18432   ;;  %p14709_p7 = pmov %p14708_p2 }
  0x42   : > { %p14710_p3 = pmov %p14708_p2 }
  0x43   : > { %12851 = vsyncadd (%p14709_p7), [#allocation5], 4294948864 }
  0x44   : > { %12853 = dma.done.wait (%p14710_p3), [#allocation7], 18432   ;;  %p14711_p8 = pmov %p14708_p2 }
  0x45   : > { %p245_p9 = scmp.lt.s32.totalorder %s12901_s19, 1  ;;  %v12864_v0 = vmov 0.0   ;;  %v655_v1 = vld [vmem:[#allocation4 + $0x80] sm:$0xff]  ;;  %v656_v2 = vld [vmem:[#allocation4 + $0x88] sm:$0xff]  ;;  %v657_v3 = vld [vmem:[#allocation4 + $0x90] sm:$0xff]  ;;  %vm504_vm0 = vcmask 31744  }
  0x46   : > { %12855 = vsyncadd (%p14711_p8), [#allocation7], 4294948864  ;;  %291 = vst [vmem:[#allocation2 + $0x120] sm:$0xff] %v12864_v0  ;;  %9104 = vmatprep.mubr.f32.mxu0 %v12864_v0  ;;  %v11088_v4 = vpack.c.bf16 %v656_v2, %v655_v1  ;;  %v658_v5 = vld [vmem:[#allocation4 + $0x98] sm:$0xff]  ;;  %v659_v7 = vld [vmem:[#allocation4 + $0xa0] sm:$0xff]  ;;  %vm572_vm1 = vcmask 31745  }
  0x47   : > { %257 = vst [vmem:[#allocation2 + $0x10] sm:$0xff] %v12864_v0  ;;  %258 = vst [vmem:[#allocation2 + $0x18] sm:$0xff] %v12864_v0  ;;  %s14715_s19 = smov (!%p245_p9, %s12901_s19), 1  ;;  %v11092_v6 = vpack.c.bf16 %v658_v5, %v657_v3  ;;  %v660_v8 = vld [vmem:[#allocation4 + $0xa8] sm:$0xff]  ;;  %vm539_vm2 = vcmask 30720   ;;  %v661_v10 = vld [vmem:[#allocation4 + $0xb0] sm:$0xff] }
  0x48   : > { %259 = vst [vmem:[#allocation2 + $0x20] sm:$0xff] %v12864_v0  ;;  %260 = vst [vmem:[#allocation2 + $0x28] sm:$0xff] %v12864_v0  ;;  %s7918_s22 = sshll.u32 %s14715_s19, 8  ;;  %11089 = vmatprep.subr.bf16.mxu0 %v11088_v4  ;;  %11377 = vmatprep.subr.bf16.mxu1 %v11088_v4  ;;  %v11096_v9 = vpack.c.bf16 %v660_v8, %v659_v7  ;;  %v662_v12 = vld [vmem:[#allocation4 + $0xb8] sm:$0xff]  ;;  %v663_v20 = vld [vmem:[#allocation4 + $0xc0] sm:$0xff] }
  0x49   : > { %261 = vst [vmem:[#allocation2 + $0x30] sm:$0xff] %v12864_v0  ;;  %262 = vst [vmem:[#allocation2 + $0x38] sm:$0xff] %v12864_v0  ;;  %s13151_s28 = scalar_lea.vmem %s14696_s0, %s7918_s22  ;;  %11091 = vmatpush3.bf16.msra.mxu0 %v11088_v4  ;;  %11379 = vmatpush3.bf16.msra.mxu1 %v11088_v4  ;;  %v11100_v19 = vpack.c.bf16 %v662_v12, %v661_v10  ;;  %v664_v23 = vld [vmem:[#allocation4 + $0xc8] sm:$0xff]  ;;  %v665_v34 = vld [vmem:[#allocation4 + $0xd0] sm:$0xff]  ;;  %s14566_s10 = scalar_lea.vmem %s14701_s5, %s7918_s22 }
  0x4a   : > { %263 = vst [vmem:[#allocation2 + $0x40] sm:$0xff] %v12864_v0  ;;  %264 = vst [vmem:[#allocation2 + $0x48] sm:$0xff] %v12864_v0  ;;  %11093 = vmatprep.subr.bf16.mxu0 %v11092_v6  ;;  %11381 = vmatprep.subr.bf16.mxu1 %v11092_v6  ;;  %v485_v11 = vld [vmem:[%s13151_s28 + $0x70] sm:$0xff]  ;;  %v486_v13 = vld [vmem:[%s13151_s28 + $0x78] sm:$0xff]  ;;  %v11104_v30 = vpack.c.bf16 %v664_v23, %v663_v20 }
  0x4b   : > { %265 = vst [vmem:[#allocation2 + $0x50] sm:$0xff] %v12864_v0  ;;  %266 = vst [vmem:[#allocation2 + $0x58] sm:$0xff] %v12864_v0  ;;  %v471_v14 = vld [vmem:[%s13151_s28] sm:$0xff]  ;;  %v472_v16 = vld [vmem:[%s13151_s28 + $0x8] sm:$0xff] }
  0x4c   : > { %267 = vst [vmem:[#allocation2 + $0x60] sm:$0xff] %v12864_v0  ;;  %268 = vst [vmem:[#allocation2 + $0x68] sm:$0xff] %v12864_v0  ;;  %v487_v15 = vld [vmem:[%s13151_s28 + $0x80] sm:$0xff]  ;;  %v488_v17 = vld [vmem:[%s13151_s28 + $0x88] sm:$0xff] }
  0x4d   : > { %269 = vst [vmem:[#allocation2 + $0x70] sm:$0xff] %v12864_v0  ;;  %270 = vst [vmem:[#allocation2 + $0x78] sm:$0xff] %v12864_v0  ;;  %11095 = vmatpush3.bf16.msra.mxu0 %v11092_v6  ;;  %11383 = vmatpush3.bf16.msra.mxu1 %v11092_v6  ;;  %v473_v18 = vld [vmem:[%s13151_s28 + $0x10] sm:$0xff]  ;;  %v474_v22 = vld [vmem:[%s13151_s28 + $0x18] sm:$0xff] }
  0x4e   : > { %271 = vst [vmem:[#allocation2 + $0x80] sm:$0xff] %v12864_v0  ;;  %272 = vst [vmem:[#allocation2 + $0x88] sm:$0xff] %v12864_v0  ;;  %11097 = vmatprep.subr.bf16.mxu0 %v11096_v9  ;;  %11385 = vmatprep.subr.bf16.mxu1 %v11096_v9  ;;  %v489_v21 = vld [vmem:[%s13151_s28 + $0x90] sm:$0xff]  ;;  %v490_v24 = vld [vmem:[%s13151_s28 + $0x98] sm:$0xff] }
  0x4f   : > { %273 = vst [vmem:[#allocation2 + $0x90] sm:$0xff] %v12864_v0  ;;  %274 = vst [vmem:[#allocation2 + $0x98] sm:$0xff] %v12864_v0  ;;  %v475_v25 = vld [vmem:[%s13151_s28 + $0x20] sm:$0xff]  ;;  %v476_v27 = vld [vmem:[%s13151_s28 + $0x28] sm:$0xff] }
  0x50   : > { %275 = vst [vmem:[#allocation2 + $0xa0] sm:$0xff] %v12864_v0  ;;  %276 = vst [vmem:[#allocation2 + $0xa8] sm:$0xff] %v12864_v0  ;;  %v491_v26 = vld [vmem:[%s13151_s28 + $0xa0] sm:$0xff]  ;;  %v492_v28 = vld [vmem:[%s13151_s28 + $0xa8] sm:$0xff] }
  0x51   : > { %277 = vst [vmem:[#allocation2 + $0xb0] sm:$0xff] %v12864_v0  ;;  %278 = vst [vmem:[#allocation2 + $0xb8] sm:$0xff] %v12864_v0  ;;  %11099 = vmatpush3.bf16.msra.mxu0 %v11096_v9  ;;  %11387 = vmatpush3.bf16.msra.mxu1 %v11096_v9  ;;  %v477_v29 = vld [vmem:[%s13151_s28 + $0x30] sm:$0xff]  ;;  %v478_v33 = vld [vmem:[%s13151_s28 + $0x38] sm:$0xff] }
  0x52   : > { %279 = vst [vmem:[#allocation2 + $0xc0] sm:$0xff] %v12864_v0  ;;  %280 = vst [vmem:[#allocation2 + $0xc8] sm:$0xff] %v12864_v0  ;;  %11101 = vmatprep.subr.bf16.mxu0 %v11100_v19  ;;  %11389 = vmatprep.subr.bf16.mxu1 %v11100_v19  ;;  %v493_v32 = vld [vmem:[%s13151_s28 + $0xb0] sm:$0xff]  ;;  %v666_v35 = vld [vmem:[#allocation4 + $0xd8] sm:$0xff] }
  0x53   : > { %281 = vst [vmem:[#allocation2 + $0xd0] sm:$0xff] %v12864_v0  ;;  %282 = vst [vmem:[#allocation2 + $0xd8] sm:$0xff] %v12864_v0  ;;  %v494_v36 = vld [vmem:[%s13151_s28 + $0xb8] sm:$0xff]  ;;  %v11108_v37 = vpack.c.bf16 %v666_v35, %v665_v34  ;;  %v479_v38 = vld [vmem:[%s13151_s28 + $0x40] sm:$0xff] }
  0x54   : > { %283 = vst [vmem:[#allocation2 + $0xe0] sm:$0xff] %v12864_v0  ;;  %284 = vst [vmem:[#allocation2 + $0xe8] sm:$0xff] %v12864_v0  ;;  %v667_v39 = vld [vmem:[#allocation4 + $0xe0] sm:$0xff]  ;;  %v668_v40 = vld [vmem:[#allocation4 + $0xe8] sm:$0xff] }
  0x55   : > { %285 = vst [vmem:[#allocation2 + $0xf0] sm:$0xff] %v12864_v0  ;;  %286 = vst [vmem:[#allocation2 + $0xf8] sm:$0xff] %v12864_v0  ;;  %11103 = vmatpush3.bf16.msra.mxu0 %v11100_v19  ;;  %11391 = vmatpush3.bf16.msra.mxu1 %v11100_v19  ;;  %v495_v41 = vld [vmem:[%s13151_s28 + $0xc0] sm:$0xff]  ;;  %v480_v42 = vld [vmem:[%s13151_s28 + $0x48] sm:$0xff]  ;;  %v11112_v43 = vpack.c.bf16 %v668_v40, %v667_v39 }
  0x56   : > { %287 = vst [vmem:[#allocation2 + $0x100] sm:$0xff] %v12864_v0  ;;  %288 = vst [vmem:[#allocation2 + $0x108] sm:$0xff] %v12864_v0  ;;  %11105 = vmatprep.subr.bf16.mxu0 %v11104_v30  ;;  %11393 = vmatprep.subr.bf16.mxu1 %v11104_v30  ;;  %v669_v44 = vld [vmem:[#allocation4 + $0xf0] sm:$0xff]  ;;  %v670_v45 = vld [vmem:[#allocation4 + $0xf8] sm:$0xff] }
  0x57   : > { %293 = vst [vmem:[#allocation2 + $0x130] sm:$0xff] %v12864_v0  ;;  %294 = vst [vmem:[#allocation2 + $0x138] sm:$0xff] %v12864_v0  ;;  %v496_v46 = vld [vmem:[%s13151_s28 + $0xc8] sm:$0xff]  ;;  %v481_v47 = vld [vmem:[%s13151_s28 + $0x50] sm:$0xff]  ;;  %v11116_v52 = vpack.c.bf16 %v670_v45, %v669_v44 }
  0x58   : > { %295 = vst [vmem:[#allocation2 + $0x140] sm:$0xff] %v12864_v0  ;;  %296 = vst [vmem:[#allocation2 + $0x148] sm:$0xff] %v12864_v0  ;;  %v497_v48 = vld [vmem:[%s13151_s28 + $0xd0] sm:$0xff]  ;;  %v482_v49 = vld [vmem:[%s13151_s28 + $0x58] sm:$0xff] }
  0x59   : > { %297 = vst [vmem:[#allocation2 + $0x150] sm:$0xff] %v12864_v0  ;;  %298 = vst [vmem:[#allocation2 + $0x158] sm:$0xff] %v12864_v0  ;;  %11107 = vmatpush3.bf16.msra.mxu0 %v11104_v30  ;;  %11395 = vmatpush3.bf16.msra.mxu1 %v11104_v30  ;;  %v498_v50 = vld [vmem:[%s13151_s28 + $0xd8] sm:$0xff]  ;;  %v483_v51 = vld [vmem:[%s13151_s28 + $0x60] sm:$0xff] }
  0x5a   : > { %299 = vst [vmem:[#allocation2 + $0x160] sm:$0xff] %v12864_v0  ;;  %300 = vst [vmem:[#allocation2 + $0x168] sm:$0xff] %v12864_v0  ;;  %11109 = vmatprep.subr.bf16.mxu0 %v11108_v37  ;;  %11397 = vmatprep.subr.bf16.mxu1 %v11108_v37  ;;  %v499_v53 = vld [vmem:[%s13151_s28 + $0xe0] sm:$0xff]  ;;  %v484_v54 = vld [vmem:[%s13151_s28 + $0x68] sm:$0xff] }
  0x5b   : > { %301 = vst [vmem:[#allocation2 + $0x170] sm:$0xff] %v12864_v0  ;;  %302 = vst [vmem:[#allocation2 + $0x178] sm:$0xff] %v12864_v0  ;;  %v621_v55 = vld [vmem:[#allocation4] sm:$0xff]  ;;  %v622_v56 = vld [vmem:[#allocation4 + $0x8] sm:$0xff] }
  0x5c   : > { %303 = vst [vmem:[#allocation2 + $0x180] sm:$0xff] %v12864_v0  ;;  %304 = vst [vmem:[#allocation2 + $0x188] sm:$0xff] %v12864_v0  ;;  %v500_v57 = vld [vmem:[%s13151_s28 + $0xe8] sm:$0xff]  ;;  %v11120_v58 = vpack.c.bf16 %v622_v56, %v621_v55  ;;  %v623_v59 = vld [vmem:[#allocation4 + $0x10] sm:$0xff] }
  0x5d   : > { %305 = vst [vmem:[#allocation2 + $0x190] sm:$0xff] %v12864_v0  ;;  %306 = vst [vmem:[#allocation2 + $0x198] sm:$0xff] %v12864_v0  ;;  %11111 = vmatpush3.bf16.msra.mxu0 %v11108_v37  ;;  %11399 = vmatpush3.bf16.msra.mxu1 %v11108_v37  ;;  %v624_v60 = vld [vmem:[#allocation4 + $0x18] sm:$0xff]  ;;  %v625_v2 = vld [vmem:[#allocation4 + $0x20] sm:$0xff] }
  0x5e   : > { %307 = vst [vmem:[#allocation2 + $0x1a0] sm:$0xff] %v12864_v0  ;;  %308 = vst [vmem:[#allocation2 + $0x1a8] sm:$0xff] %v12864_v0  ;;  %11113 = vmatprep.subr.bf16.mxu0 %v11112_v43  ;;  %11401 = vmatprep.subr.bf16.mxu1 %v11112_v43  ;;  %v11124_v1 = vpack.c.bf16 %v624_v60, %v623_v59  ;;  %v626_v3 = vld [vmem:[#allocation4 + $0x28] sm:$0xff]  ;;  %v627_v9 = vld [vmem:[#allocation4 + $0x30] sm:$0xff] }
  0x5f   : > { %309 = vst [vmem:[#allocation2 + $0x1b0] sm:$0xff] %v12864_v0  ;;  %310 = vst [vmem:[#allocation2 + $0x1b8] sm:$0xff] %v12864_v0  ;;  %v11128_v8 = vpack.c.bf16 %v626_v3, %v625_v2  ;;  %v628_v10 = vld [vmem:[#allocation4 + $0x38] sm:$0xff]  ;;  %v631_v23 = vld [vmem:[#allocation4 + $0x50] sm:$0xff] }
  0x60   : > { %311 = vst [vmem:[#allocation2 + $0x1c0] sm:$0xff] %v12864_v0  ;;  %312 = vst [vmem:[#allocation2 + $0x1c8] sm:$0xff] %v12864_v0  ;;  %v633_v30 = vld [vmem:[#allocation4 + $0x60] sm:$0xff]  ;;  %v635_v37 = vld [vmem:[#allocation4 + $0x70] sm:$0xff] }
  0x61   : > { %313 = vst [vmem:[#allocation2 + $0x1d0] sm:$0xff] %v12864_v0  ;;  %314 = vst [vmem:[#allocation2 + $0x1d8] sm:$0xff] %v12864_v0  ;;  %11115 = vmatpush3.bf16.msra.mxu0 %v11112_v43  ;;  %11403 = vmatpush3.bf16.msra.mxu1 %v11112_v43  ;;  %v979_v44 = vld [vmem:[#allocation4 + $0x100] sm:$0xff]  ;;  %v980_v45 = vld [vmem:[#allocation4 + $0x108] sm:$0xff] }
  0x62   : > { %315 = vst [vmem:[#allocation2 + $0x1e0] sm:$0xff] %v12864_v0  ;;  %316 = vst [vmem:[#allocation2 + $0x1e8] sm:$0xff] %v12864_v0  ;;  %11117 = vmatprep.subr.bf16.mxu0 %v11116_v52  ;;  %11405 = vmatprep.subr.bf16.mxu1 %v11116_v52  ;;  %v501_v56 = vld [vmem:[%s13151_s28 + $0xf0] sm:$0xff]  ;;  %v502_v59 = vld [vmem:[%s13151_s28 + $0xf8] sm:$0xff] }
  0x63   : > { %317 = vst [vmem:[#allocation2 + $0x1f0] sm:$0xff] %v12864_v0  ;;  %318 = vst [vmem:[#allocation2 + $0x1f8] sm:$0xff] %v12864_v0  ;;  %v986_v2 = vld [vmem:[#allocation4 + $0x138] sm:$0xff] }
  0x64   : > { %319 = vst [vmem:[#allocation2 + $0x200] sm:$0xff] %v12864_v0  ;;  %320 = vst [vmem:[#allocation2 + $0x208] sm:$0xff] %v12864_v0 }
  0x65   : > { %321 = vst [vmem:[#allocation2 + $0x210] sm:$0xff] %v12864_v0  ;;  %322 = vst [vmem:[#allocation2 + $0x218] sm:$0xff] %v12864_v0  ;;  %11119 = vmatpush3.bf16.msra.mxu0 %v11116_v52  ;;  %11407 = vmatpush3.bf16.msra.mxu1 %v11116_v52 }
  0x66   : > { %323 = vst [vmem:[#allocation2 + $0x220] sm:$0xff] %v12864_v0  ;;  %324 = vst [vmem:[#allocation2 + $0x228] sm:$0xff] %v12864_v0  ;;  %11121 = vmatprep.subr.bf16.mxu0 %v11120_v58  ;;  %11409 = vmatprep.subr.bf16.mxu1 %v11120_v58 }
  0x67   : > { %329 = vst [vmem:[#allocation2 + $0x250] sm:$0xff] %v12864_v0  ;;  %330 = vst [vmem:[#allocation2 + $0x258] sm:$0xff] %v12864_v0 }
  0x68   : > { %331 = vst [vmem:[#allocation2 + $0x260] sm:$0xff] %v12864_v0  ;;  %332 = vst [vmem:[#allocation2 + $0x268] sm:$0xff] %v12864_v0  ;;  %9105 = vmatmul.mubr.f32.vlgmr.msra.gmra.mrb[0].mxu0 %v12864_v0 }
  0x69   : > { %333 = vst [vmem:[#allocation2 + $0x270] sm:$0xff] %v12864_v0  ;;  %334 = vst [vmem:[#allocation2 + $0x278] sm:$0xff] %v12864_v0  ;;  %11123 = vmatpush3.bf16.msra.mxu0 %v11120_v58 }
  0x6a   : > { %335 = vst [vmem:[#allocation2 + $0x280] sm:$0xff] %v12864_v0  ;;  %336 = vst [vmem:[#allocation2 + $0x288] sm:$0xff] %v12864_v0  ;;  %11125 = vmatprep.subr.bf16.mxu0 %v11124_v1 }
  0x6b   : > { %337 = vst [vmem:[#allocation2 + $0x290] sm:$0xff] %v12864_v0  ;;  %338 = vst [vmem:[#allocation2 + $0x298] sm:$0xff] %v12864_v0 }
  0x6c   : > { %339 = vst [vmem:[#allocation2 + $0x2a0] sm:$0xff] %v12864_v0  ;;  %340 = vst [vmem:[#allocation2 + $0x2a8] sm:$0xff] %v12864_v0 }
  0x6d   : > { %341 = vst [vmem:[#allocation2 + $0x2b0] sm:$0xff] %v12864_v0  ;;  %342 = vst [vmem:[#allocation2 + $0x2b8] sm:$0xff] %v12864_v0  ;;  %11127 = vmatpush3.bf16.msra.mxu0 %v11124_v1 }
  0x6e   : > { %343 = vst [vmem:[#allocation2 + $0x2c0] sm:$0xff] %v12864_v0  ;;  %344 = vst [vmem:[#allocation2 + $0x2c8] sm:$0xff] %v12864_v0  ;;  %11129 = vmatprep.subr.bf16.mxu0 %v11128_v8 }
  0x6f   : > { %345 = vst [vmem:[#allocation2 + $0x2d0] sm:$0xff] %v12864_v0  ;;  %346 = vst [vmem:[#allocation2 + $0x2d8] sm:$0xff] %v12864_v0 }
  0x70   : > { %347 = vst [vmem:[#allocation2 + $0x2e0] sm:$0xff] %v12864_v0  ;;  %348 = vst [vmem:[#allocation2 + $0x2e8] sm:$0xff] %v12864_v0 }
  0x71   : > { %349 = vst [vmem:[#allocation2 + $0x2f0] sm:$0xff] %v12864_v0  ;;  %350 = vst [vmem:[#allocation2 + $0x2f8] sm:$0xff] %v12864_v0  ;;  %11131 = vmatpush3.bf16.msra.mxu0 %v11128_v8 }
  0x72   : > { %351 = vst [vmem:[#allocation2 + $0x300] sm:$0xff] %v12864_v0  ;;  %352 = vst [vmem:[#allocation2 + $0x308] sm:$0xff] %v12864_v0 }
  0x73   : > { %353 = vst [vmem:[#allocation2 + $0x310] sm:$0xff] %v12864_v0  ;;  %354 = vst [vmem:[#allocation2 + $0x318] sm:$0xff] %v12864_v0 }
  0x74   : > { %355 = vst [vmem:[#allocation2 + $0x320] sm:$0xff] %v12864_v0  ;;  %356 = vst [vmem:[#allocation2 + $0x328] sm:$0xff] %v12864_v0 }
  0x75   : > { %357 = vst [vmem:[#allocation2 + $0x330] sm:$0xff] %v12864_v0  ;;  %358 = vst [vmem:[#allocation2 + $0x338] sm:$0xff] %v12864_v0 }
  0x76   : > { %359 = vst [vmem:[#allocation2 + $0x340] sm:$0xff] %v12864_v0  ;;  %360 = vst [vmem:[#allocation2 + $0x348] sm:$0xff] %v12864_v0 }
  0x77   : > { %365 = vst [vmem:[#allocation3 + $0x10] sm:$0xff] %v12864_v0  ;;  %366 = vst [vmem:[#allocation3 + $0x18] sm:$0xff] %v12864_v0 }
  0x78   : > { %367 = vst [vmem:[#allocation3 + $0x20] sm:$0xff] %v12864_v0  ;;  %368 = vst [vmem:[#allocation3 + $0x28] sm:$0xff] %v12864_v0 }
  0x79   : > { %369 = vst [vmem:[#allocation3 + $0x30] sm:$0xff] %v12864_v0  ;;  %370 = vst [vmem:[#allocation3 + $0x38] sm:$0xff] %v12864_v0 }
  0x7a   : > { %371 = vst [vmem:[#allocation3 + $0x40] sm:$0xff] %v12864_v0  ;;  %372 = vst [vmem:[#allocation3 + $0x48] sm:$0xff] %v12864_v0 }
  0x7b   : > { %373 = vst [vmem:[#allocation3 + $0x50] sm:$0xff] %v12864_v0  ;;  %374 = vst [vmem:[#allocation3 + $0x58] sm:$0xff] %v12864_v0 }
  0x7c   : > { %375 = vst [vmem:[#allocation3 + $0x60] sm:$0xff] %v12864_v0  ;;  %376 = vst [vmem:[#allocation3 + $0x68] sm:$0xff] %v12864_v0 }
  0x7d   : > { %377 = vst [vmem:[#allocation3 + $0x70] sm:$0xff] %v12864_v0  ;;  %378 = vst [vmem:[#allocation3 + $0x78] sm:$0xff] %v12864_v0 }
  0x7e   : > { %379 = vst [vmem:[#allocation3 + $0x80] sm:$0xff] %v12864_v0  ;;  %380 = vst [vmem:[#allocation3 + $0x88] sm:$0xff] %v12864_v0 }
  0x7f   : > { %381 = vst [vmem:[#allocation3 + $0x90] sm:$0xff] %v12864_v0  ;;  %382 = vst [vmem:[#allocation3 + $0x98] sm:$0xff] %v12864_v0 }
  0x80   : > { %383 = vst [vmem:[#allocation3 + $0xa0] sm:$0xff] %v12864_v0  ;;  %384 = vst [vmem:[#allocation3 + $0xa8] sm:$0xff] %v12864_v0 }
  0x81   : > { %385 = vst [vmem:[#allocation3 + $0xb0] sm:$0xff] %v12864_v0  ;;  %386 = vst [vmem:[#allocation3 + $0xb8] sm:$0xff] %v12864_v0 }
  0x82   : > { %387 = vst [vmem:[#allocation3 + $0xc0] sm:$0xff] %v12864_v0  ;;  %388 = vst [vmem:[#allocation3 + $0xc8] sm:$0xff] %v12864_v0 }
  0x83   : > { %389 = vst [vmem:[#allocation3 + $0xd0] sm:$0xff] %v12864_v0  ;;  %390 = vst [vmem:[#allocation3 + $0xd8] sm:$0xff] %v12864_v0 }
  0x84   : > { %391 = vst [vmem:[#allocation3 + $0xe0] sm:$0xff] %v12864_v0  ;;  %392 = vst [vmem:[#allocation3 + $0xe8] sm:$0xff] %v12864_v0 }
  0x85   : > { %393 = vst [vmem:[#allocation3 + $0xf0] sm:$0xff] %v12864_v0  ;;  %394 = vst [vmem:[#allocation3 + $0xf8] sm:$0xff] %v12864_v0 }
  0x86   : > { %395 = vst [vmem:[#allocation3 + $0x100] sm:$0xff] %v12864_v0  ;;  %396 = vst [vmem:[#allocation3 + $0x108] sm:$0xff] %v12864_v0 }
  0x87   : > { %437 = vst [vmem:[#allocation3 + $0x250] sm:$0xff] %v12864_v0  ;;  %438 = vst [vmem:[#allocation3 + $0x258] sm:$0xff] %v12864_v0 }
  0x88   : > { %439 = vst [vmem:[#allocation3 + $0x260] sm:$0xff] %v12864_v0  ;;  %440 = vst [vmem:[#allocation3 + $0x268] sm:$0xff] %v12864_v0 }
  0x89   : > { %441 = vst [vmem:[#allocation3 + $0x270] sm:$0xff] %v12864_v0  ;;  %442 = vst [vmem:[#allocation3 + $0x278] sm:$0xff] %v12864_v0 }
  0x8a   : > { %443 = vst [vmem:[#allocation3 + $0x280] sm:$0xff] %v12864_v0  ;;  %444 = vst [vmem:[#allocation3 + $0x288] sm:$0xff] %v12864_v0 }
  0x8b   : > { %445 = vst [vmem:[#allocation3 + $0x290] sm:$0xff] %v12864_v0  ;;  %446 = vst [vmem:[#allocation3 + $0x298] sm:$0xff] %v12864_v0 }
  0x8c   : > { %447 = vst [vmem:[#allocation3 + $0x2a0] sm:$0xff] %v12864_v0  ;;  %448 = vst [vmem:[#allocation3 + $0x2a8] sm:$0xff] %v12864_v0 }
  0x8d   : > { %449 = vst [vmem:[#allocation3 + $0x2b0] sm:$0xff] %v12864_v0  ;;  %450 = vst [vmem:[#allocation3 + $0x2b8] sm:$0xff] %v12864_v0 }
  0x8e   : > { %451 = vst [vmem:[#allocation3 + $0x2c0] sm:$0xff] %v12864_v0  ;;  %452 = vst [vmem:[#allocation3 + $0x2c8] sm:$0xff] %v12864_v0 }
  0x8f   : > { %453 = vst [vmem:[#allocation3 + $0x2d0] sm:$0xff] %v12864_v0  ;;  %454 = vst [vmem:[#allocation3 + $0x2d8] sm:$0xff] %v12864_v0 }
  0x90   : > { %455 = vst [vmem:[#allocation3 + $0x2e0] sm:$0xff] %v12864_v0  ;;  %456 = vst [vmem:[#allocation3 + $0x2e8] sm:$0xff] %v12864_v0 }
  0x91   : > { %457 = vst [vmem:[#allocation3 + $0x2f0] sm:$0xff] %v12864_v0  ;;  %458 = vst [vmem:[#allocation3 + $0x2f8] sm:$0xff] %v12864_v0 }
  0x92   : > { %459 = vst [vmem:[#allocation3 + $0x300] sm:$0xff] %v12864_v0  ;;  %460 = vst [vmem:[#allocation3 + $0x308] sm:$0xff] %v12864_v0 }
  0x93   : > { %461 = vst [vmem:[#allocation3 + $0x310] sm:$0xff] %v12864_v0  ;;  %462 = vst [vmem:[#allocation3 + $0x318] sm:$0xff] %v12864_v0 }
  0x94   : > { %463 = vst [vmem:[#allocation3 + $0x320] sm:$0xff] %v12864_v0  ;;  %464 = vst [vmem:[#allocation3 + $0x328] sm:$0xff] %v12864_v0 }
  0x95   : > { %465 = vst [vmem:[#allocation3 + $0x330] sm:$0xff] %v12864_v0  ;;  %466 = vst [vmem:[#allocation3 + $0x338] sm:$0xff] %v12864_v0 }
  0x96   : > { %467 = vst [vmem:[#allocation3 + $0x340] sm:$0xff] %v12864_v0  ;;  %468 = vst [vmem:[#allocation3 + $0x348] sm:$0xff] %v12864_v0 }
  0x97   : > { %519 = vst.msk [vmem:[#allocation2 + $0x1a0] sm:$0xff] %vm504_vm0, %v485_v11  ;;  %553 = vst.msk [vmem:[#allocation2 + $0x81] sm:$0xff] %vm504_vm0, %v485_v11 }
  0x98   : > { %587 = vst.msk [vmem:[#allocation2 + $0x2bf] sm:$0xfe] %vm572_vm1, %v485_v11  ;;  %573 = vst.msk [vmem:[#allocation2 + $0x24f] sm:$0xfe] %vm572_vm1, %v471_v14 }
  0x99   : > { %520 = vst.msk [vmem:[#allocation2 + $0x1a8] sm:$0xff] %vm504_vm0, %v486_v13  ;;  %588 = vst.msk [vmem:[#allocation2 + $0x2c7] sm:$0xff] %vm504_vm0, %v486_v13 }
  0x9a   : > { %505 = vst.msk [vmem:[#allocation2 + $0x130] sm:$0xff] %vm504_vm0, %v471_v14  ;;  %538 = vst.msk [vmem:[#allocation2 + $0x11] sm:$0xff] %vm504_vm0, %v471_v14 }
  0x9b   : > { %554 = vst.msk [vmem:[#allocation2 + $0x89] sm:$0x7f] %vm539_vm2, %v486_v13  ;;  %540 = vst.msk [vmem:[#allocation2 + $0x19] sm:$0x7f] %vm539_vm2, %v472_v16 }
  0x9c   : > { %521 = vst.msk [vmem:[#allocation2 + $0x1b0] sm:$0xff] %vm504_vm0, %v487_v15  ;;  %555 = vst.msk [vmem:[#allocation2 + $0x91] sm:$0xff] %vm504_vm0, %v487_v15 }
  0x9d   : > { %506 = vst.msk [vmem:[#allocation2 + $0x138] sm:$0xff] %vm504_vm0, %v472_v16  ;;  %574 = vst.msk [vmem:[#allocation2 + $0x257] sm:$0xff] %vm504_vm0, %v472_v16  ;;  %v629_v16 = vld [vmem:[#allocation4 + $0x40] sm:$0xff] }
  0x9e   : > { %589 = vst.msk [vmem:[#allocation2 + $0x2cf] sm:$0xfe] %vm572_vm1, %v487_v15  ;;  %575 = vst.msk [vmem:[#allocation2 + $0x25f] sm:$0xfe] %vm572_vm1, %v473_v18  ;;  %v2447_v31 = vld [vmem:[#allocation2 + $0x1a0] sm:$0xff]  ;;  %v11132_v15 = vpack.c.bf16 %v628_v10, %v627_v9  ;;  %v988_v9 = vld [vmem:[#allocation4 + $0x148] sm:$0xff] }
  0x9f   : > { %522 = vst.msk [vmem:[#allocation2 + $0x1b8] sm:$0xff] %vm504_vm0, %v488_v17  ;;  %590 = vst.msk [vmem:[#allocation2 + $0x2d7] sm:$0xff] %vm504_vm0, %v488_v17  ;;  %9608 = vmatprep.mubr.f32.mxu1 %v2447_v31  ;;  %v634_v31 = vld [vmem:[#allocation4 + $0x68] sm:$0xff] }
  0xa0   : > { %507 = vst.msk [vmem:[#allocation2 + $0x140] sm:$0xff] %vm504_vm0, %v473_v18  ;;  %541 = vst.msk [vmem:[#allocation2 + $0x21] sm:$0xff] %vm504_vm0, %v473_v18  ;;  %v2448_v61 = vld [vmem:[#allocation2 + $0x1a8] sm:$0xff]  ;;  %11133 = vmatprep.subr.bf16.mxu0 %v11132_v15 }
  0xa1   : > { %556 = vst.msk [vmem:[#allocation2 + $0x99] sm:$0x7f] %vm539_vm2, %v488_v17  ;;  %542 = vst.msk [vmem:[#allocation2 + $0x29] sm:$0x7f] %vm539_vm2, %v474_v22  ;;  %v640_v62 = vld [vmem:[#allocation2 + $0x130] sm:$0xff]  ;;  %9609 = vmatmul.mubr.f32.vlgmr.msra.gmra.mrb[0].mxu1 %v2448_v61  ;;  %v630_v17 = vld [vmem:[#allocation4 + $0x48] sm:$0xff]  ;;  %11135 = vmatpush3.bf16.msra.mxu0 %v11132_v15 }
  0xa2   : > { %523 = vst.msk [vmem:[#allocation2 + $0x1c0] sm:$0xff] %vm504_vm0, %v489_v21  ;;  %557 = vst.msk [vmem:[#allocation2 + $0xa1] sm:$0xff] %vm504_vm0, %v489_v21  ;;  %11411 = vmatpush3.bf16.msra.mxu1 %v11120_v58  ;;  %9107 = vmatprep.mubr.f32.mxu0 %v640_v62  ;;  %v13276_v52 = vld [vmem:[#allocation2 + $0x88] sm:$0xff]  ;;  %v13291_v60 = vld [vmem:[#allocation2 + $0x18] sm:$0xff] }
  0xa3   : > { %508 = vst.msk [vmem:[#allocation2 + $0x148] sm:$0xff] %vm504_vm0, %v474_v22  ;;  %576 = vst.msk [vmem:[#allocation2 + $0x267] sm:$0xff] %vm504_vm0, %v474_v22  ;;  %v2449_v63 = vld [vmem:[#allocation2 + $0x1b0] sm:$0xff]  ;;  %11413 = vmatprep.subr.bf16.mxu1 %v11124_v1  ;;  %v11136_v22 = vpack.c.bf16 %v630_v17, %v629_v16  ;;  %v984_v58 = vld [vmem:[#allocation4 + $0x128] sm:$0xff] }
  0xa4   : > { %591 = vst.msk [vmem:[#allocation2 + $0x2df] sm:$0xfe] %vm572_vm1, %v489_v21  ;;  %577 = vst.msk [vmem:[#allocation2 + $0x26f] sm:$0xfe] %vm572_vm1, %v475_v25  ;;  %v641_v4 = vld [vmem:[#allocation2 + $0x138] sm:$0xff]  ;;  %9611 = vmatprep.mubr.f32.mxu1 %v2449_v63 }
  0xa5   : > { %524 = vst.msk [vmem:[#allocation2 + $0x1c8] sm:$0xff] %vm504_vm0, %v490_v24  ;;  %592 = vst.msk [vmem:[#allocation2 + $0x2e7] sm:$0xff] %vm504_vm0, %v490_v24  ;;  %9108 = vmatmul.mubr.f32.gmra.mrb[2].mxu0 %v641_v4  ;;  %11137 = vmatprep.subr.bf16.mxu0 %v11136_v22  ;;  %v990_v16 = vld [vmem:[#allocation4 + $0x158] sm:$0xff] }
  0xa6   : > { %509 = vst.msk [vmem:[#allocation2 + $0x150] sm:$0xff] %vm504_vm0, %v475_v25  ;;  %543 = vst.msk [vmem:[#allocation2 + $0x31] sm:$0xff] %vm504_vm0, %v475_v25  ;;  %v2450_v5 = vld [vmem:[#allocation2 + $0x1b8] sm:$0xff]  ;;  %11415 = vmatpush3.bf16.msra.mxu1 %v11124_v1  ;;  %11139 = vmatpush3.bf16.msra.mxu0 %v11136_v22  ;;  %v985_v1 = vld [vmem:[#allocation4 + $0x130] sm:$0xff] }
  0xa7   : > { %558 = vst.msk [vmem:[#allocation2 + $0xa9] sm:$0x7f] %vm539_vm2, %v490_v24  ;;  %544 = vst.msk [vmem:[#allocation2 + $0x39] sm:$0x7f] %vm539_vm2, %v476_v27  ;;  %v642_v6 = vld [vmem:[#allocation2 + $0x140] sm:$0xff]  ;;  %9612 = vmatmul.mubr.f32.gmra.mrb[2].mxu1 %v2450_v5  ;;  %11417 = vmatprep.subr.bf16.mxu1 %v11128_v8  ;;  %v632_v24 = vld [vmem:[#allocation4 + $0x58] sm:$0xff] }
  0xa8   : > { %525 = vst.msk [vmem:[#allocation2 + $0x1d0] sm:$0xff] %vm504_vm0, %v491_v26  ;;  %559 = vst.msk [vmem:[#allocation2 + $0xb1] sm:$0xff] %vm504_vm0, %v491_v26  ;;  %9110 = vmatprep.mubr.f32.mxu0 %v642_v6  ;;  %v13293_v61 = vld [vmem:[#allocation2 + $0x98] sm:$0xff]  ;;  %v13306_v3 = vld [vmem:[#allocation2 + $0x28] sm:$0xff] }
  0xa9   : > { %510 = vst.msk [vmem:[#allocation2 + $0x158] sm:$0xff] %vm504_vm0, %v476_v27  ;;  %578 = vst.msk [vmem:[#allocation2 + $0x277] sm:$0xff] %vm504_vm0, %v476_v27  ;;  %v2451_v7 = vld [vmem:[#allocation2 + $0x1c0] sm:$0xff] }
  0xaa   : > { %593 = vst.msk [vmem:[#allocation2 + $0x2ef] sm:$0xfe] %vm572_vm1, %v491_v26  ;;  %579 = vst.msk [vmem:[#allocation2 + $0x27f] sm:$0xfe] %vm572_vm1, %v477_v29  ;;  %v643_v11 = vld [vmem:[#allocation2 + $0x148] sm:$0xff]  ;;  %9614 = vmatprep.mubr.f32.mxu1 %v2451_v7  ;;  %11419 = vmatpush3.bf16.msra.mxu1 %v11128_v8  ;;  %v13302_v62 = vld [vmem:[#allocation2 + $0xa0] sm:$0xff]  ;;  %v11164_v7 = vpack.c.bf16 %v986_v2, %v985_v1 }
  0xab   : > { %526 = vst.msk [vmem:[#allocation2 + $0x1d8] sm:$0xff] %vm504_vm0, %v492_v28  ;;  %594 = vst.msk [vmem:[#allocation2 + $0x2f7] sm:$0xff] %vm504_vm0, %v492_v28  ;;  %9111 = vmatmul.mubr.f32.gmra.mrb[4].mxu0 %v643_v11  ;;  %11421 = vmatprep.subr.bf16.mxu1 %v11132_v15  ;;  %v987_v8 = vld [vmem:[#allocation4 + $0x140] sm:$0xff]  ;;  %v1180_v1 = vld [vmem:[#allocation4 + $0x1b8] sm:$0xff] }
  0xac   : > { %511 = vst.msk [vmem:[#allocation2 + $0x160] sm:$0xff] %vm504_vm0, %v477_v29  ;;  %545 = vst.msk [vmem:[#allocation2 + $0x41] sm:$0xff] %vm504_vm0, %v477_v29  ;;  %v2452_v12 = vld [vmem:[#allocation2 + $0x1c8] sm:$0xff]  ;;  %v11140_v29 = vpack.c.bf16 %v632_v24, %v631_v23 }
  0xad   : > { %560 = vst.msk [vmem:[#allocation2 + $0xb9] sm:$0x7f] %vm539_vm2, %v492_v28  ;;  %546 = vst.msk [vmem:[#allocation2 + $0x49] sm:$0x7f] %vm539_vm2, %v478_v33  ;;  %v644_v13 = vld [vmem:[#allocation2 + $0x150] sm:$0xff]  ;;  %9615 = vmatmul.mubr.f32.gmra.mrb[4].mxu1 %v2452_v12  ;;  %v992_v23 = vld [vmem:[#allocation4 + $0x168] sm:$0xff] }
  0xae   : > { %527 = vst.msk [vmem:[#allocation2 + $0x1e0] sm:$0xff] %vm504_vm0, %v493_v32  ;;  %561 = vst.msk [vmem:[#allocation2 + $0xc1] sm:$0xff] %vm504_vm0, %v493_v32  ;;  %9113 = vmatprep.mubr.f32.mxu0 %v644_v13  ;;  %11423 = vmatpush3.bf16.msra.mxu1 %v11132_v15  ;;  %v13308_v4 = vld [vmem:[#allocation2 + $0xa8] sm:$0xff]  ;;  %v13312_v5 = vld [vmem:[#allocation2 + $0x30] sm:$0xff] }
  0xaf   : > { %512 = vst.msk [vmem:[#allocation2 + $0x168] sm:$0xff] %vm504_vm0, %v478_v33  ;;  %580 = vst.msk [vmem:[#allocation2 + $0x287] sm:$0xff] %vm504_vm0, %v478_v33  ;;  %v2453_v14 = vld [vmem:[#allocation2 + $0x1d0] sm:$0xff]  ;;  %11425 = vmatprep.subr.bf16.mxu1 %v11136_v22  ;;  %11141 = vmatprep.subr.bf16.mxu0 %v11140_v29  ;;  %v13318_v10 = vld [vmem:[#allocation2 + $0x38] sm:$0xff] }
  0xb0   : > { %595 = vst.msk [vmem:[#allocation2 + $0x2ff] sm:$0xfe] %vm572_vm1, %v493_v32  ;;  %581 = vst.msk [vmem:[#allocation2 + $0x28f] sm:$0xfe] %vm572_vm1, %v479_v38  ;;  %v645_v18 = vld [vmem:[#allocation2 + $0x158] sm:$0xff]  ;;  %9617 = vmatprep.mubr.f32.mxu1 %v2453_v14  ;;  %11143 = vmatpush3.bf16.msra.mxu0 %v11140_v29  ;;  %v13314_v6 = vld [vmem:[#allocation2 + $0xb0] sm:$0xff]  ;;  %v11168_v14 = vpack.c.bf16 %v988_v9, %v987_v8 }
  0xb1   : > { %528 = vst.msk [vmem:[#allocation2 + $0x1e8] sm:$0xff] %vm504_vm0, %v494_v36  ;;  %596 = vst.msk [vmem:[#allocation2 + $0x307] sm:$0xff] %vm504_vm0, %v494_v36  ;;  %9114 = vmatmul.mubr.f32.gmra.mrb[6].mxu0 %v645_v18  ;;  %v989_v15 = vld [vmem:[#allocation4 + $0x150] sm:$0xff]  ;;  %v13390_v2 = vld [vmem:[#allocation2 + $0x268] sm:$0xff] }
  0xb2   : > { %562 = vst.msk [vmem:[#allocation2 + $0xc9] sm:$0x7f] %vm539_vm2, %v494_v36  ;;  %548 = vst.msk [vmem:[#allocation2 + $0x59] sm:$0x7f] %vm539_vm2, %v480_v42  ;;  %v2454_v19 = vld [vmem:[#allocation2 + $0x1d8] sm:$0xff]  ;;  %11427 = vmatpush3.bf16.msra.mxu1 %v11136_v22  ;;  %v11144_v36 = vpack.c.bf16 %v634_v31, %v633_v30  ;;  %v991_v22 = vld [vmem:[#allocation4 + $0x160] sm:$0xff] }
  0xb3   : > { %513 = vst.msk [vmem:[#allocation2 + $0x170] sm:$0xff] %vm504_vm0, %v479_v38  ;;  %547 = vst.msk [vmem:[#allocation2 + $0x51] sm:$0xff] %vm504_vm0, %v479_v38  ;;  %v646_v20 = vld [vmem:[#allocation2 + $0x160] sm:$0xff]  ;;  %9618 = vmatmul.mubr.f32.gmra.mrb[6].mxu1 %v2454_v19  ;;  %11429 = vmatprep.subr.bf16.mxu1 %v11140_v29  ;;  %v636_v38 = vld [vmem:[#allocation4 + $0x78] sm:$0xff] }
  0xb4   : > { %529 = vst.msk [vmem:[#allocation2 + $0x1f0] sm:$0xff] %vm504_vm0, %v495_v41  ;;  %563 = vst.msk [vmem:[#allocation2 + $0xd1] sm:$0xff] %vm504_vm0, %v495_v41  ;;  %9116 = vmatprep.mubr.f32.mxu0 %v646_v20  ;;  %11145 = vmatprep.subr.bf16.mxu0 %v11144_v36  ;;  %v11148_v43 = vpack.c.bf16 %v636_v38, %v635_v37  ;;  %v13320_v11 = vld [vmem:[#allocation2 + $0xb8] sm:$0xff]  ;;  %v13324_v12 = vld [vmem:[#allocation2 + $0x40] sm:$0xff] }
  0xb5   : > { %597 = vst.msk [vmem:[#allocation2 + $0x30f] sm:$0xfe] %vm572_vm1, %v495_v41  ;;  %583 = vst.msk [vmem:[#allocation2 + $0x29f] sm:$0xfe] %vm572_vm1, %v481_v47  ;;  %v2455_v21 = vld [vmem:[#allocation2 + $0x1e0] sm:$0xff]  ;;  %11147 = vmatpush3.bf16.msra.mxu0 %v11144_v36  ;;  %v13330_v17 = vld [vmem:[#allocation2 + $0x48] sm:$0xff] }
  0xb6   : > { %514 = vst.msk [vmem:[#allocation2 + $0x178] sm:$0xff] %vm504_vm0, %v480_v42  ;;  %582 = vst.msk [vmem:[#allocation2 + $0x297] sm:$0xff] %vm504_vm0, %v480_v42  ;;  %v647_v25 = vld [vmem:[#allocation2 + $0x168] sm:$0xff]  ;;  %9620 = vmatprep.mubr.f32.mxu1 %v2455_v21  ;;  %11431 = vmatpush3.bf16.msra.mxu1 %v11140_v29  ;;  %v13326_v13 = vld [vmem:[#allocation2 + $0xc0] sm:$0xff]  ;;  %v11172_v21 = vpack.c.bf16 %v990_v16, %v989_v15 }
  0xb7   : > { %530 = vst.msk [vmem:[#allocation2 + $0x1f8] sm:$0xff] %vm504_vm0, %v496_v46  ;;  %598 = vst.msk [vmem:[#allocation2 + $0x317] sm:$0xff] %vm504_vm0, %v496_v46  ;;  %9117 = vmatmul.mubr.f32.gmra.mrb[8].mxu0 %v647_v25  ;;  %11433 = vmatprep.subr.bf16.mxu1 %v11144_v36  ;;  %v993_v29 = vld [vmem:[#allocation4 + $0x170] sm:$0xff]  ;;  %v994_v30 = vld [vmem:[#allocation4 + $0x178] sm:$0xff] }
  0xb8   : > { %515 = vst.msk [vmem:[#allocation2 + $0x180] sm:$0xff] %vm504_vm0, %v481_v47  ;;  %549 = vst.msk [vmem:[#allocation2 + $0x61] sm:$0xff] %vm504_vm0, %v481_v47  ;;  %v2456_v26 = vld [vmem:[#allocation2 + $0x1e8] sm:$0xff]  ;;  %11149 = vmatprep.subr.bf16.mxu0 %v11148_v43  ;;  %v13396_v8 = vld [vmem:[#allocation2 + $0x270] sm:$0xff] }
  0xb9   : > { %531 = vst.msk [vmem:[#allocation2 + $0x200] sm:$0xff] %vm504_vm0, %v497_v48  ;;  %565 = vst.msk [vmem:[#allocation2 + $0xe1] sm:$0xff] %vm504_vm0, %v497_v48  ;;  %9621 = vmatmul.mubr.f32.gmra.mrb[8].mxu1 %v2456_v26  ;;  %11151 = vmatpush3.bf16.msra.mxu0 %v11148_v43  ;;  %v13332_v18 = vld [vmem:[#allocation2 + $0xc8] sm:$0xff]  ;;  %v13398_v9 = vld [vmem:[#allocation2 + $0x2f0] sm:$0xff] }
  0xba   : > { %564 = vst.msk [vmem:[#allocation2 + $0xd9] sm:$0x7f] %vm539_vm2, %v496_v46  ;;  %550 = vst.msk [vmem:[#allocation2 + $0x69] sm:$0x7f] %vm539_vm2, %v482_v49  ;;  %v648_v27 = vld [vmem:[#allocation2 + $0x170] sm:$0xff]  ;;  %11435 = vmatpush3.bf16.msra.mxu1 %v11144_v36  ;;  %v13342_v24 = vld [vmem:[#allocation2 + $0x58] sm:$0xff] }
  0xbb   : > { %599 = vst.msk [vmem:[#allocation2 + $0x31f] sm:$0xfe] %vm572_vm1, %v497_v48  ;;  %585 = vst.msk [vmem:[#allocation2 + $0x2af] sm:$0xfe] %vm572_vm1, %v483_v51  ;;  %v2457_v28 = vld [vmem:[#allocation2 + $0x1f0] sm:$0xff]  ;;  %9119 = vmatprep.mubr.f32.mxu0 %v648_v27  ;;  %11437 = vmatprep.subr.bf16.mxu1 %v11148_v43  ;;  %v13274_v48 = vld [vmem:[#allocation2 + $0x80] sm:$0xff] }
  0xbc   : > { %516 = vst.msk [vmem:[#allocation2 + $0x188] sm:$0xff] %vm504_vm0, %v482_v49  ;;  %584 = vst.msk [vmem:[#allocation2 + $0x2a7] sm:$0xff] %vm504_vm0, %v482_v49  ;;  %9623 = vmatprep.mubr.f32.mxu1 %v2457_v28  ;;  %v11152_v49 = vpack.c.bf16 %v980_v45, %v979_v44  ;;  %v13336_v19 = vld [vmem:[#allocation2 + $0x50] sm:$0xff]  ;;  %v11176_v28 = vpack.c.bf16 %v992_v23, %v991_v22  ;;  %v1173_v36 = vld [vmem:[#allocation4 + $0x180] sm:$0xff] }
  0xbd   : > { %532 = vst.msk [vmem:[#allocation2 + $0x208] sm:$0xff] %vm504_vm0, %v498_v50  ;;  %600 = vst.msk [vmem:[#allocation2 + $0x327] sm:$0xff] %vm504_vm0, %v498_v50  ;;  %v649_v32 = vld [vmem:[#allocation2 + $0x178] sm:$0xff]  ;;  %v13338_v20 = vld [vmem:[#allocation2 + $0xd0] sm:$0xff] }
  0xbe   : > { %517 = vst.msk [vmem:[#allocation2 + $0x190] sm:$0xff] %vm504_vm0, %v483_v51  ;;  %551 = vst.msk [vmem:[#allocation2 + $0x71] sm:$0xff] %vm504_vm0, %v483_v51  ;;  %v2458_v33 = vld [vmem:[#allocation2 + $0x1f8] sm:$0xff]  ;;  %9120 = vmatmul.mubr.f32.gmra.mrb[10].mxu0 %v649_v32  ;;  %11439 = vmatpush3.bf16.msra.mxu1 %v11148_v43  ;;  %v1174_v37 = vld [vmem:[#allocation4 + $0x188] sm:$0xff] }
  0xbf   : > { %566 = vst.msk [vmem:[#allocation2 + $0xe9] sm:$0x7f] %vm539_vm2, %v498_v50  ;;  %552 = vst.msk [vmem:[#allocation2 + $0x79] sm:$0x7f] %vm539_vm2, %v484_v54  ;;  %v650_v34 = vld [vmem:[#allocation2 + $0x180] sm:$0xff]  ;;  %9624 = vmatmul.mubr.f32.gmra.mrb[10].mxu1 %v2458_v33  ;;  %v981_v50 = vld [vmem:[#allocation4 + $0x110] sm:$0xff]  ;;  %11153 = vmatprep.subr.bf16.mxu0 %v11152_v49 }
  0xc0   : > { %533 = vst.msk [vmem:[#allocation2 + $0x210] sm:$0xff] %vm504_vm0, %v499_v53  ;;  %567 = vst.msk [vmem:[#allocation2 + $0xf1] sm:$0xff] %vm504_vm0, %v499_v53  ;;  %v2459_v35 = vld [vmem:[#allocation2 + $0x200] sm:$0xff]  ;;  %9122 = vmatprep.mubr.f32.mxu0 %v650_v34  ;;  %v982_v51 = vld [vmem:[#allocation4 + $0x118] sm:$0xff]  ;;  %11441 = vmatprep.subr.bf16.mxu1 %v11152_v49 }
  0xc1   : > { %518 = vst.msk [vmem:[#allocation2 + $0x198] sm:$0xff] %vm504_vm0, %v484_v54  ;;  %586 = vst.msk [vmem:[#allocation2 + $0x2b7] sm:$0xff] %vm504_vm0, %v484_v54  ;;  %9626 = vmatprep.mubr.f32.mxu1 %v2459_v35  ;;  %v13282_v54 = vld [vmem:[#allocation2 + $0x90] sm:$0xff]  ;;  %v11156_v55 = vpack.c.bf16 %v982_v51, %v981_v50  ;;  %v13344_v25 = vld [vmem:[#allocation2 + $0xd8] sm:$0xff]  ;;  %v11180_v35 = vpack.c.bf16 %v994_v30, %v993_v29 }
  0xc2   : > { %601 = vst.msk [vmem:[#allocation2 + $0x32f] sm:$0xfe] %vm572_vm1, %v499_v53  ;;  %v13280_v53 = vld [vmem:[#allocation2 + $0x10] sm:$0xff]  ;;  %603 = vst.msk [vmem:[#allocation2 + $0x33f] sm:$0xfe] %vm572_vm1, %v501_v56  ;;  %v13348_v26 = vld [vmem:[#allocation2 + $0x60] sm:$0xff] }
  0xc3   : > { %534 = vst.msk [vmem:[#allocation2 + $0x218] sm:$0xff] %vm504_vm0, %v500_v57  ;;  %602 = vst.msk [vmem:[#allocation2 + $0x337] sm:$0xff] %vm504_vm0, %v500_v57  ;;  %v651_v39 = vld [vmem:[#allocation2 + $0x188] sm:$0xff]  ;;  %v13350_v27 = vld [vmem:[#allocation2 + $0xe0] sm:$0xff] }
  0xc4   : > { %568 = vst.msk [vmem:[#allocation2 + $0xf9] sm:$0x7f] %vm539_vm2, %v500_v57  ;;  %v2460_v40 = vld [vmem:[#allocation2 + $0x208] sm:$0xff]  ;;  %9123 = vmatmul.mubr.f32.gmra.mrb[12].mxu0 %v651_v39  ;;  %v983_v57 = vld [vmem:[#allocation4 + $0x120] sm:$0xff]  ;;  %570 = vst.msk [vmem:[#allocation2 + $0x109] sm:$0x7f] %vm539_vm2, %v502_v59 }
  0xc5   : > { %v652_v41 = vld [vmem:[#allocation2 + $0x190] sm:$0xff]  ;;  %9627 = vmatmul.mubr.f32.gmra.mrb[12].mxu1 %v2460_v40  ;;  %569 = vst.msk [vmem:[#allocation2 + $0x101] sm:$0xff] %vm504_vm0, %v501_v56  ;;  %535 = vst.msk [vmem:[#allocation2 + $0x220] sm:$0xff] %vm504_vm0, %v501_v56  ;;  %v11160_v63 = vpack.c.bf16 %v984_v58, %v983_v57  ;;  %v13354_v31 = vld [vmem:[#allocation2 + $0x68] sm:$0xff] }
  0xc6   : > { %9125 = vmatprep.mubr.f32.mxu0 %v652_v41  ;;  %536 = vst.msk [vmem:[#allocation2 + $0x228] sm:$0xff] %vm504_vm0, %v502_v59  ;;  %604 = vst.msk [vmem:[#allocation2 + $0x347] sm:$0xff] %vm504_vm0, %v502_v59  ;;  %v13356_v32 = vld [vmem:[#allocation2 + $0xe8] sm:$0xff]  ;;  %v13360_v33 = vld [vmem:[#allocation2 + $0x70] sm:$0xff]  ;;  %v11184_v41 = vpack.c.bf16 %v1174_v37, %v1173_v36 }
  0xc7   : > { %v2461_v42 = vld [vmem:[#allocation2 + $0x210] sm:$0xff]  ;;  %v13366_v38 = vld [vmem:[#allocation2 + $0x78] sm:$0xff]  ;;  %v2770_v40 = vld [vmem:[#allocation2 + $0x2c0] sm:$0xff] }
  0xc8   : > { %v653_v46 = vld [vmem:[#allocation2 + $0x198] sm:$0xff]  ;;  %9629 = vmatprep.mubr.f32.mxu1 %v2461_v42  ;;  %v13362_v34 = vld [vmem:[#allocation2 + $0xf0] sm:$0xff]  ;;  %v2771_v44 = vld [vmem:[#allocation2 + $0x2c8] sm:$0xff] }
  0xc9   : > { %9126 = vmatmul.mubr.f32.gmra.mrb[14].mxu0 %v653_v46  ;;  %v1175_v42 = vld [vmem:[#allocation4 + $0x190] sm:$0xff]  ;;  %v1176_v43 = vld [vmem:[#allocation4 + $0x198] sm:$0xff]  ;;  %v12784_v45 = vld [vmem:[#allocation2 + $0x120] sm:$0xff] }
  0xca   : > { %v2462_v47 = vld [vmem:[#allocation2 + $0x218] sm:$0xff]  ;;  %9160 = vmatprep.mubr.f32.mxu0 %v12864_v0  ;;  %v13374_v46 = vld [vmem:[#allocation2 + $0x250] sm:$0xff]  ;;  %v1177_v50 = vld [vmem:[#allocation4 + $0x1a0] sm:$0xff] }
  0xcb   : > { %9630 = vmatmul.mubr.f32.gmra.mrb[14].mxu1 %v2462_v47  ;;  %v13368_v39 = vld [vmem:[#allocation2 + $0xf8] sm:$0xff]  ;;  %v13376_v47 = vld [vmem:[#allocation2 + $0x2d0] sm:$0xff]  ;;  %v1178_v51 = vld [vmem:[#allocation4 + $0x1a8] sm:$0xff] }
  0xcc   : > { %9664 = vmatprep.mubr.f32.mxu1 %v13274_v48  ;;  %v13380_v56 = vld [vmem:[#allocation2 + $0x2d8] sm:$0xff]  ;;  %v13384_v57 = vld [vmem:[#allocation2 + $0x260] sm:$0xff]  ;;  %v11192_v59 = vpack.c.bf16 %v1178_v51, %v1177_v50  ;;  %v1182_v16 = vld [vmem:[#allocation4 + $0x1c8] sm:$0xff] }
  0xcd   : > { %9161 = vmatmul.mubr.f32.vlgmr.msra.gmra.mrb[0].mxu0 %v12864_v0  ;;  %v13300_v0 = vld [vmem:[#allocation2 + $0x20] sm:$0xff]  ;;  %v13404_v22 = vld [vmem:[#allocation2 + $0x2f8] sm:$0xff]  ;;  %v1183_v30 = vld [vmem:[#allocation4 + $0x1d0] sm:$0xff] }
  0xce   : > { %11155 = vmatpush3.bf16.msra.mxu0 %v11152_v49  ;;  %9163 = vmatprep.mubr.f32.mxu0 %v13280_v53  ;;  %v13386_v58 = vld [vmem:[#allocation2 + $0x2e0] sm:$0xff]  ;;  %v13414_v36 = vld [vmem:[#allocation2 + $0x288] sm:$0xff] }
  0xcf   : > { %9665 = vmatmul.mubr.f32.vlgmr.msra.gmra.mrb[0].mxu1 %v13276_v52  ;;  %11157 = vmatprep.subr.bf16.mxu0 %v11156_v55  ;;  %v1181_v15 = vld [vmem:[#allocation4 + $0x1c0] sm:$0xff]  ;;  %v13416_v37 = vld [vmem:[#allocation2 + $0x308] sm:$0xff] }
  0xd0   : > { %11443 = vmatpush3.bf16.msra.mxu1 %v11152_v49  ;;  %9667 = vmatprep.mubr.f32.mxu1 %v13282_v54  ;;  %v11188_v49 = vpack.c.bf16 %v1176_v43, %v1175_v42  ;;  %v13408_v23 = vld [vmem:[#allocation2 + $0x280] sm:$0xff]  ;;  %v11200_v29 = vpack.c.bf16 %v1182_v16, %v1181_v15  ;;  %v13440_v15 = vld [vmem:[#allocation2 + $0x328] sm:$0xff]  ;;  %v13444_v16 = vld [vmem:[#allocation2 + $0x2b0] sm:$0xff] }
  0xd1   : > { %11445 = vmatprep.subr.bf16.mxu1 %v11156_v55  ;;  %9164 = vmatmul.mubr.f32.gmra.mrb[2].mxu0 %v13291_v60  ;;  %v1185_v43 = vld [vmem:[#allocation4 + $0x1e0] sm:$0xff] }
  0xd2   : > { %11159 = vmatpush3.bf16.msra.mxu0 %v11156_v55  ;;  %9166 = vmatprep.mubr.f32.mxu0 %v13300_v0  ;;  %v13432_v50 = vld [vmem:[#allocation2 + $0x2a0] sm:$0xff] }
  0xd3   : > { %9668 = vmatmul.mubr.f32.gmra.mrb[2].mxu1 %v13293_v61  ;;  %11161 = vmatprep.subr.bf16.mxu0 %v11160_v63  ;;  %v13434_v51 = vld [vmem:[#allocation2 + $0x320] sm:$0xff] }
  0xd4   : > { %11447 = vmatpush3.bf16.msra.mxu1 %v11156_v55  ;;  %9670 = vmatprep.mubr.f32.mxu1 %v13302_v62  ;;  %v13378_v55 = vld [vmem:[#allocation2 + $0x258] sm:$0xff]  ;;  %14712 = vst [vmem:[#allocation10_spill] sm:$0xff] %v13434_v51 }
  0xd5   : > { %11449 = vmatprep.subr.bf16.mxu1 %v11160_v63  ;;  %9167 = vmatmul.mubr.f32.gmra.mrb[4].mxu0 %v13306_v3 }
  0xd6   : > { %11163 = vmatpush3.bf16.msra.mxu0 %v11160_v63  ;;  %9169 = vmatprep.mubr.f32.mxu0 %v13312_v5 }
  0xd7   : > { %9671 = vmatmul.mubr.f32.gmra.mrb[4].mxu1 %v13308_v4  ;;  %11165 = vmatprep.subr.bf16.mxu0 %v11164_v7 }
  0xd8   : > { %11451 = vmatpush3.bf16.msra.mxu1 %v11160_v63  ;;  %9673 = vmatprep.mubr.f32.mxu1 %v13314_v6  ;;  %v1179_v63 = vld [vmem:[#allocation4 + $0x1b0] sm:$0xff] }
  0xd9   : > { %11453 = vmatprep.subr.bf16.mxu1 %v11164_v7  ;;  %9170 = vmatmul.mubr.f32.gmra.mrb[6].mxu0 %v13318_v10 }
  0xda   : > { %11167 = vmatpush3.bf16.msra.mxu0 %v11164_v7  ;;  %9172 = vmatprep.mubr.f32.mxu0 %v13324_v12 }
  0xdb   : > { %9674 = vmatmul.mubr.f32.gmra.mrb[6].mxu1 %v13320_v11  ;;  %11169 = vmatprep.subr.bf16.mxu0 %v11168_v14 }
  0xdc   : > { %11455 = vmatpush3.bf16.msra.mxu1 %v11164_v7  ;;  %9676 = vmatprep.mubr.f32.mxu1 %v13326_v13  ;;  %v13392_v7 = vld [vmem:[#allocation2 + $0x2e8] sm:$0xff] }
  0xdd   : > { %11457 = vmatprep.subr.bf16.mxu1 %v11168_v14  ;;  %9173 = vmatmul.mubr.f32.gmra.mrb[8].mxu0 %v13330_v17 }
  0xde   : > { %11171 = vmatpush3.bf16.msra.mxu0 %v11168_v14  ;;  %9175 = vmatprep.mubr.f32.mxu0 %v13336_v19 }
  0xdf   : > { %9677 = vmatmul.mubr.f32.gmra.mrb[8].mxu1 %v13332_v18  ;;  %11173 = vmatprep.subr.bf16.mxu0 %v11172_v21 }
  0xe0   : > { %11459 = vmatpush3.bf16.msra.mxu1 %v11168_v14  ;;  %9679 = vmatprep.mubr.f32.mxu1 %v13338_v20  ;;  %v11196_v14 = vpack.c.bf16 %v1180_v1, %v1179_v63  ;;  %v1187_v63 = vld [vmem:[#allocation4 + $0x1f0] sm:$0xff]  ;;  %v1188_v1 = vld [vmem:[#allocation4 + $0x1f8] sm:$0xff] }
  0xe1   : > { %11461 = vmatprep.subr.bf16.mxu1 %v11172_v21  ;;  %9176 = vmatmul.mubr.f32.gmra.mrb[10].mxu0 %v13342_v24 }
  0xe2   : > { %11175 = vmatpush3.bf16.msra.mxu0 %v11172_v21  ;;  %9178 = vmatprep.mubr.f32.mxu0 %v13348_v26 }
  0xe3   : > { %9680 = vmatmul.mubr.f32.gmra.mrb[10].mxu1 %v13344_v25  ;;  %11177 = vmatprep.subr.bf16.mxu0 %v11176_v28 }
  0xe4   : > { %11463 = vmatpush3.bf16.msra.mxu1 %v11172_v21  ;;  %9682 = vmatprep.mubr.f32.mxu1 %v13350_v27  ;;  %v13402_v21 = vld [vmem:[#allocation2 + $0x278] sm:$0xff] }
  0xe5   : > { %11465 = vmatprep.subr.bf16.mxu1 %v11176_v28  ;;  %9179 = vmatmul.mubr.f32.gmra.mrb[12].mxu0 %v13354_v31 }
  0xe6   : > { %11179 = vmatpush3.bf16.msra.mxu0 %v11176_v28  ;;  %9181 = vmatprep.mubr.f32.mxu0 %v13360_v33 }
  0xe7   : > { %9683 = vmatmul.mubr.f32.gmra.mrb[12].mxu1 %v13356_v32  ;;  %11181 = vmatprep.subr.bf16.mxu0 %v11180_v35 }
  0xe8   : > { %11467 = vmatpush3.bf16.msra.mxu1 %v11176_v28  ;;  %9685 = vmatprep.mubr.f32.mxu1 %v13362_v34  ;;  %v13410_v28 = vld [vmem:[#allocation2 + $0x300] sm:$0xff] }
  0xe9   : > { %11469 = vmatprep.subr.bf16.mxu1 %v11180_v35  ;;  %9182 = vmatmul.mubr.f32.gmra.mrb[14].mxu0 %v13366_v38 }
  0xea   : > { %11183 = vmatpush3.bf16.msra.mxu0 %v11180_v35  ;;  %9216 = vmatprep.mubr.f32.mxu0 %v12784_v45 }
  0xeb   : > { %9686 = vmatmul.mubr.f32.gmra.mrb[14].mxu1 %v13368_v39  ;;  %11185 = vmatprep.subr.bf16.mxu0 %v11184_v41 }
  0xec   : > { %11471 = vmatpush3.bf16.msra.mxu1 %v11180_v35  ;;  %9720 = vmatprep.mubr.f32.mxu1 %v2770_v40  ;;  %v1184_v35 = vld [vmem:[#allocation4 + $0x1d8] sm:$0xff]  ;;  %v13420_v40 = vld [vmem:[#allocation2 + $0x290] sm:$0xff] }
  0xed   : > { %11473 = vmatprep.subr.bf16.mxu1 %v11184_v41  ;;  %9217 = vmatmul.mubr.f32.vlgmr.msra.gmra.mrb[0].mxu0 %v12784_v45  ;;  %v11204_v42 = vpack.c.bf16 %v1184_v35, %v1183_v30  ;;  %v13426_v45 = vld [vmem:[#allocation2 + $0x298] sm:$0xff]  ;;  %v11212_v30 = vpack.c.bf16 %v1188_v1, %v1187_v63  ;;  %v1367_v35 = vld [vmem:[#allocation4 + $0x200] sm:$0xff]  ;;  %v1369_v63 = vld [vmem:[#allocation4 + $0x210] sm:$0xff] }
  0xee   : > { %11187 = vmatpush3.bf16.msra.mxu0 %v11184_v41  ;;  %9219 = vmatprep.mubr.f32.mxu0 %v13374_v46  ;;  %v1370_v1 = vld [vmem:[#allocation4 + $0x218] sm:$0xff] }
  0xef   : > { %9721 = vmatmul.mubr.f32.vlgmr.msra.gmra.mrb[0].mxu1 %v2771_v44  ;;  %11189 = vmatprep.subr.bf16.mxu0 %v11188_v49  ;;  %v1186_v44 = vld [vmem:[#allocation4 + $0x1e8] sm:$0xff] }
  0xf0   : > { %11475 = vmatpush3.bf16.msra.mxu1 %v11184_v41  ;;  %9723 = vmatprep.mubr.f32.mxu1 %v13376_v47  ;;  %v13422_v41 = vld [vmem:[#allocation2 + $0x310] sm:$0xff] }
  0xf1   : > { %11477 = vmatprep.subr.bf16.mxu1 %v11188_v49  ;;  %9220 = vmatmul.mubr.f32.gmra.mrb[2].mxu0 %v13378_v55 }
  0xf2   : > { %11191 = vmatpush3.bf16.msra.mxu0 %v11188_v49  ;;  %9222 = vmatprep.mubr.f32.mxu0 %v13384_v57 }
  0xf3   : > { %9724 = vmatmul.mubr.f32.gmra.mrb[2].mxu1 %v13380_v56  ;;  %11193 = vmatprep.subr.bf16.mxu0 %v11192_v59 }
  0xf4   : > { %11479 = vmatpush3.bf16.msra.mxu1 %v11188_v49  ;;  %9726 = vmatprep.mubr.f32.mxu1 %v13386_v58  ;;  %v13428_v49 = vld [vmem:[#allocation2 + $0x318] sm:$0xff] }
  0xf5   : > { %11481 = vmatprep.subr.bf16.mxu1 %v11192_v59  ;;  %9223 = vmatmul.mubr.f32.gmra.mrb[4].mxu0 %v13390_v2 }
  0xf6   : > { %11195 = vmatpush3.bf16.msra.mxu0 %v11192_v59  ;;  %9225 = vmatprep.mubr.f32.mxu0 %v13396_v8 }
  0xf7   : > { %9727 = vmatmul.mubr.f32.gmra.mrb[4].mxu1 %v13392_v7  ;;  %11197 = vmatprep.subr.bf16.mxu0 %v11196_v14 }
  0xf8   : > { %11483 = vmatpush3.bf16.msra.mxu1 %v11192_v59  ;;  %9729 = vmatprep.mubr.f32.mxu1 %v13398_v9  ;;  %v11208_v59 = vpack.c.bf16 %v1186_v44, %v1185_v43  ;;  %v13450_v43 = vld [vmem:[#allocation2 + $0x2b8] sm:$0xff] }
  0xf9   : > { %11485 = vmatprep.subr.bf16.mxu1 %v11196_v14  ;;  %9226 = vmatmul.mubr.f32.gmra.mrb[6].mxu0 %v13402_v21  ;;  %v13452_v44 = vld [vmem:[#allocation2 + $0x338] sm:$0xff] }
  0xfa   : > { %11199 = vmatpush3.bf16.msra.mxu0 %v11196_v14  ;;  %9228 = vmatprep.mubr.f32.mxu0 %v13408_v23 }
  0xfb   : > { %9730 = vmatmul.mubr.f32.gmra.mrb[6].mxu1 %v13404_v22  ;;  %11201 = vmatprep.subr.bf16.mxu0 %v11200_v29 }
  0xfc   : > { %11487 = vmatpush3.bf16.msra.mxu1 %v11196_v14  ;;  %9732 = vmatprep.mubr.f32.mxu1 %v13410_v28  ;;  %v13438_v14 = vld [vmem:[#allocation2 + $0x2a8] sm:$0xff] }
  0xfd   : > { %11489 = vmatprep.subr.bf16.mxu1 %v11200_v29  ;;  %9229 = vmatmul.mubr.f32.gmra.mrb[8].mxu0 %v13414_v36 }
  0xfe   : > { %11203 = vmatpush3.bf16.msra.mxu0 %v11200_v29  ;;  %9231 = vmatprep.mubr.f32.mxu0 %v13420_v40 }
  0xff   : > { %9733 = vmatmul.mubr.f32.gmra.mrb[8].mxu1 %v13416_v37  ;;  %11205 = vmatprep.subr.bf16.mxu0 %v11204_v42 }
 0x100   : > { %11491 = vmatpush3.bf16.msra.mxu1 %v11200_v29  ;;  %9735 = vmatprep.mubr.f32.mxu1 %v13422_v41  ;;  %v13446_v29 = vld [vmem:[#allocation2 + $0x330] sm:$0xff] }
 0x101   : > { %11493 = vmatprep.subr.bf16.mxu1 %v11204_v42  ;;  %9232 = vmatmul.mubr.f32.gmra.mrb[10].mxu0 %v13426_v45 }
 0x102   : > { %11207 = vmatpush3.bf16.msra.mxu0 %v11204_v42  ;;  %9234 = vmatprep.mubr.f32.mxu0 %v13432_v50 }
 0x103   : > { %9736 = vmatmul.mubr.f32.gmra.mrb[10].mxu1 %v13428_v49  ;;  %11209 = vmatprep.subr.bf16.mxu0 %v11208_v59 }
 0x104   : > { %11495 = vmatpush3.bf16.msra.mxu1 %v11204_v42  ;;  %9738 = vmatprep.mubr.f32.mxu1 %v13434_v51  ;;  %v1368_v42 = vld [vmem:[#allocation4 + $0x208] sm:$0xff] }
 0x105   : > { %11497 = vmatprep.subr.bf16.mxu1 %v11208_v59  ;;  %9235 = vmatmul.mubr.f32.gmra.mrb[12].mxu0 %v13438_v14  ;;  %v11216_v51 = vpack.c.bf16 %v1368_v42, %v1367_v35  ;;  %v1371_v35 = vld [vmem:[#allocation4 + $0x220] sm:$0xff]  ;;  %v1372_v42 = vld [vmem:[#allocation4 + $0x228] sm:$0xff] }
 0x106   : > { %11211 = vmatpush3.bf16.msra.mxu0 %v11208_v59  ;;  %9237 = vmatprep.mubr.f32.mxu0 %v13444_v16 }
 0x107   : > { %9739 = vmatmul.mubr.f32.gmra.mrb[12].mxu1 %v13440_v15  ;;  %11213 = vmatprep.subr.bf16.mxu0 %v11212_v30 }
 0x108   : > { %11499 = vmatpush3.bf16.msra.mxu1 %v11208_v59  ;;  %9741 = vmatprep.mubr.f32.mxu1 %v13446_v29  ;;  %v11220_v59 = vpack.c.bf16 %v1370_v1, %v1369_v63  ;;  %v13498_v63 = vld [vmem:[#allocation2 + $0x148] sm:$0xff] }
 0x109   : > { %11501 = vmatprep.subr.bf16.mxu1 %v11212_v30  ;;  %9238 = vmatmul.mubr.f32.gmra.mrb[14].mxu0 %v13450_v43  ;;  %v13500_v1 = vld [vmem:[#allocation2 + $0x1c8] sm:$0xff] }
 0x10a   : > { %11215 = vmatpush3.bf16.msra.mxu0 %v11212_v30  ;;  %9272 = vmatprep.mubr.f32.mxu0 %v13280_v53  ;;  %v11224_v53 = vpack.c.bf16 %v1372_v42, %v1371_v35  ;;  %v13506_v35 = vld [vmem:[#allocation2 + $0x1d0] sm:$0xff] }
 0x10b   : > { %9742 = vmatmul.mubr.f32.gmra.mrb[14].mxu1 %v13452_v44  ;;  %11217 = vmatprep.subr.bf16.mxu0 %v11216_v51 }
 0x10c   : > { %11503 = vmatpush3.bf16.msra.mxu1 %v11212_v30  ;;  %9776 = vmatprep.mubr.f32.mxu1 %v13282_v54  ;;  %v1373_v54 = vld [vmem:[#allocation4 + $0x230] sm:$0xff]  ;;  %v1374_v30 = vld [vmem:[#allocation4 + $0x238] sm:$0xff] }
 0x10d   : > { %11505 = vmatprep.subr.bf16.mxu1 %v11216_v51  ;;  %9273 = vmatmul.mubr.f32.vlgmr.msra.gmra.mrb[0].mxu0 %v13291_v60  ;;  %v11228_v60 = vpack.c.bf16 %v1374_v30, %v1373_v54  ;;  %v1568_v54 = vld [vmem:[#allocation4 + $0x2b8] sm:$0xff] }
 0x10e   : > { %11219 = vmatpush3.bf16.msra.mxu0 %v11216_v51  ;;  %9275 = vmatprep.mubr.f32.mxu0 %v13300_v0  ;;  %v1376_v0 = vld [vmem:[#allocation4 + $0x248] sm:$0xff]  ;;  %v13510_v30 = vld [vmem:[#allocation2 + $0x158] sm:$0xff] }
 0x10f   : > { %9777 = vmatmul.mubr.f32.vlgmr.msra.gmra.mrb[0].mxu1 %v13293_v61  ;;  %11221 = vmatprep.subr.bf16.mxu0 %v11220_v59  ;;  %v1375_v61 = vld [vmem:[#allocation4 + $0x240] sm:$0xff] }
 0x110   : > { %11507 = vmatpush3.bf16.msra.mxu1 %v11216_v51  ;;  %9779 = vmatprep.mubr.f32.mxu1 %v13302_v62  ;;  %v11232_v62 = vpack.c.bf16 %v1376_v0, %v1375_v61  ;;  %v1566_v51 = vld [vmem:[#allocation4 + $0x2a8] sm:$0xff]  ;;  %v13516_v61 = vld [vmem:[#allocation2 + $0x160] sm:$0xff] }
 0x111   : > { %11509 = vmatprep.subr.bf16.mxu1 %v11220_v59  ;;  %9276 = vmatmul.mubr.f32.gmra.mrb[2].mxu0 %v13306_v3  ;;  %v1377_v3 = vld [vmem:[#allocation4 + $0x250] sm:$0xff]  ;;  %v13518_v0 = vld [vmem:[#allocation2 + $0x1e0] sm:$0xff] }
 0x112   : > { %11223 = vmatpush3.bf16.msra.mxu0 %v11220_v59  ;;  %9278 = vmatprep.mubr.f32.mxu0 %v13312_v5 }
 0x113   : > { %9780 = vmatmul.mubr.f32.gmra.mrb[2].mxu1 %v13308_v4  ;;  %11225 = vmatprep.subr.bf16.mxu0 %v11224_v53  ;;  %v1378_v4 = vld [vmem:[#allocation4 + $0x258] sm:$0xff] }
 0x114   : > { %11511 = vmatpush3.bf16.msra.mxu1 %v11220_v59  ;;  %9782 = vmatprep.mubr.f32.mxu1 %v13314_v6  ;;  %v11236_v5 = vpack.c.bf16 %v1378_v4, %v1377_v3  ;;  %v1379_v6 = vld [vmem:[#allocation4 + $0x260] sm:$0xff]  ;;  %v13504_v59 = vld [vmem:[#allocation2 + $0x150] sm:$0xff]  ;;  %v1570_v4 = vld [vmem:[#allocation4 + $0x2c8] sm:$0xff] }
 0x115   : > { %11513 = vmatprep.subr.bf16.mxu1 %v11224_v53  ;;  %9279 = vmatmul.mubr.f32.gmra.mrb[4].mxu0 %v13318_v10  ;;  %v1380_v10 = vld [vmem:[#allocation4 + $0x268] sm:$0xff]  ;;  %v1569_v3 = vld [vmem:[#allocation4 + $0x2c0] sm:$0xff] }
 0x116   : > { %11227 = vmatpush3.bf16.msra.mxu0 %v11224_v53  ;;  %9281 = vmatprep.mubr.f32.mxu0 %v13324_v12  ;;  %v1381_v12 = vld [vmem:[#allocation4 + $0x270] sm:$0xff] }
 0x117   : > { %9783 = vmatmul.mubr.f32.gmra.mrb[4].mxu1 %v13320_v11  ;;  %11229 = vmatprep.subr.bf16.mxu0 %v11228_v60  ;;  %v11240_v11 = vpack.c.bf16 %v1380_v10, %v1379_v6  ;;  %v13524_v6 = vld [vmem:[#allocation2 + $0x1e8] sm:$0xff]  ;;  %v13528_v10 = vld [vmem:[#allocation2 + $0x170] sm:$0xff] }
 0x118   : > { %11515 = vmatpush3.bf16.msra.mxu1 %v11224_v53  ;;  %9785 = vmatprep.mubr.f32.mxu1 %v13326_v13  ;;  %v1382_v13 = vld [vmem:[#allocation4 + $0x278] sm:$0xff]  ;;  %v1567_v53 = vld [vmem:[#allocation4 + $0x2b0] sm:$0xff] }
 0x119   : > { %11517 = vmatprep.subr.bf16.mxu1 %v11228_v60  ;;  %9282 = vmatmul.mubr.f32.gmra.mrb[6].mxu0 %v13330_v17  ;;  %v13484_v17 = vld [vmem:[#allocation2 + $0x100] sm:$0xff] }
 0x11a   : > { %11231 = vmatpush3.bf16.msra.mxu0 %v11228_v60  ;;  %9284 = vmatprep.mubr.f32.mxu0 %v13336_v19  ;;  %v1561_v19 = vld [vmem:[#allocation4 + $0x280] sm:$0xff] }
 0x11b   : > { %9786 = vmatmul.mubr.f32.gmra.mrb[6].mxu1 %v13332_v18  ;;  %11233 = vmatprep.subr.bf16.mxu0 %v11232_v62  ;;  %v11244_v18 = vpack.c.bf16 %v1382_v13, %v1381_v12  ;;  %v11264_v12 = vpack.c.bf16 %v1570_v4, %v1569_v3  ;;  %v1571_v13 = vld [vmem:[#allocation4 + $0x2d0] sm:$0xff]  ;;  %v13564_v3 = vld [vmem:[#allocation2 + $0x1a0] sm:$0xff] }
 0x11c   : > { %11519 = vmatpush3.bf16.msra.mxu1 %v11228_v60  ;;  %9788 = vmatprep.mubr.f32.mxu1 %v13338_v20  ;;  %v1562_v20 = vld [vmem:[#allocation4 + $0x288] sm:$0xff]  ;;  %v13512_v60 = vld [vmem:[#allocation2 + $0x1d8] sm:$0xff]  ;;  %v13566_v4 = vld [vmem:[#allocation2 + $0x220] sm:$0xff] }
 0x11d   : > { %11521 = vmatprep.subr.bf16.mxu1 %v11232_v62  ;;  %9285 = vmatmul.mubr.f32.gmra.mrb[8].mxu0 %v13342_v24  ;;  %v13488_v24 = vld [vmem:[#allocation2 + $0x108] sm:$0xff] }
 0x11e   : > { %11235 = vmatpush3.bf16.msra.mxu0 %v11232_v62  ;;  %9287 = vmatprep.mubr.f32.mxu0 %v13348_v26  ;;  %v3158_v26 = vld [vmem:[#allocation2 + $0x1b0] sm:$0xff] }
 0x11f   : > { %9789 = vmatmul.mubr.f32.gmra.mrb[8].mxu1 %v13344_v25  ;;  %11237 = vmatprep.subr.bf16.mxu0 %v11236_v5  ;;  %v1350_v25 = vld [vmem:[#allocation2 + $0x130] sm:$0xff] }
 0x120   : > { %11523 = vmatpush3.bf16.msra.mxu1 %v11232_v62  ;;  %9791 = vmatprep.mubr.f32.mxu1 %v13350_v27  ;;  %v11248_v27 = vpack.c.bf16 %v1562_v20, %v1561_v19  ;;  %v11260_v62 = vpack.c.bf16 %v1568_v54, %v1567_v53  ;;  %v13534_v19 = vld [vmem:[#allocation2 + $0x178] sm:$0xff] }
 0x121   : > { %11525 = vmatprep.subr.bf16.mxu1 %v11236_v5  ;;  %9288 = vmatmul.mubr.f32.gmra.mrb[10].mxu0 %v13354_v31  ;;  %v1563_v31 = vld [vmem:[#allocation4 + $0x290] sm:$0xff]  ;;  %v13536_v20 = vld [vmem:[#allocation2 + $0x1f8] sm:$0xff] }
 0x122   : > { %11239 = vmatpush3.bf16.msra.mxu0 %v11236_v5  ;;  %9290 = vmatprep.mubr.f32.mxu0 %v13360_v33  ;;  %v1351_v33 = vld [vmem:[#allocation2 + $0x138] sm:$0xff] }
 0x123   : > { %9792 = vmatmul.mubr.f32.gmra.mrb[10].mxu1 %v13356_v32  ;;  %11241 = vmatprep.subr.bf16.mxu0 %v11240_v11  ;;  %v1564_v32 = vld [vmem:[#allocation4 + $0x298] sm:$0xff] }
 0x124   : > { %11527 = vmatpush3.bf16.msra.mxu1 %v11236_v5  ;;  %9794 = vmatprep.mubr.f32.mxu1 %v13362_v34  ;;  %v3159_v34 = vld [vmem:[#allocation2 + $0x1b8] sm:$0xff]  ;;  %v13522_v5 = vld [vmem:[#allocation2 + $0x168] sm:$0xff] }
 0x125   : > { %11529 = vmatprep.subr.bf16.mxu1 %v11240_v11  ;;  %9291 = vmatmul.mubr.f32.gmra.mrb[12].mxu0 %v13366_v38  ;;  %v13496_v38 = vld [vmem:[#allocation2 + $0x1c0] sm:$0xff]  ;;  %v1576_v53 = vld [vmem:[#allocation4 + $0x2f8] sm:$0xff] }
 0x126   : > { %11243 = vmatpush3.bf16.msra.mxu0 %v11240_v11  ;;  %9293 = vmatprep.mubr.f32.mxu0 %v13274_v48  ;;  %v13494_v48 = vld [vmem:[#allocation2 + $0x140] sm:$0xff]  ;;  %v13558_v54 = vld [vmem:[#allocation2 + $0x198] sm:$0xff] }
 0x127   : > { %9795 = vmatmul.mubr.f32.gmra.mrb[12].mxu1 %v13368_v39  ;;  %11245 = vmatprep.subr.bf16.mxu0 %v11244_v18  ;;  %v11252_v39 = vpack.c.bf16 %v1564_v32, %v1563_v31  ;;  %v1573_v31 = vld [vmem:[#allocation4 + $0x2e0] sm:$0xff]  ;;  %v1574_v32 = vld [vmem:[#allocation4 + $0x2e8] sm:$0xff] }
 0x128   : > { %11531 = vmatpush3.bf16.msra.mxu1 %v11240_v11  ;;  %9797 = vmatprep.mubr.f32.mxu1 %v13484_v17  ;;  %v13530_v11 = vld [vmem:[#allocation2 + $0x1f0] sm:$0xff] }
 0x129   : > { %11533 = vmatprep.subr.bf16.mxu1 %v11244_v18  ;;  %9294 = vmatmul.mubr.f32.gmra.mrb[14].mxu0 %v13276_v52  ;;  %v1565_v52 = vld [vmem:[#allocation4 + $0x2a0] sm:$0xff] }
 0x12a   : > { %11247 = vmatpush3.bf16.msra.mxu0 %v11244_v18  ;;  %9328 = vmatprep.mubr.f32.mxu0 %v1350_v25  ;;  %v11256_v42 = vpack.c.bf16 %v1566_v51, %v1565_v52  ;;  %v13540_v25 = vld [vmem:[#allocation2 + $0x180] sm:$0xff]  ;;  %v13554_v52 = vld [vmem:[#allocation2 + $0x210] sm:$0xff]  ;;  %v11272_v51 = vpack.c.bf16 %v1574_v32, %v1573_v31  ;;  %v13572_v31 = vld [vmem:[#allocation2 + $0x228] sm:$0xff] }
 0x12b   : > { %9798 = vmatmul.mubr.f32.gmra.mrb[14].mxu1 %v13488_v24  ;;  %11249 = vmatprep.subr.bf16.mxu0 %v11248_v27 }
 0x12c   : > { %11535 = vmatpush3.bf16.msra.mxu1 %v11244_v18  ;;  %9832 = vmatprep.mubr.f32.mxu1 %v3158_v26  ;;  %v1572_v18 = vld [vmem:[#allocation4 + $0x2d8] sm:$0xff]  ;;  %v13542_v26 = vld [vmem:[#allocation2 + $0x200] sm:$0xff] }
 0x12d   : > { %11537 = vmatprep.subr.bf16.mxu1 %v11248_v27  ;;  %9329 = vmatmul.mubr.f32.vlgmr.msra.gmra.mrb[0].mxu0 %v1351_v33  ;;  %v13546_v33 = vld [vmem:[#allocation2 + $0x188] sm:$0xff] }
 0x12e   : > { %11251 = vmatpush3.bf16.msra.mxu0 %v11248_v27  ;;  %9331 = vmatprep.mubr.f32.mxu0 %v13494_v48 }
 0x12f   : > { %9833 = vmatmul.mubr.f32.vlgmr.msra.gmra.mrb[0].mxu1 %v3159_v34  ;;  %11253 = vmatprep.subr.bf16.mxu0 %v11252_v39  ;;  %v13548_v34 = vld [vmem:[#allocation2 + $0x208] sm:$0xff] }
 0x130   : > { %11539 = vmatpush3.bf16.msra.mxu1 %v11248_v27  ;;  %9835 = vmatprep.mubr.f32.mxu1 %v13496_v38  ;;  %v11268_v27 = vpack.c.bf16 %v1572_v18, %v1571_v13  ;;  %v1756_v13 = vld [vmem:[#allocation4 + $0x300] sm:$0xff]  ;;  %v1757_v18 = vld [vmem:[#allocation4 + $0x308] sm:$0xff] }
 0x131   : > { %11541 = vmatprep.subr.bf16.mxu1 %v11252_v39  ;;  %9332 = vmatmul.mubr.f32.gmra.mrb[2].mxu0 %v13498_v63  ;;  %v11280_v32 = vpack.c.bf16 %v1757_v18, %v1756_v13  ;;  %v1760_v13 = vld [vmem:[#allocation4 + $0x320] sm:$0xff]  ;;  %v1761_v18 = vld [vmem:[#allocation4 + $0x328] sm:$0xff] }
 0x132   : > { %11255 = vmatpush3.bf16.msra.mxu0 %v11252_v39  ;;  %9334 = vmatprep.mubr.f32.mxu0 %v13504_v59 }
 0x133   : > { %9836 = vmatmul.mubr.f32.gmra.mrb[2].mxu1 %v13500_v1  ;;  %11257 = vmatprep.subr.bf16.mxu0 %v11256_v42 }
 0x134   : > { %11543 = vmatpush3.bf16.msra.mxu1 %v11252_v39  ;;  %9838 = vmatprep.mubr.f32.mxu1 %v13506_v35  ;;  %v13552_v39 = vld [vmem:[#allocation2 + $0x190] sm:$0xff] }
 0x135   : > { %11545 = vmatprep.subr.bf16.mxu1 %v11256_v42  ;;  %9335 = vmatmul.mubr.f32.gmra.mrb[4].mxu0 %v13510_v30 }
 0x136   : > { %11259 = vmatpush3.bf16.msra.mxu0 %v11256_v42  ;;  %9337 = vmatprep.mubr.f32.mxu0 %v13516_v61 }
 0x137   : > { %9839 = vmatmul.mubr.f32.gmra.mrb[4].mxu1 %v13512_v60  ;;  %11261 = vmatprep.subr.bf16.mxu0 %v11260_v62 }
 0x138   : > { %11547 = vmatpush3.bf16.msra.mxu1 %v11256_v42  ;;  %9841 = vmatprep.mubr.f32.mxu1 %v13518_v0  ;;  %v1575_v42 = vld [vmem:[#allocation4 + $0x2f0] sm:$0xff] }
 0x139   : > { %11549 = vmatprep.subr.bf16.mxu1 %v11260_v62  ;;  %9338 = vmatmul.mubr.f32.gmra.mrb[6].mxu0 %v13522_v5 }
 0x13a   : > { %11263 = vmatpush3.bf16.msra.mxu0 %v11260_v62  ;;  %9340 = vmatprep.mubr.f32.mxu0 %v13528_v10 }
 0x13b   : > { %9842 = vmatmul.mubr.f32.gmra.mrb[6].mxu1 %v13524_v6  ;;  %11265 = vmatprep.subr.bf16.mxu0 %v11264_v12 }
 0x13c   : > { %11551 = vmatpush3.bf16.msra.mxu1 %v11260_v62  ;;  %9844 = vmatprep.mubr.f32.mxu1 %v13530_v11  ;;  %v13560_v62 = vld [vmem:[#allocation2 + $0x218] sm:$0xff] }
 0x13d   : > { %11553 = vmatprep.subr.bf16.mxu1 %v11264_v12  ;;  %9341 = vmatmul.mubr.f32.gmra.mrb[8].mxu0 %v13534_v19 }
 0x13e   : > { %11267 = vmatpush3.bf16.msra.mxu0 %v11264_v12  ;;  %9343 = vmatprep.mubr.f32.mxu0 %v13540_v25 }
 0x13f   : > { %9845 = vmatmul.mubr.f32.gmra.mrb[8].mxu1 %v13536_v20  ;;  %11269 = vmatprep.subr.bf16.mxu0 %v11268_v27 }
 0x140   : > { %11555 = vmatpush3.bf16.msra.mxu1 %v11264_v12  ;;  %9847 = vmatprep.mubr.f32.mxu1 %v13542_v26  ;;  %v11276_v12 = vpack.c.bf16 %v1576_v53, %v1575_v42  ;;  %v1758_v42 = vld [vmem:[#allocation4 + $0x310] sm:$0xff]  ;;  %v1759_v53 = vld [vmem:[#allocation4 + $0x318] sm:$0xff] }
 0x141   : > { %11557 = vmatprep.subr.bf16.mxu1 %v11268_v27  ;;  %9344 = vmatmul.mubr.f32.gmra.mrb[10].mxu0 %v13546_v33 }
 0x142   : > { %11271 = vmatpush3.bf16.msra.mxu0 %v11268_v27  ;;  %9346 = vmatprep.mubr.f32.mxu0 %v13552_v39 }
 0x143   : > { %9848 = vmatmul.mubr.f32.gmra.mrb[10].mxu1 %v13548_v34  ;;  %11273 = vmatprep.subr.bf16.mxu0 %v11272_v51 }
 0x144   : > { %11559 = vmatpush3.bf16.msra.mxu1 %v11268_v27  ;;  %9850 = vmatprep.mubr.f32.mxu1 %v13554_v52  ;;  %v13570_v27 = vld [vmem:[#allocation2 + $0x1a8] sm:$0xff] }
 0x145   : > { %11561 = vmatprep.subr.bf16.mxu1 %v11272_v51  ;;  %9347 = vmatmul.mubr.f32.gmra.mrb[12].mxu0 %v13558_v54 }
 0x146   : > { %11275 = vmatpush3.bf16.msra.mxu0 %v11272_v51  ;;  %9349 = vmatprep.mubr.f32.mxu0 %v13564_v3 }
 0x147   : > { %9851 = vmatmul.mubr.f32.gmra.mrb[12].mxu1 %v13560_v62  ;;  %11277 = vmatprep.subr.bf16.mxu0 %v11276_v12 }
 0x148   : > { %11563 = vmatpush3.bf16.msra.mxu1 %v11272_v51  ;;  %9853 = vmatprep.mubr.f32.mxu1 %v13566_v4  ;;  %v11284_v51 = vpack.c.bf16 %v1759_v53, %v1758_v42  ;;  %v3547_v42 = vld [vmem:[#allocation2 + $0xa8] sm:$0xff]  ;;  %v1741_v53 = vld [vmem:[#allocation2 + $0x30] sm:$0xff] }
 0x149   : > { %11565 = vmatprep.subr.bf16.mxu1 %v11276_v12  ;;  %9350 = vmatmul.mubr.f32.gmra.mrb[14].mxu0 %v13570_v27 }
 0x14a   : > { %11279 = vmatpush3.bf16.msra.mxu0 %v11276_v12  ;;  %9384 = vmatprep.mubr.f32.mxu0 %v13374_v46  ;;  %v11288_v46 = vpack.c.bf16 %v1761_v18, %v1760_v13  ;;  %v1955_v18 = vld [vmem:[#allocation4 + $0x3a0] sm:$0xff] }
 0x14b   : > { %9854 = vmatmul.mubr.f32.gmra.mrb[14].mxu1 %v13572_v31  ;;  %11281 = vmatprep.subr.bf16.mxu0 %v11280_v32 }
 0x14c   : > { %11567 = vmatpush3.bf16.msra.mxu1 %v11276_v12  ;;  %9888 = vmatprep.mubr.f32.mxu1 %v13376_v47  ;;  %v1762_v47 = vld [vmem:[#allocation4 + $0x330] sm:$0xff]  ;;  %v1763_v12 = vld [vmem:[#allocation4 + $0x338] sm:$0xff] }
 0x14d   : > { %11569 = vmatprep.subr.bf16.mxu1 %v11280_v32  ;;  %9385 = vmatmul.mubr.f32.vlgmr.msra.gmra.mrb[0].mxu0 %v13378_v55  ;;  %v11292_v55 = vpack.c.bf16 %v1763_v12, %v1762_v47  ;;  %v1742_v47 = vld [vmem:[#allocation2 + $0x38] sm:$0xff] }
 0x14e   : > { %11283 = vmatpush3.bf16.msra.mxu0 %v11280_v32  ;;  %9387 = vmatprep.mubr.f32.mxu0 %v13384_v57  ;;  %v1765_v57 = vld [vmem:[#allocation4 + $0x348] sm:$0xff]  ;;  %v3549_v12 = vld [vmem:[#allocation2 + $0xb8] sm:$0xff] }
 0x14f   : > { %9889 = vmatmul.mubr.f32.vlgmr.msra.gmra.mrb[0].mxu1 %v13380_v56  ;;  %11285 = vmatprep.subr.bf16.mxu0 %v11284_v51  ;;  %v1764_v56 = vld [vmem:[#allocation4 + $0x340] sm:$0xff] }
 0x150   : > { %11571 = vmatpush3.bf16.msra.mxu1 %v11280_v32  ;;  %9891 = vmatprep.mubr.f32.mxu1 %v13386_v58  ;;  %v11296_v58 = vpack.c.bf16 %v1765_v57, %v1764_v56  ;;  %v1740_v32 = vld [vmem:[#allocation2 + $0x28] sm:$0xff]  ;;  %v3550_v56 = vld [vmem:[#allocation2 + $0xc0] sm:$0xff] }
 0x151   : > { %11573 = vmatprep.subr.bf16.mxu1 %v11284_v51  ;;  %9388 = vmatmul.mubr.f32.gmra.mrb[2].mxu0 %v13390_v2  ;;  %v1766_v2 = vld [vmem:[#allocation4 + $0x350] sm:$0xff] }
 0x152   : > { %11287 = vmatpush3.bf16.msra.mxu0 %v11284_v51  ;;  %9390 = vmatprep.mubr.f32.mxu0 %v13396_v8 }
 0x153   : > { %9892 = vmatmul.mubr.f32.gmra.mrb[2].mxu1 %v13392_v7  ;;  %11289 = vmatprep.subr.bf16.mxu0 %v11288_v46  ;;  %v1767_v7 = vld [vmem:[#allocation4 + $0x358] sm:$0xff] }
 0x154   : > { %11575 = vmatpush3.bf16.msra.mxu1 %v11284_v51  ;;  %9894 = vmatprep.mubr.f32.mxu1 %v13398_v9  ;;  %v11300_v8 = vpack.c.bf16 %v1767_v7, %v1766_v2  ;;  %v1768_v9 = vld [vmem:[#allocation4 + $0x360] sm:$0xff]  ;;  %v3548_v51 = vld [vmem:[#allocation2 + $0xb0] sm:$0xff]  ;;  %v1958_v2 = vld [vmem:[#allocation4 + $0x3b8] sm:$0xff] }
 0x155   : > { %11577 = vmatprep.subr.bf16.mxu1 %v11288_v46  ;;  %9391 = vmatmul.mubr.f32.gmra.mrb[4].mxu0 %v13402_v21  ;;  %v1769_v21 = vld [vmem:[#allocation4 + $0x368] sm:$0xff] }
 0x156   : > { %11291 = vmatpush3.bf16.msra.mxu0 %v11288_v46  ;;  %9393 = vmatprep.mubr.f32.mxu0 %v13408_v23  ;;  %v11304_v23 = vpack.c.bf16 %v1769_v21, %v1768_v9  ;;  %v1744_v7 = vld [vmem:[#allocation2 + $0x48] sm:$0xff]  ;;  %v1745_v9 = vld [vmem:[#allocation2 + $0x50] sm:$0xff] }
 0x157   : > { %9895 = vmatmul.mubr.f32.gmra.mrb[4].mxu1 %v13404_v22  ;;  %11293 = vmatprep.subr.bf16.mxu0 %v11292_v55  ;;  %v14713_v22 = vld [vmem:[#allocation10_spill] sm:$0xff]  ;;  %v3552_v21 = vld [vmem:[#allocation2 + $0xd0] sm:$0xff] }
 0x158   : > { %11579 = vmatpush3.bf16.msra.mxu1 %v11288_v46  ;;  %9897 = vmatprep.mubr.f32.mxu1 %v13410_v28  ;;  %v1770_v28 = vld [vmem:[#allocation4 + $0x370] sm:$0xff]  ;;  %v1956_v46 = vld [vmem:[#allocation4 + $0x3a8] sm:$0xff] }
 0x159   : > { %11581 = vmatprep.subr.bf16.mxu1 %v11292_v55  ;;  %9394 = vmatmul.mubr.f32.gmra.mrb[6].mxu0 %v13414_v36  ;;  %v1771_v36 = vld [vmem:[#allocation4 + $0x378] sm:$0xff]  ;;  %v11320_v57 = vpack.c.bf16 %v1956_v46, %v1955_v18 }
 0x15a   : > { %11295 = vmatpush3.bf16.msra.mxu0 %v11292_v55  ;;  %9396 = vmatprep.mubr.f32.mxu0 %v13420_v40  ;;  %v13606_v40 = vld [vmem:[#allocation2 + $0x340] sm:$0xff]  ;;  %v1750_v18 = vld [vmem:[#allocation2 + $0x78] sm:$0xff] }
 0x15b   : > { %9898 = vmatmul.mubr.f32.gmra.mrb[6].mxu1 %v13416_v37  ;;  %11297 = vmatprep.subr.bf16.mxu0 %v11296_v58  ;;  %v13604_v37 = vld [vmem:[#allocation2 + $0x2c0] sm:$0xff]  ;;  %v3557_v46 = vld [vmem:[#allocation2 + $0xf8] sm:$0xff] }
 0x15c   : > { %11583 = vmatpush3.bf16.msra.mxu1 %v11292_v55  ;;  %9900 = vmatprep.mubr.f32.mxu1 %v13422_v41  ;;  %v11308_v41 = vpack.c.bf16 %v1771_v36, %v1770_v28  ;;  %v1743_v55 = vld [vmem:[#allocation2 + $0x40] sm:$0xff]  ;;  %v1960_v28 = vld [vmem:[#allocation4 + $0x3c8] sm:$0xff]  ;;  %v1746_v36 = vld [vmem:[#allocation2 + $0x58] sm:$0xff] }
 0x15d   : > { %11585 = vmatprep.subr.bf16.mxu1 %v11296_v58  ;;  %9397 = vmatmul.mubr.f32.gmra.mrb[8].mxu0 %v13426_v45  ;;  %v1951_v45 = vld [vmem:[#allocation4 + $0x380] sm:$0xff] }
 0x15e   : > { %11299 = vmatpush3.bf16.msra.mxu0 %v11296_v58  ;;  %9399 = vmatprep.mubr.f32.mxu0 %v13432_v50  ;;  %v13610_v50 = vld [vmem:[#allocation2 + $0x2c8] sm:$0xff] }
 0x15f   : > { %9901 = vmatmul.mubr.f32.gmra.mrb[8].mxu1 %v13428_v49  ;;  %11301 = vmatprep.subr.bf16.mxu0 %v11300_v8  ;;  %v1952_v49 = vld [vmem:[#allocation4 + $0x388] sm:$0xff] }
 0x160   : > { %11587 = vmatpush3.bf16.msra.mxu1 %v11296_v58  ;;  %9903 = vmatprep.mubr.f32.mxu1 %v14713_v22  ;;  %v1957_v58 = vld [vmem:[#allocation4 + $0x3b0] sm:$0xff] }
 0x161   : > { %11589 = vmatprep.subr.bf16.mxu1 %v11300_v8  ;;  %9400 = vmatmul.mubr.f32.gmra.mrb[10].mxu0 %v13438_v14  ;;  %v13612_v14 = vld [vmem:[#allocation2 + $0x348] sm:$0xff]  ;;  %v11324_v22 = vpack.c.bf16 %v1958_v2, %v1957_v58  ;;  %v1753_v58 = vld [vmem:[#allocation2 + $0x90] sm:$0xff] }
 0x162   : > { %11303 = vmatpush3.bf16.msra.mxu0 %v11300_v8  ;;  %9402 = vmatprep.mubr.f32.mxu0 %v13444_v16  ;;  %v3546_v16 = vld [vmem:[#allocation2 + $0xa0] sm:$0xff] }
 0x163   : > { %9904 = vmatmul.mubr.f32.gmra.mrb[10].mxu1 %v13440_v15  ;;  %11305 = vmatprep.subr.bf16.mxu0 %v11304_v23  ;;  %v1739_v15 = vld [vmem:[#allocation2 + $0x20] sm:$0xff] }
 0x164   : > { %11591 = vmatpush3.bf16.msra.mxu1 %v11300_v8  ;;  %9906 = vmatprep.mubr.f32.mxu1 %v13446_v29  ;;  %v11312_v29 = vpack.c.bf16 %v1952_v49, %v1951_v45  ;;  %v3551_v8 = vld [vmem:[#allocation2 + $0xc8] sm:$0xff]  ;;  %v1747_v45 = vld [vmem:[#allocation2 + $0x60] sm:$0xff] }
 0x165   : > { %11593 = vmatprep.subr.bf16.mxu1 %v11304_v23  ;;  %9403 = vmatmul.mubr.f32.gmra.mrb[12].mxu0 %v13450_v43  ;;  %v1953_v43 = vld [vmem:[#allocation4 + $0x390] sm:$0xff]  ;;  %v3554_v49 = vld [vmem:[#allocation2 + $0xe0] sm:$0xff] }
 0x166   : > { %11307 = vmatpush3.bf16.msra.mxu0 %v11304_v23  ;;  %9405 = vmatprep.mubr.f32.mxu0 %v13604_v37 }
 0x167   : > { %9907 = vmatmul.mubr.f32.gmra.mrb[12].mxu1 %v13452_v44  ;;  %11309 = vmatprep.subr.bf16.mxu0 %v11308_v41  ;;  %v1954_v44 = vld [vmem:[#allocation4 + $0x398] sm:$0xff] }
 0x168   : > { %11595 = vmatpush3.bf16.msra.mxu1 %v11304_v23  ;;  %9909 = vmatprep.mubr.f32.mxu1 %v13606_v40  ;;  %v11316_v13 = vpack.c.bf16 %v1954_v44, %v1953_v43  ;;  %v1959_v23 = vld [vmem:[#allocation4 + $0x3c0] sm:$0xff]  ;;  %v1748_v43 = vld [vmem:[#allocation2 + $0x68] sm:$0xff] }
 0x169   : > { %11597 = vmatprep.subr.bf16.mxu1 %v11308_v41  ;;  %9406 = vmatmul.mubr.f32.gmra.mrb[14].mxu0 %v13610_v50  ;;  %v3555_v44 = vld [vmem:[#allocation2 + $0xe8] sm:$0xff] }
 0x16a   : > { %11311 = vmatpush3.bf16.msra.mxu0 %v11308_v41  ;;  %9440 = vmatprep.mubr.f32.mxu0 %v1739_v15  ;;  %v11328_v15 = vpack.c.bf16 %v1960_v28, %v1959_v23  ;;  %v2149_v23 = vld [vmem:[#allocation4 + $0x418] sm:$0xff]  ;;  %v2150_v28 = vld [vmem:[#allocation4 + $0x420] sm:$0xff] }
 0x16b   : > { %9910 = vmatmul.mubr.f32.gmra.mrb[14].mxu1 %v13612_v14  ;;  %11313 = vmatprep.subr.bf16.mxu0 %v11312_v29 }
 0x16c   : > { %11599 = vmatpush3.bf16.msra.mxu1 %v11308_v41  ;;  %9944 = vmatprep.mubr.f32.mxu1 %v3546_v16  ;;  %v3553_v41 = vld [vmem:[#allocation2 + $0xd8] sm:$0xff]  ;;  %v1961_v16 = vld [vmem:[#allocation4 + $0x3d0] sm:$0xff] }
 0x16d   : > { %11601 = vmatprep.subr.bf16.mxu1 %v11312_v29  ;;  %9441 = vmatmul.mubr.f32.vlgmr.msra.gmra.mrb[0].mxu0 %v1740_v32  ;;  %v1749_v32 = vld [vmem:[#allocation2 + $0x70] sm:$0xff] }
 0x16e   : > { %11315 = vmatpush3.bf16.msra.mxu0 %v11312_v29  ;;  %9443 = vmatprep.mubr.f32.mxu0 %v1741_v53 }
 0x16f   : > { %9945 = vmatmul.mubr.f32.vlgmr.msra.gmra.mrb[0].mxu1 %v3547_v42  ;;  %11317 = vmatprep.subr.bf16.mxu0 %v11316_v13  ;;  %v3556_v42 = vld [vmem:[#allocation2 + $0xf0] sm:$0xff] }
 0x170   : > { %11603 = vmatpush3.bf16.msra.mxu1 %v11312_v29  ;;  %9947 = vmatprep.mubr.f32.mxu1 %v3548_v51  ;;  %v1962_v29 = vld [vmem:[#allocation4 + $0x3d8] sm:$0xff]  ;;  %v1963_v51 = vld [vmem:[#allocation4 + $0x3e0] sm:$0xff] }
 0x171   : > { %11605 = vmatprep.subr.bf16.mxu1 %v11316_v13  ;;  %9444 = vmatmul.mubr.f32.gmra.mrb[2].mxu0 %v1742_v47  ;;  %v11332_v53 = vpack.c.bf16 %v1962_v29, %v1961_v16  ;;  %v1751_v47 = vld [vmem:[#allocation2 + $0x80] sm:$0xff]  ;;  %v2132_v16 = vld [vmem:[#allocation2 + $0x278] sm:$0xff] }
 0x172   : > { %11319 = vmatpush3.bf16.msra.mxu0 %v11316_v13  ;;  %9446 = vmatprep.mubr.f32.mxu0 %v1743_v55  ;;  %v1965_v55 = vld [vmem:[#allocation4 + $0x3f0] sm:$0xff]  ;;  %v3937_v29 = vld [vmem:[#allocation2 + $0x2f8] sm:$0xff] }
 0x173   : > { %9948 = vmatmul.mubr.f32.gmra.mrb[2].mxu1 %v3549_v12  ;;  %11321 = vmatprep.subr.bf16.mxu0 %v11320_v57 }
 0x174   : > { %11607 = vmatpush3.bf16.msra.mxu1 %v11316_v13  ;;  %9950 = vmatprep.mubr.f32.mxu1 %v3550_v56  ;;  %v1964_v13 = vld [vmem:[#allocation4 + $0x3e8] sm:$0xff]  ;;  %v1966_v56 = vld [vmem:[#allocation4 + $0x3f8] sm:$0xff] }
 0x175   : > { %11609 = vmatprep.subr.bf16.mxu1 %v11320_v57  ;;  %9447 = vmatmul.mubr.f32.gmra.mrb[4].mxu0 %v1744_v7  ;;  %v11336_v12 = vpack.c.bf16 %v1964_v13, %v1963_v51  ;;  %v11340_v2 = vpack.c.bf16 %v1966_v56, %v1965_v55  ;;  %v2146_v7 = vld [vmem:[#allocation4 + $0x400] sm:$0xff]  ;;  %v2134_v51 = vld [vmem:[#allocation2 + $0x288] sm:$0xff]  ;;  %v2136_v56 = vld [vmem:[#allocation2 + $0x298] sm:$0xff] }
 0x176   : > { %11323 = vmatpush3.bf16.msra.mxu0 %v11320_v57  ;;  %9449 = vmatprep.mubr.f32.mxu0 %v1745_v9  ;;  %v1754_v9 = vld [vmem:[#allocation2 + $0x98] sm:$0xff]  ;;  %v3939_v13 = vld [vmem:[#allocation2 + $0x308] sm:$0xff] }
 0x177   : > { %9951 = vmatmul.mubr.f32.gmra.mrb[4].mxu1 %v3551_v8  ;;  %11325 = vmatprep.subr.bf16.mxu0 %v11324_v22  ;;  %v2147_v8 = vld [vmem:[#allocation4 + $0x408] sm:$0xff] }
 0x178   : > { %11611 = vmatpush3.bf16.msra.mxu1 %v11320_v57  ;;  %9953 = vmatprep.mubr.f32.mxu1 %v3552_v21  ;;  %v1752_v57 = vld [vmem:[#allocation2 + $0x88] sm:$0xff]  ;;  %v13620_v21 = vld [vmem:[#allocation2 + $0x120] sm:$0xff] }
 0x179   : > { %11613 = vmatprep.subr.bf16.mxu1 %v11324_v22  ;;  %9450 = vmatmul.mubr.f32.gmra.mrb[6].mxu0 %v1746_v36  ;;  %v2151_v36 = vld [vmem:[#allocation4 + $0x428] sm:$0xff] }
 0x17a   : > { %11327 = vmatpush3.bf16.msra.mxu0 %v11324_v22  ;;  %9452 = vmatprep.mubr.f32.mxu0 %v1747_v45  ;;  %v4276_v55 = vld [vmem:[#allocation6 + $0xc8] sm:$0xff] }
 0x17b   : > { %9954 = vmatmul.mubr.f32.gmra.mrb[6].mxu1 %v3553_v41  ;;  %11329 = vmatprep.subr.bf16.mxu0 %v11328_v15  ;;  %v2153_v41 = vld [vmem:[#allocation4 + $0x438] sm:$0xff] }
 0x17c   : > { %11615 = vmatpush3.bf16.msra.mxu1 %v11324_v22  ;;  %9956 = vmatprep.mubr.f32.mxu1 %v3554_v49  ;;  %v2148_v22 = vld [vmem:[#allocation4 + $0x410] sm:$0xff]  ;;  %v4271_v49 = vld [vmem:[#allocation6 + $0xa0] sm:$0xff] }
 0x17d   : > { %11617 = vmatprep.subr.bf16.mxu1 %v11328_v15  ;;  %9453 = vmatmul.mubr.f32.gmra.mrb[8].mxu0 %v1748_v43  ;;  %v2133_v43 = vld [vmem:[#allocation2 + $0x280] sm:$0xff] }
 0x17e   : > { %11331 = vmatpush3.bf16.msra.mxu0 %v11328_v15  ;;  %9455 = vmatprep.mubr.f32.mxu0 %v1749_v32 }
 0x17f   : > { %9957 = vmatmul.mubr.f32.gmra.mrb[8].mxu1 %v3555_v44  ;;  %11333 = vmatprep.subr.bf16.mxu0 %v11332_v53  ;;  %v3938_v44 = vld [vmem:[#allocation2 + $0x300] sm:$0xff] }
 0x180   : > { %11619 = vmatpush3.bf16.msra.mxu1 %v11328_v15  ;;  %9959 = vmatprep.mubr.f32.mxu1 %v3556_v42  ;;  %v4272_v15 = vld [vmem:[#allocation6 + $0xa8] sm:$0xff]  ;;  %v4273_v42 = vld [vmem:[#allocation6 + $0xb0] sm:$0xff] }
 0x181   : > { %11621 = vmatprep.subr.bf16.mxu1 %v11332_v53  ;;  %9456 = vmatmul.mubr.f32.gmra.mrb[10].mxu0 %v1750_v18  ;;  %v11672_v32 = vpack.c.bf16 %v4272_v15, %v4271_v49  ;;  %v2135_v18 = vld [vmem:[#allocation2 + $0x290] sm:$0xff]  ;;  %v4592_v49 = vld [vmem:[#allocation6 + $0x108] sm:$0xff] }
 0x182   : > { %11335 = vmatpush3.bf16.msra.mxu0 %v11332_v53  ;;  %9458 = vmatprep.mubr.f32.mxu0 %v1751_v47 }
 0x183   : > { %9960 = vmatmul.mubr.f32.gmra.mrb[10].mxu1 %v3557_v46  ;;  %11337 = vmatprep.subr.bf16.mxu0 %v11336_v12  ;;  %v3940_v46 = vld [vmem:[#allocation2 + $0x310] sm:$0xff] }
 0x184   : > { %11623 = vmatpush3.bf16.msra.mxu1 %v11332_v53  ;;  %9962 = vmatprep.mubr.f32.mxu1 %v13484_v17  ;;  %v11344_v17 = vpack.c.bf16 %v2147_v8, %v2146_v7  ;;  %v4274_v53 = vld [vmem:[#allocation6 + $0xb8] sm:$0xff]  ;;  %v4277_v8 = vld [vmem:[#allocation6 + $0xd0] sm:$0xff] }
 0x185   : > { %11625 = vmatprep.subr.bf16.mxu1 %v11336_v12  ;;  %9459 = vmatmul.mubr.f32.gmra.mrb[12].mxu0 %v1752_v57  ;;  %v11676_v47 = vpack.c.bf16 %v4274_v53, %v4273_v42  ;;  %v3941_v57 = vld [vmem:[#allocation2 + $0x318] sm:$0xff] }
 0x186   : > { %11339 = vmatpush3.bf16.msra.mxu0 %v11336_v12  ;;  %9461 = vmatprep.mubr.f32.mxu0 %v1753_v58  ;;  %v2137_v58 = vld [vmem:[#allocation2 + $0x2a0] sm:$0xff] }
 0x187   : > { %9963 = vmatmul.mubr.f32.gmra.mrb[12].mxu1 %v13488_v24  ;;  %11341 = vmatprep.subr.bf16.mxu0 %v11340_v2  ;;  %v11348_v24 = vpack.c.bf16 %v2149_v23, %v2148_v22  ;;  %v3943_v22 = vld [vmem:[#allocation2 + $0x328] sm:$0xff]  ;;  %v2139_v23 = vld [vmem:[#allocation2 + $0x2b0] sm:$0xff] }
 0x188   : > { %11627 = vmatpush3.bf16.msra.mxu1 %v11336_v12  ;;  %9965 = vmatprep.mubr.f32.mxu1 %v13620_v21  ;;  %v4275_v12 = vld [vmem:[#allocation6 + $0xc0] sm:$0xff] }
 0x189   : > { %11629 = vmatprep.subr.bf16.mxu1 %v11340_v2  ;;  %9462 = vmatmul.mubr.f32.gmra.mrb[14].mxu0 %v1754_v9  ;;  %v11680_v7 = vpack.c.bf16 %v4276_v55, %v4275_v12  ;;  %v4278_v9 = vld [vmem:[#allocation6 + $0xd8] sm:$0xff] }
 0x18a   : > { %11343 = vmatpush3.bf16.msra.mxu0 %v11340_v2  ;;  %9496 = vmatprep.mubr.f32.mxu0 %v13494_v48  ;;  %v11352_v48 = vpack.c.bf16 %v2151_v36, %v2150_v28  ;;  %v11684_v28 = vpack.c.bf16 %v4278_v9, %v4277_v8  ;;  %v2140_v36 = vld [vmem:[#allocation2 + $0x2b8] sm:$0xff] }
 0x18b   : > { %9966 = vmatmul.mubr.f32.gmra.mrb[14].mxu1 %v13620_v21  ;;  %11345 = vmatprep.subr.bf16.mxu0 %v11344_v17 }
 0x18c   : > { %11631 = vmatpush3.bf16.msra.mxu1 %v11340_v2  ;;  %10000 = vmatprep.mubr.f32.mxu1 %v13496_v38  ;;  %v2152_v38 = vld [vmem:[#allocation4 + $0x430] sm:$0xff]  ;;  %v3942_v2 = vld [vmem:[#allocation2 + $0x320] sm:$0xff] }
 0x18d   : > { %11633 = vmatprep.subr.bf16.mxu1 %v11344_v17  ;;  %9497 = vmatmul.mubr.f32.vlgmr.msra.gmra.mrb[0].mxu0 %v13498_v63  ;;  %v11356_v63 = vpack.c.bf16 %v2153_v41, %v2152_v38  ;;  %v2143_v38 = vld [vmem:[#allocation2 + $0x2d0] sm:$0xff]  ;;  %v2144_v41 = vld [vmem:[#allocation2 + $0x2d8] sm:$0xff] }
 0x18e   : > { %11347 = vmatpush3.bf16.msra.mxu0 %v11344_v17  ;;  %9499 = vmatprep.mubr.f32.mxu0 %v13504_v59  ;;  %v2155_v59 = vld [vmem:[#allocation4 + $0x448] sm:$0xff] }
 0x18f   : > { %10001 = vmatmul.mubr.f32.vlgmr.msra.gmra.mrb[0].mxu1 %v13500_v1  ;;  %11349 = vmatprep.subr.bf16.mxu0 %v11348_v24  ;;  %v2154_v1 = vld [vmem:[#allocation4 + $0x440] sm:$0xff] }
 0x190   : > { %11635 = vmatpush3.bf16.msra.mxu1 %v11344_v17  ;;  %10003 = vmatprep.mubr.f32.mxu1 %v13506_v35  ;;  %v11360_v35 = vpack.c.bf16 %v2155_v59, %v2154_v1  ;;  %v2138_v17 = vld [vmem:[#allocation2 + $0x2a8] sm:$0xff]  ;;  %v4282_v59 = vld [vmem:[#allocation6 + $0xf8] sm:$0xff] }
 0x191   : > { %11637 = vmatprep.subr.bf16.mxu1 %v11348_v24  ;;  %9500 = vmatmul.mubr.f32.gmra.mrb[2].mxu0 %v13510_v30  ;;  %v2156_v30 = vld [vmem:[#allocation4 + $0x450] sm:$0xff] }
 0x192   : > { %11351 = vmatpush3.bf16.msra.mxu0 %v11348_v24  ;;  %9502 = vmatprep.mubr.f32.mxu0 %v13516_v61 }
 0x193   : > { %10004 = vmatmul.mubr.f32.gmra.mrb[2].mxu1 %v13512_v60  ;;  %11353 = vmatprep.subr.bf16.mxu0 %v11352_v48  ;;  %v2157_v60 = vld [vmem:[#allocation4 + $0x458] sm:$0xff] }
 0x194   : > { %11639 = vmatpush3.bf16.msra.mxu1 %v11348_v24  ;;  %10006 = vmatprep.mubr.f32.mxu1 %v13518_v0  ;;  %v11364_v61 = vpack.c.bf16 %v2157_v60, %v2156_v30  ;;  %v2158_v0 = vld [vmem:[#allocation4 + $0x460] sm:$0xff]  ;;  %v3944_v24 = vld [vmem:[#allocation2 + $0x330] sm:$0xff] }
 0x195   : > { %11641 = vmatprep.subr.bf16.mxu1 %v11352_v48  ;;  %9503 = vmatmul.mubr.f32.gmra.mrb[4].mxu0 %v13522_v5  ;;  %v2159_v5 = vld [vmem:[#allocation4 + $0x468] sm:$0xff]  ;;  %v4235_v60 = vld [vmem:[#allocation6 + $0x10] sm:$0xff] }
 0x196   : > { %11355 = vmatpush3.bf16.msra.mxu0 %v11352_v48  ;;  %9505 = vmatprep.mubr.f32.mxu0 %v13528_v10  ;;  %v2160_v10 = vld [vmem:[#allocation4 + $0x470] sm:$0xff] }
 0x197   : > { %10007 = vmatmul.mubr.f32.gmra.mrb[4].mxu1 %v13524_v6  ;;  %11357 = vmatprep.subr.bf16.mxu0 %v11356_v63  ;;  %v11368_v6 = vpack.c.bf16 %v2159_v5, %v2158_v0  ;;  %v4237_v5 = vld [vmem:[#allocation6 + $0x20] sm:$0xff] }
 0x198   : > { %11643 = vmatpush3.bf16.msra.mxu1 %v11352_v48  ;;  %10009 = vmatprep.mubr.f32.mxu1 %v13530_v11  ;;  %v2161_v11 = vld [vmem:[#allocation4 + $0x478] sm:$0xff] }
 0x199   : > { %11645 = vmatprep.subr.bf16.mxu1 %v11356_v63  ;;  %9506 = vmatmul.mubr.f32.gmra.mrb[6].mxu0 %v13534_v19  ;;  %v1948_v19 = vld [vmem:[#allocation2 + $0x1b0] sm:$0xff]  ;;  %v3945_v48 = vld [vmem:[#allocation2 + $0x338] sm:$0xff] }
 0x19a   : > { %11359 = vmatpush3.bf16.msra.mxu0 %v11356_v63  ;;  %9508 = vmatprep.mubr.f32.mxu0 %v13540_v25  ;;  %v4267_v25 = vld [vmem:[#allocation6 + $0x80] sm:$0xff] }
 0x19b   : > { %10010 = vmatmul.mubr.f32.gmra.mrb[6].mxu1 %v13536_v20  ;;  %11361 = vmatprep.subr.bf16.mxu0 %v11360_v35  ;;  %v11372_v20 = vpack.c.bf16 %v2161_v11, %v2160_v10  ;;  %v4239_v11 = vld [vmem:[#allocation6 + $0x30] sm:$0xff] }
 0x19c   : > { %11647 = vmatpush3.bf16.msra.mxu1 %v11356_v63  ;;  %10012 = vmatprep.mubr.f32.mxu1 %v13542_v26  ;;  %v4268_v26 = vld [vmem:[#allocation6 + $0x88] sm:$0xff]  ;;  %v4279_v63 = vld [vmem:[#allocation6 + $0xe0] sm:$0xff] }
 0x19d   : > { %11649 = vmatprep.subr.bf16.mxu1 %v11360_v35  ;;  %9509 = vmatmul.mubr.f32.gmra.mrb[8].mxu0 %v13546_v33  ;;  %v1949_v33 = vld [vmem:[#allocation2 + $0x1b8] sm:$0xff] }
 0x19e   : > { %11363 = vmatpush3.bf16.msra.mxu0 %v11360_v35  ;;  %9511 = vmatprep.mubr.f32.mxu0 %v13552_v39  ;;  %v3934_v39 = vld [vmem:[#allocation2 + $0x2e0] sm:$0xff] }
 0x19f   : > { %10013 = vmatmul.mubr.f32.gmra.mrb[8].mxu1 %v13548_v34  ;;  %11365 = vmatprep.subr.bf16.mxu0 %v11364_v61  ;;  %v2129_v34 = vld [vmem:[#allocation2 + $0x260] sm:$0xff] }
 0x1a0   : > { %11651 = vmatpush3.bf16.msra.mxu1 %v11360_v35  ;;  %10015 = vmatprep.mubr.f32.mxu1 %v13554_v52  ;;  %v11664_v52 = vpack.c.bf16 %v4268_v26, %v4267_v25  ;;  %v4234_v35 = vld [vmem:[#allocation6 + $0x8] sm:$0xff]  ;;  %v4241_v25 = vld [vmem:[#allocation6 + $0x40] sm:$0xff] }
 0x1a1   : > { %11653 = vmatprep.subr.bf16.mxu1 %v11364_v61  ;;  %9512 = vmatmul.mubr.f32.gmra.mrb[10].mxu0 %v13558_v54  ;;  %v4269_v54 = vld [vmem:[#allocation6 + $0x90] sm:$0xff]  ;;  %v4242_v26 = vld [vmem:[#allocation6 + $0x48] sm:$0xff] }
 0x1a2   : > { %11367 = vmatpush3.bf16.msra.mxu0 %v11364_v61  ;;  %9514 = vmatprep.mubr.f32.mxu0 %v13564_v3  ;;  %v2130_v3 = vld [vmem:[#allocation2 + $0x268] sm:$0xff] }
 0x1a3   : > { %10016 = vmatmul.mubr.f32.gmra.mrb[10].mxu1 %v13560_v62  ;;  %11369 = vmatprep.subr.bf16.mxu0 %v11368_v6  ;;  %v4270_v62 = vld [vmem:[#allocation6 + $0x98] sm:$0xff] }
 0x1a4   : > { %11655 = vmatpush3.bf16.msra.mxu1 %v11364_v61  ;;  %10018 = vmatprep.mubr.f32.mxu1 %v13566_v4  ;;  %v3935_v4 = vld [vmem:[#allocation2 + $0x2e8] sm:$0xff]  ;;  %v11668_v45 = vpack.c.bf16 %v4270_v62, %v4269_v54  ;;  %v4236_v61 = vld [vmem:[#allocation6 + $0x18] sm:$0xff]  ;;  %v4245_v54 = vld [vmem:[#allocation6 + $0x60] sm:$0xff] }
 0x1a5   : > { %11657 = vmatprep.subr.bf16.mxu1 %v11368_v6  ;;  %9515 = vmatmul.mubr.f32.gmra.mrb[12].mxu0 %v13570_v27  ;;  %v2131_v27 = vld [vmem:[#allocation2 + $0x270] sm:$0xff]  ;;  %v13667_v0 = vpack.c.bf16 %v4236_v61, %v4235_v60  ;;  %v4246_v62 = vld [vmem:[#allocation6 + $0x68] sm:$0xff] }
 0x1a6   : > { %11371 = vmatpush3.bf16.msra.mxu0 %v11368_v6  ;;  %9517 = vmatprep.mubr.f32.mxu0 %v1948_v19  ;;  %v4240_v19 = vld [vmem:[#allocation6 + $0x38] sm:$0xff] }
 0x1a7   : > { %10019 = vmatmul.mubr.f32.gmra.mrb[12].mxu1 %v13572_v31  ;;  %11373 = vmatprep.subr.bf16.mxu0 %v11372_v20  ;;  %v3936_v31 = vld [vmem:[#allocation2 + $0x2f0] sm:$0xff] }
 0x1a8   : > { %11659 = vmatpush3.bf16.msra.mxu1 %v11368_v6  ;;  %10021 = vmatprep.mubr.f32.mxu1 %v13620_v21  ;;  %v4238_v6 = vld [vmem:[#allocation6 + $0x28] sm:$0xff] }
 0x1a9   : > { %11661 = vmatprep.subr.bf16.mxu1 %v11372_v20  ;;  %9518 = vmatmul.mubr.f32.gmra.mrb[14].mxu0 %v1949_v33  ;;  %v13671_v10 = vpack.c.bf16 %v4238_v6, %v4237_v5  ;;  %v13679_v33 = vpack.c.bf16 %v4242_v26, %v4241_v25 }
 0x1aa   : > { %11375 = vmatpush3.bf16.msra.mxu0 %v11372_v20  ;;  %9552 = vmatprep.mubr.f32.mxu0 %v2129_v34  ;;  %v4243_v34 = vld [vmem:[#allocation6 + $0x50] sm:$0xff] }
 0x1ab   : > { %10022 = vmatmul.mubr.f32.gmra.mrb[14].mxu1 %v13620_v21  ;;  %11665 = vmatprep.subr.bf16.mxu0 %v11664_v52 }
 0x1ac   : > { %11663 = vmatpush3.bf16.msra.mxu1 %v11372_v20  ;;  %10056 = vmatprep.mubr.f32.mxu1 %v3934_v39  ;;  %v13675_v20 = vpack.c.bf16 %v4240_v19, %v4239_v11  ;;  %v4244_v39 = vld [vmem:[#allocation6 + $0x58] sm:$0xff] }
 0x1ad   : > { %11953 = vmatprep.subr.bf16.mxu1 %v11664_v52  ;;  %9553 = vmatmul.mubr.f32.vlgmr.msra.gmra.mrb[0].mxu0 %v2130_v3  ;;  %v13687_v3 = vpack.c.bf16 %v4246_v62, %v4245_v54 }
 0x1ae   : > { %9555 = vmatprep.mubr.f32.mxu0 %v2131_v27  ;;  %11667 = vmatpush3.bf16.msra.mxu0 %v11664_v52  ;;  %v4248_v27 = vld [vmem:[#allocation6 + $0x78] sm:$0xff] }
 0x1af   : > { %10057 = vmatmul.mubr.f32.vlgmr.msra.gmra.mrb[0].mxu1 %v3935_v4  ;;  %11669 = vmatprep.subr.bf16.mxu0 %v11668_v45  ;;  %v4247_v4 = vld [vmem:[#allocation6 + $0x70] sm:$0xff] }
 0x1b0   : > { %10059 = vmatprep.mubr.f32.mxu1 %v3936_v31  ;;  %11955 = vmatpush3.bf16.msra.mxu1 %v11664_v52  ;;  %v13683_v52 = vpack.c.bf16 %v4244_v39, %v4243_v34  ;;  %v13691_v31 = vpack.c.bf16 %v4248_v27, %v4247_v4 }
 0x1b1   : > { %11957 = vmatprep.subr.bf16.mxu1 %v11668_v45  ;;  %9556 = vmatmul.mubr.f32.gmra.mrb[2].mxu0 %v2132_v16  ;;  %v13701_v16 = vld [vmem:[%s14698_s2] ss:$0 sm:$0xff] }
 0x1b2   : > { %9558 = vmatprep.mubr.f32.mxu0 %v2133_v43  ;;  %11671 = vmatpush3.bf16.msra.mxu0 %v11668_v45 }
 0x1b3   : > { %10060 = vmatmul.mubr.f32.gmra.mrb[2].mxu1 %v3937_v29  ;;  %11673 = vmatprep.subr.bf16.mxu0 %v11672_v32 }
 0x1b4   : > { %10062 = vmatprep.mubr.f32.mxu1 %v3938_v44  ;;  %11959 = vmatpush3.bf16.msra.mxu1 %v11668_v45  ;;  %v4591_v45 = vld [vmem:[#allocation6 + $0x100] sm:$0xff] }
 0x1b5   : > { %11961 = vmatprep.subr.bf16.mxu1 %v11672_v32  ;;  %9559 = vmatmul.mubr.f32.gmra.mrb[4].mxu0 %v2134_v51  ;;  %v13695_v15 = vpack.c.bf16 %v4592_v49, %v4591_v45 }
 0x1b6   : > { %9561 = vmatprep.mubr.f32.mxu0 %v2135_v18  ;;  %11675 = vmatpush3.bf16.msra.mxu0 %v11672_v32 }
 0x1b7   : > { %10063 = vmatmul.mubr.f32.gmra.mrb[4].mxu1 %v3939_v13  ;;  %11677 = vmatprep.subr.bf16.mxu0 %v11676_v47 }
 0x1b8   : > { %10065 = vmatprep.mubr.f32.mxu1 %v3940_v46  ;;  %11963 = vmatpush3.bf16.msra.mxu1 %v11672_v32 }
 0x1b9   : > { %11965 = vmatprep.subr.bf16.mxu1 %v11676_v47  ;;  %9562 = vmatmul.mubr.f32.gmra.mrb[6].mxu0 %v2136_v56 }
 0x1ba   : > { %9564 = vmatprep.mubr.f32.mxu0 %v2137_v58  ;;  %11679 = vmatpush3.bf16.msra.mxu0 %v11676_v47 }
 0x1bb   : > { %10066 = vmatmul.mubr.f32.gmra.mrb[6].mxu1 %v3941_v57  ;;  %11681 = vmatprep.subr.bf16.mxu0 %v11680_v7 }
 0x1bc   : > { %10068 = vmatprep.mubr.f32.mxu1 %v3942_v2  ;;  %11967 = vmatpush3.bf16.msra.mxu1 %v11676_v47 }
 0x1bd   : > { %11969 = vmatprep.subr.bf16.mxu1 %v11680_v7  ;;  %9565 = vmatmul.mubr.f32.gmra.mrb[8].mxu0 %v2138_v17 }
 0x1be   : > { %9567 = vmatprep.mubr.f32.mxu0 %v2139_v23  ;;  %11683 = vmatpush3.bf16.msra.mxu0 %v11680_v7 }
 0x1bf   : > { %10069 = vmatmul.mubr.f32.gmra.mrb[8].mxu1 %v3943_v22  ;;  %11685 = vmatprep.subr.bf16.mxu0 %v11684_v28 }
 0x1c0   : > { %10071 = vmatprep.mubr.f32.mxu1 %v3944_v24  ;;  %11971 = vmatpush3.bf16.msra.mxu1 %v11680_v7 }
 0x1c1   : > { %11973 = vmatprep.subr.bf16.mxu1 %v11684_v28  ;;  %9568 = vmatmul.mubr.f32.gmra.mrb[10].mxu0 %v2140_v36 }
 0x1c2   : > { %9570 = vmatprep.mubr.f32.mxu0 %v13604_v37  ;;  %11687 = vmatpush3.bf16.msra.mxu0 %v11684_v28  ;;  %v4280_v37 = vld [vmem:[#allocation6 + $0xe8] sm:$0xff] }
 0x1c3   : > { %10072 = vmatmul.mubr.f32.gmra.mrb[10].mxu1 %v3945_v48  ;;  %v11688_v1 = vpack.c.bf16 %v4280_v37, %v4279_v63 }
 0x1c4   : > { %10074 = vmatprep.mubr.f32.mxu1 %v13606_v40  ;;  %11975 = vmatpush3.bf16.msra.mxu1 %v11684_v28  ;;  %v4281_v40 = vld [vmem:[#allocation6 + $0xf0] sm:$0xff] }
 0x1c5   : > { %9571 = vmatmul.mubr.f32.gmra.mrb[12].mxu0 %v13610_v50  ;;  %11689 = vmatprep.subr.bf16.mxu0 %v11688_v1  ;;  %v11692_v50 = vpack.c.bf16 %v4282_v59, %v4281_v40 }
 0x1c6   : > { %9573 = vmatprep.mubr.f32.mxu0 %v2143_v38  ;;  %11977 = vmatprep.subr.bf16.mxu1 %v11688_v1 }
 0x1c7   : > { %10075 = vmatmul.mubr.f32.gmra.mrb[12].mxu1 %v13612_v14  ;;  %11691 = vmatpush3.bf16.msra.mxu0 %v11688_v1  ;;  %v4233_v14 = vld [vmem:[#allocation6] sm:$0xff] }
 0x1c8   : > { %10077 = vmatprep.mubr.f32.mxu1 %v13620_v21  ;;  %11979 = vmatpush3.bf16.msra.mxu1 %v11688_v1  ;;  %v13661_v30 = vpack.c.bf16 %v4234_v35, %v4233_v14 }
 0x1c9   : > { %9574 = vmatmul.mubr.f32.gmra.mrb[14].mxu0 %v2144_v41  ;;  %11693 = vmatprep.subr.bf16.mxu0 %v11692_v50 }
 0x1ca   : > { %10112 = vmatprep.mubr.f32.mxu0 %v13620_v21  ;;  %11981 = vmatprep.subr.bf16.mxu1 %v11692_v50 }
 0x1cb   : > { %10078 = vmatmul.mubr.f32.gmra.mrb[14].mxu1 %v13620_v21  ;;  %11695 = vmatpush3.bf16.msra.mxu0 %v11692_v50 }
 0x1cc   : > { %11983 = vmatpush3.bf16.msra.mxu1 %v11692_v50  ;;  %11697 = vmatprep.subr.bf16.mxu0 %v13661_v30 }
 0x1cd   : > { %11985 = vmatprep.subr.bf16.mxu1 %v13661_v30 }
 0x1ce   : > { %10113 = vmatmul.mubr.f32.vlgmr.msra.gmra.mrb[16].mxu0 %v13620_v21 }
 0x1cf   : > { %11699 = vmatpush3.bf16.msra.mxu0 %v13661_v30 }
 0x1d0   : > { %11701 = vmatprep.subr.bf16.mxu0 %v13667_v0 }
 0x1d3   : > { %11703 = vmatpush3.bf16.msra.mxu0 %v13667_v0 }
 0x1d4   : > { %11705 = vmatprep.subr.bf16.mxu0 %v13671_v10 }
 0x1d7   : > { %11707 = vmatpush3.bf16.msra.mxu0 %v13671_v10 }
 0x1d8   : > { %11709 = vmatprep.subr.bf16.mxu0 %v13675_v20 }
 0x1db   : > { %11711 = vmatpush3.bf16.msra.mxu0 %v13675_v20 }
 0x1dc   : > { %11713 = vmatprep.subr.bf16.mxu0 %v13679_v33 }
 0x1df   : > { %11715 = vmatpush3.bf16.msra.mxu0 %v13679_v33 }
 0x1e0   : > { %11717 = vmatprep.subr.bf16.mxu0 %v13683_v52 }
 0x1e3   : > { %11719 = vmatpush3.bf16.msra.mxu0 %v13683_v52 }
 0x1e4   : > { %11721 = vmatprep.subr.bf16.mxu0 %v13687_v3 }
 0x1e7   : > { %11723 = vmatpush3.bf16.msra.mxu0 %v13687_v3 }
 0x1e8   : > { %11725 = vmatprep.subr.bf16.mxu0 %v13691_v31 }
 0x1eb   : > { %11727 = vmatpush3.bf16.msra.mxu0 %v13691_v31 }
 0x1ec   : > { %11729 = vmatprep.subr.bf16.mxu0 %v13695_v15 }
 0x280   : > { %v9554_v29 = vpop.f32.mrb[0].mxu0 }
 0x281   : > { %v2331_v44 = vadd.f32 %v9554_v29, %v13701_v16  ;;  %v2228_v42 = vpop.f32.mrb[1].mxu0 }
 0x282   : > { %v10058_v43 = vpop.f32.mrb[0].mxu1  ;;  %v2330_v51 = vadd.f32 %v13701_v16, %v2228_v42 }
 0x283   : > { %v4135_v32 = vadd.f32 %v10058_v43, %v13701_v16  ;;  %v4032_v53 = vpop.f32.mrb[1].mxu1  ;;  %v2347_v18 = vmax.f32 %v2331_v44, 0.0 }
 0x284   : > { %v4134_v13 = vadd.f32 %v13701_v16, %v4032_v53  ;;  %v2346_v47 = vmax.f32 %v2330_v51, 0.0  ;;  %v9557_v55 = vpop.f32.mrb[2].mxu0 }
 0x285   : > { %v13707_v46 = vmax.f32 %v4135_v32, 0.0  ;;  %2364 = vst [vmem:[#allocation3 + $0x138] sm:$0xff] %v2347_v18  ;;  %2381 = vst [vmem:[#allocation3 + $0x19] sm:$0x7f] %v2347_v18  ;;  %v2333_v57 = vadd.f32 %v9557_v55, %v13701_v16  ;;  %v2238_v2 = vpop.f32.mrb[3].mxu0 }
 0x286   : > { %v13709_v12 = vmax.f32 %v4134_v13, 0.0  ;;  %v10061_v56 = vpop.f32.mrb[2].mxu1  ;;  %2398 = vst [vmem:[#allocation3 + $0x257] sm:$0xff] %v2347_v18  ;;  %2363 = vst [vmem:[#allocation3 + $0x130] sm:$0xff] %v2346_v47  ;;  %v2332_v8 = vadd.f32 %v13701_v16, %v2238_v2  ;;  %10115 = vmatprep.mubr.f32.mxu0 %v2346_v47 }
 0x287   : > { %4168 = vst [vmem:[#allocation3 + $0x1b8] sm:$0xff] %v13707_v46  ;;  %4185 = vst [vmem:[#allocation3 + $0x99] sm:$0x7f] %v13707_v46  ;;  %v4137_v58 = vadd.f32 %v10061_v56, %v13701_v16  ;;  %v4042_v7 = vpop.f32.mrb[3].mxu1  ;;  %v2349_v17 = vmax.f32 %v2333_v57, 0.0  ;;  %10116 = vmatmul.mubr.f32.gmra.mrb[18].mxu0 %v2347_v18 }
 0x288   : > { %4202 = vst [vmem:[#allocation3 + $0x2d7] sm:$0xff] %v13707_v46  ;;  %2380 = vst [vmem:[#allocation3 + $0x11] sm:$0xff] %v2346_v47  ;;  %v4136_v9 = vadd.f32 %v13701_v16, %v4042_v7  ;;  %v2348_v23 = vmax.f32 %v2332_v8, 0.0  ;;  %v9560_v28 = vpop.f32.mrb[4].mxu0 }
 0x289   : > { %2397 = vst [vmem:[#allocation3 + $0x24f] sm:$0xfe] %v2346_v47  ;;  %4167 = vst [vmem:[#allocation3 + $0x1b0] sm:$0xff] %v13709_v12  ;;  %v13721_v22 = vmax.f32 %v4137_v58, 0.0  ;;  %v2335_v48 = vadd.f32 %v9560_v28, %v13701_v16  ;;  %v2248_v41 = vpop.f32.mrb[5].mxu0 }
 0x28a   : > { %4184 = vst [vmem:[#allocation3 + $0x91] sm:$0xff] %v13709_v12  ;;  %4201 = vst [vmem:[#allocation3 + $0x2cf] sm:$0xfe] %v13709_v12  ;;  %v13723_v24 = vmax.f32 %v4136_v9, 0.0  ;;  %v10064_v36 = vpop.f32.mrb[4].mxu1  ;;  %v2334_v37 = vadd.f32 %v13701_v16, %v2248_v41  ;;  %10118 = vmatprep.mubr.f32.mxu0 %v2348_v23 }
 0x28b   : > { %2366 = vst [vmem:[#allocation3 + $0x148] sm:$0xff] %v2349_v17  ;;  %2383 = vst [vmem:[#allocation3 + $0x29] sm:$0x7f] %v2349_v17  ;;  %v4139_v38 = vadd.f32 %v10064_v36, %v13701_v16  ;;  %v4052_v63 = vpop.f32.mrb[5].mxu1  ;;  %v2351_v40 = vmax.f32 %v2335_v48, 0.0  ;;  %10119 = vmatmul.mubr.f32.gmra.mrb[20].mxu0 %v2349_v17 }
 0x28c   : > { %2400 = vst [vmem:[#allocation3 + $0x267] sm:$0xff] %v2349_v17  ;;  %4170 = vst [vmem:[#allocation3 + $0x1c8] sm:$0xff] %v13721_v22  ;;  %v4138_v1 = vadd.f32 %v13701_v16, %v4052_v63  ;;  %v2350_v50 = vmax.f32 %v2334_v37, 0.0  ;;  %v9563_v35 = vpop.f32.mrb[6].mxu0 }
 0x28d   : > { %4187 = vst [vmem:[#allocation3 + $0xa9] sm:$0x7f] %v13721_v22  ;;  %4204 = vst [vmem:[#allocation3 + $0x2e7] sm:$0xff] %v13721_v22  ;;  %v13735_v59 = vmax.f32 %v4139_v38, 0.0  ;;  %v2337_v61 = vadd.f32 %v9563_v35, %v13701_v16  ;;  %v2258_v6 = vpop.f32.mrb[7].mxu0 }
 0x28e   : > { %2365 = vst [vmem:[#allocation3 + $0x140] sm:$0xff] %v2348_v23  ;;  %2382 = vst [vmem:[#allocation3 + $0x21] sm:$0xff] %v2348_v23  ;;  %v13737_v14 = vmax.f32 %v4138_v1, 0.0  ;;  %v10067_v60 = vpop.f32.mrb[6].mxu1  ;;  %v2336_v19 = vadd.f32 %v13701_v16, %v2258_v6  ;;  %10121 = vmatprep.mubr.f32.mxu0 %v2350_v50 }
 0x28f   : > { %2399 = vst [vmem:[#allocation3 + $0x25f] sm:$0xfe] %v2348_v23  ;;  %4169 = vst [vmem:[#allocation3 + $0x1c0] sm:$0xff] %v13723_v24  ;;  %v4141_v5 = vadd.f32 %v10067_v60, %v13701_v16  ;;  %v4062_v11 = vpop.f32.mrb[7].mxu1  ;;  %v2353_v26 = vmax.f32 %v2337_v61, 0.0  ;;  %10122 = vmatmul.mubr.f32.gmra.mrb[22].mxu0 %v2351_v40 }
 0x290   : > { %4186 = vst [vmem:[#allocation3 + $0xa1] sm:$0xff] %v13723_v24  ;;  %4203 = vst [vmem:[#allocation3 + $0x2df] sm:$0xfe] %v13723_v24  ;;  %v4140_v25 = vadd.f32 %v13701_v16, %v4062_v11  ;;  %v2352_v39 = vmax.f32 %v2336_v19, 0.0  ;;  %v9566_v62 = vpop.f32.mrb[8].mxu0 }
 0x291   : > { %2368 = vst [vmem:[#allocation3 + $0x158] sm:$0xff] %v2351_v40  ;;  %2385 = vst [vmem:[#allocation3 + $0x39] sm:$0x7f] %v2351_v40  ;;  %v13749_v34 = vmax.f32 %v4141_v5, 0.0  ;;  %v2339_v27 = vadd.f32 %v9566_v62, %v13701_v16  ;;  %v2268_v49 = vpop.f32.mrb[9].mxu0 }
 0x292   : > { %2402 = vst [vmem:[#allocation3 + $0x277] sm:$0xff] %v2351_v40  ;;  %4172 = vst [vmem:[#allocation3 + $0x1d8] sm:$0xff] %v13735_v59  ;;  %v13751_v54 = vmax.f32 %v4140_v25, 0.0  ;;  %v10070_v4 = vpop.f32.mrb[8].mxu1  ;;  %v2338_v43 = vadd.f32 %v13701_v16, %v2268_v49  ;;  %10124 = vmatprep.mubr.f32.mxu0 %v2352_v39 }
 0x293   : > { %4189 = vst [vmem:[#allocation3 + $0xb9] sm:$0x7f] %v13735_v59  ;;  %4206 = vst [vmem:[#allocation3 + $0x2f7] sm:$0xff] %v13735_v59  ;;  %v4143_v45 = vadd.f32 %v10070_v4, %v13701_v16  ;;  %v4072_v29 = vpop.f32.mrb[9].mxu1  ;;  %v2355_v32 = vmax.f32 %v2339_v27, 0.0  ;;  %10125 = vmatmul.mubr.f32.gmra.mrb[24].mxu0 %v2353_v26  ;;  %v4593_v4 = vld [vmem:[#allocation6 + $0x110] sm:$0xff] }
 0x294   : > { %2367 = vst [vmem:[#allocation3 + $0x150] sm:$0xff] %v2350_v50  ;;  %2384 = vst [vmem:[#allocation3 + $0x31] sm:$0xff] %v2350_v50  ;;  %v4142_v44 = vadd.f32 %v13701_v16, %v4072_v29  ;;  %v2354_v53 = vmax.f32 %v2338_v43, 0.0  ;;  %v9569_v13 = vpop.f32.mrb[10].mxu0  ;;  %v4594_v27 = vld [vmem:[#allocation6 + $0x118] sm:$0xff]  ;;  %v13809_v29 = vld [vmem:[#allocation3 + $0x10] sm:$0xff] }
 0x295   : > { %2401 = vst [vmem:[#allocation3 + $0x26f] sm:$0xfe] %v2350_v50  ;;  %4171 = vst [vmem:[#allocation3 + $0x1d0] sm:$0xff] %v13737_v14  ;;  %v13763_v42 = vmax.f32 %v4143_v45, 0.0  ;;  %v2341_v47 = vadd.f32 %v9569_v13, %v13701_v16  ;;  %v2278_v56 = vpop.f32.mrb[11].mxu0  ;;  %v4595_v43 = vld [vmem:[#allocation6 + $0x120] sm:$0xff] }
 0x296   : > { %4188 = vst [vmem:[#allocation3 + $0xb1] sm:$0xff] %v13737_v14  ;;  %4205 = vst [vmem:[#allocation3 + $0x2ef] sm:$0xfe] %v13737_v14  ;;  %v13765_v51 = vmax.f32 %v4142_v44, 0.0  ;;  %v10073_v18 = vpop.f32.mrb[10].mxu1  ;;  %v2340_v58 = vadd.f32 %v13701_v16, %v2278_v56  ;;  %10127 = vmatprep.mubr.f32.mxu0 %v2354_v53  ;;  %v4596_v44 = vld [vmem:[#allocation6 + $0x128] sm:$0xff] }
 0x297   : > { %2370 = vst [vmem:[#allocation3 + $0x168] sm:$0xff] %v2353_v26  ;;  %2387 = vst [vmem:[#allocation3 + $0x49] sm:$0x7f] %v2353_v26  ;;  %v4145_v55 = vadd.f32 %v10073_v18, %v13701_v16  ;;  %v4082_v57 = vpop.f32.mrb[11].mxu1  ;;  %v2357_v7 = vmax.f32 %v2341_v47, 0.0  ;;  %10128 = vmatmul.mubr.f32.gmra.mrb[26].mxu0 %v2355_v32  ;;  %v4597_v13 = vld [vmem:[#allocation6 + $0x130] sm:$0xff] }
 0x298   : > { %2404 = vst [vmem:[#allocation3 + $0x287] sm:$0xff] %v2353_v26  ;;  %4174 = vst [vmem:[#allocation3 + $0x1e8] sm:$0xff] %v13749_v34  ;;  %v4144_v2 = vadd.f32 %v13701_v16, %v4082_v57  ;;  %v2356_v9 = vmax.f32 %v2340_v58, 0.0  ;;  %v9572_v23 = vpop.f32.mrb[12].mxu0  ;;  %v4598_v18 = vld [vmem:[#allocation6 + $0x138] sm:$0xff]  ;;  %v4599_v47 = vld [vmem:[#allocation6 + $0x140] sm:$0xff] }
 0x299   : > { %4191 = vst [vmem:[#allocation3 + $0xc9] sm:$0x7f] %v13749_v34  ;;  %4208 = vst [vmem:[#allocation3 + $0x307] sm:$0xff] %v13749_v34  ;;  %v13777_v8 = vmax.f32 %v4145_v55, 0.0  ;;  %v2343_v36 = vadd.f32 %v9572_v23, %v13701_v16  ;;  %v2288_v38 = vpop.f32.mrb[13].mxu0  ;;  %v4600_v55 = vld [vmem:[#allocation6 + $0x148] sm:$0xff] }
 0x29a   : > { %2369 = vst [vmem:[#allocation3 + $0x160] sm:$0xff] %v2352_v39  ;;  %2386 = vst [vmem:[#allocation3 + $0x41] sm:$0xff] %v2352_v39  ;;  %v13779_v17 = vmax.f32 %v4144_v2, 0.0  ;;  %v10076_v28 = vpop.f32.mrb[12].mxu1  ;;  %v2342_v63 = vadd.f32 %v13701_v16, %v2288_v38  ;;  %10130 = vmatprep.mubr.f32.mxu0 %v2356_v9  ;;  %v4601_v56 = vld [vmem:[#allocation6 + $0x150] sm:$0xff]  ;;  %v4602_v57 = vld [vmem:[#allocation6 + $0x158] sm:$0xff] }
 0x29b   : > { %2403 = vst [vmem:[#allocation3 + $0x27f] sm:$0xfe] %v2352_v39  ;;  %4173 = vst [vmem:[#allocation3 + $0x1e0] sm:$0xff] %v13751_v54  ;;  %v4147_v48 = vadd.f32 %v10076_v28, %v13701_v16  ;;  %v4092_v41 = vpop.f32.mrb[13].mxu1  ;;  %v2359_v1 = vmax.f32 %v2343_v36, 0.0  ;;  %10131 = vmatmul.mubr.f32.gmra.mrb[28].mxu0 %v2357_v7  ;;  %v4603_v58 = vld [vmem:[#allocation6 + $0x160] sm:$0xff] }
 0x29c   : > { %4190 = vst [vmem:[#allocation3 + $0xc1] sm:$0xff] %v13751_v54  ;;  %4207 = vst [vmem:[#allocation3 + $0x2ff] sm:$0xfe] %v13751_v54  ;;  %v4146_v37 = vadd.f32 %v13701_v16, %v4092_v41  ;;  %v2358_v50 = vmax.f32 %v2342_v63, 0.0  ;;  %v9575_v60 = vpop.f32.mrb[14].mxu0  ;;  %v4604_v2 = vld [vmem:[#allocation6 + $0x168] sm:$0xff] }
 0x29d   : > { %2372 = vst [vmem:[#allocation3 + $0x178] sm:$0xff] %v2355_v32  ;;  %2389 = vst [vmem:[#allocation3 + $0x59] sm:$0x7f] %v2355_v32  ;;  %v13791_v40 = vmax.f32 %v4147_v48, 0.0  ;;  %v2345_v5 = vadd.f32 %v9575_v60, %v13701_v16  ;;  %v2298_v11 = vpop.f32.mrb[15].mxu0  ;;  %v4785_v23 = vld [vmem:[#allocation6 + $0x180] sm:$0xff] }
 0x29e   : > { %2406 = vst [vmem:[#allocation3 + $0x297] sm:$0xff] %v2355_v32  ;;  %4176 = vst [vmem:[#allocation3 + $0x1f8] sm:$0xff] %v13763_v42  ;;  %v13793_v35 = vmax.f32 %v4146_v37, 0.0  ;;  %v10079_v61 = vpop.f32.mrb[14].mxu1  ;;  %v2344_v25 = vadd.f32 %v13701_v16, %v2298_v11  ;;  %10133 = vmatprep.mubr.f32.mxu0 %v2358_v50  ;;  %v13815_v32 = vld [vmem:[#allocation3 + $0x18] sm:$0xff]  ;;  %v4786_v28 = vld [vmem:[#allocation6 + $0x188] sm:$0xff] }
 0x29f   : > { %4193 = vst [vmem:[#allocation3 + $0xd9] sm:$0x7f] %v13763_v42  ;;  %4210 = vst [vmem:[#allocation3 + $0x317] sm:$0xff] %v13763_v42  ;;  %v4149_v6 = vadd.f32 %v10079_v61, %v13701_v16  ;;  %v4102_v19 = vpop.f32.mrb[15].mxu1  ;;  %v2361_v39 = vmax.f32 %v2345_v5, 0.0  ;;  %10134 = vmatmul.mubr.f32.gmra.mrb[30].mxu0 %v2359_v1  ;;  %v4787_v36 = vld [vmem:[#allocation6 + $0x190] sm:$0xff] }
 0x2a0   : > { %2371 = vst [vmem:[#allocation3 + $0x170] sm:$0xff] %v2354_v53  ;;  %2388 = vst [vmem:[#allocation3 + $0x51] sm:$0xff] %v2354_v53  ;;  %v4148_v26 = vadd.f32 %v13701_v16, %v4102_v19  ;;  %v2360_v45 = vmax.f32 %v2344_v25, 0.0  ;;  %10168 = vmatprep.mubr.f32.mxu0 %v13620_v21  ;;  %v13806_v16 = vpack.c.bf16 %v4594_v27, %v4593_v4  ;;  %v4788_v48 = vld [vmem:[#allocation6 + $0x198] sm:$0xff]  ;;  %v4789_v41 = vld [vmem:[#allocation6 + $0x1a0] sm:$0xff] }
 0x2a1   : > { %2405 = vst [vmem:[#allocation3 + $0x28f] sm:$0xfe] %v2354_v53  ;;  %4175 = vst [vmem:[#allocation3 + $0x1f0] sm:$0xff] %v13765_v51  ;;  %v4165_v62 = vmax.f32 %v4149_v6, 0.0  ;;  %v13823_v53 = vld [vmem:[#allocation3 + $0x20] sm:$0xff]  ;;  %v13914_v38 = vpack.c.bf16 %v4788_v48, %v4787_v36  ;;  %v13918_v37 = vld [vmem:[#allocation3 + $0x250] sm:$0xff] }
 0x2a2   : > { %4192 = vst [vmem:[#allocation3 + $0xd1] sm:$0xff] %v13765_v51  ;;  %4209 = vst [vmem:[#allocation3 + $0x30f] sm:$0xfe] %v13765_v51  ;;  %v4164_v49 = vmax.f32 %v4148_v26, 0.0  ;;  %10616 = vmatprep.mubr.f32.mxu1 %v2360_v45  ;;  %v13933_v60 = vld [vmem:[#allocation3 + $0x98] sm:$0xff]  ;;  %v13936_v61 = vld [vmem:[#allocation3 + $0x260] sm:$0xff] }
 0x2a3   : > { %2374 = vst [vmem:[#allocation3 + $0x188] sm:$0xff] %v2357_v7  ;;  %2391 = vst [vmem:[#allocation3 + $0x69] sm:$0x7f] %v2357_v7  ;;  %10169 = vmatmul.mubr.f32.vlgmr.msra.gmra.mrb[16].mxu0 %v13620_v21  ;;  %10617 = vmatmul.mubr.f32.vlgmr.msra.gmra.mrb[16].mxu1 %v2361_v39  ;;  %v13819_v21 = vpack.c.bf16 %v4596_v44, %v4595_v43  ;;  %v4792_v5 = vld [vmem:[#allocation6 + $0x1b8] sm:$0xff]  ;;  %v13945_v6 = vld [vmem:[#allocation3 + $0x268] sm:$0xff] }
 0x2a4   : > { %2408 = vst [vmem:[#allocation3 + $0x2a7] sm:$0xff] %v2357_v7  ;;  %4178 = vst [vmem:[#allocation3 + $0x208] sm:$0xff] %v13777_v8  ;;  %10171 = vmatprep.mubr.f32.mxu0 %v13809_v29  ;;  %11731 = vmatpush3.bf16.msra.mxu0 %v13695_v15  ;;  %v4605_v7 = vld [vmem:[#allocation6 + $0x170] sm:$0xff]  ;;  %v4793_v19 = vld [vmem:[#allocation6 + $0x1c0] sm:$0xff] }
 0x2a5   : > { %4195 = vst [vmem:[#allocation3 + $0xe9] sm:$0x7f] %v13777_v8  ;;  %4212 = vst [vmem:[#allocation3 + $0x327] sm:$0xff] %v13777_v8  ;;  %10619 = vmatprep.mubr.f32.mxu1 %v13709_v12  ;;  %11987 = vmatpush3.bf16.msra.mxu1 %v13661_v30  ;;  %v13829_v30 = vld [vmem:[#allocation3 + $0x28] sm:$0xff]  ;;  %v13833_v12 = vpack.c.bf16 %v4598_v18, %v4597_v13  ;;  %v13954_v26 = vld [vmem:[#allocation3 + $0x270] sm:$0xff] }
 0x2a6   : > { %2373 = vst [vmem:[#allocation3 + $0x180] sm:$0xff] %v2356_v9  ;;  %2390 = vst [vmem:[#allocation3 + $0x61] sm:$0xff] %v2356_v9  ;;  %11733 = vmatprep.subr.bf16.mxu0 %v13806_v16  ;;  %11989 = vmatprep.subr.bf16.mxu1 %v13667_v0  ;;  %v13951_v25 = vld [vmem:[#allocation3 + $0xa8] sm:$0xff]  ;;  %v13963_v4 = vld [vmem:[#allocation3 + $0x278] sm:$0xff] }
 0x2a7   : > { %2407 = vst [vmem:[#allocation3 + $0x29f] sm:$0xfe] %v2356_v9  ;;  %4177 = vst [vmem:[#allocation3 + $0x200] sm:$0xff] %v13779_v17  ;;  %10172 = vmatmul.mubr.f32.gmra.mrb[18].mxu0 %v13815_v32  ;;  %10620 = vmatmul.mubr.f32.gmra.mrb[18].mxu1 %v13707_v46  ;;  %v13837_v46 = vld [vmem:[#allocation3 + $0x30] sm:$0xff]  ;;  %v4606_v9 = vld [vmem:[#allocation6 + $0x178] sm:$0xff] }
 0x2a8   : > { %4194 = vst [vmem:[#allocation3 + $0xe1] sm:$0xff] %v13779_v17  ;;  %4211 = vst [vmem:[#allocation3 + $0x31f] sm:$0xfe] %v13779_v17  ;;  %10174 = vmatprep.mubr.f32.mxu0 %v13823_v53  ;;  %11735 = vmatpush3.bf16.msra.mxu0 %v13806_v16  ;;  %v4796_v43 = vld [vmem:[#allocation6 + $0x1d8] sm:$0xff]  ;;  %v13976_v44 = vld [vmem:[#allocation3 + $0xc0] sm:$0xff] }
 0x2a9   : > { %2376 = vst [vmem:[#allocation3 + $0x198] sm:$0xff] %v2359_v1  ;;  %2393 = vst [vmem:[#allocation3 + $0x79] sm:$0x7f] %v2359_v1  ;;  %10622 = vmatprep.mubr.f32.mxu1 %v13723_v24  ;;  %11991 = vmatpush3.bf16.msra.mxu1 %v13667_v0  ;;  %v13843_v0 = vld [vmem:[#allocation3 + $0x38] sm:$0xff]  ;;  %v13847_v24 = vpack.c.bf16 %v4600_v55, %v4599_v47  ;;  %v4797_v18 = vld [vmem:[#allocation6 + $0x1e0] sm:$0xff] }
 0x2aa   : > { %2410 = vst [vmem:[#allocation3 + $0x2b7] sm:$0xff] %v2359_v1  ;;  %4180 = vst [vmem:[#allocation3 + $0x218] sm:$0xff] %v13791_v40  ;;  %11737 = vmatprep.subr.bf16.mxu0 %v13819_v21  ;;  %11993 = vmatprep.subr.bf16.mxu1 %v13671_v10  ;;  %v4790_v1 = vld [vmem:[#allocation6 + $0x1a8] sm:$0xff]  ;;  %v13990_v55 = vld [vmem:[#allocation3 + $0x290] sm:$0xff] }
 0x2ab   : > { %4197 = vst [vmem:[#allocation3 + $0xf9] sm:$0x7f] %v13791_v40  ;;  %4214 = vst [vmem:[#allocation3 + $0x337] sm:$0xff] %v13791_v40  ;;  %10175 = vmatmul.mubr.f32.gmra.mrb[20].mxu0 %v13829_v30  ;;  %10623 = vmatmul.mubr.f32.gmra.mrb[20].mxu1 %v13721_v22  ;;  %v13851_v22 = vld [vmem:[#allocation3 + $0x40] sm:$0xff]  ;;  %v13987_v47 = vld [vmem:[#allocation3 + $0xc8] sm:$0xff] }
 0x2ac   : > { %2375 = vst [vmem:[#allocation3 + $0x190] sm:$0xff] %v2358_v50  ;;  %2392 = vst [vmem:[#allocation3 + $0x71] sm:$0xff] %v2358_v50  ;;  %10177 = vmatprep.mubr.f32.mxu0 %v13837_v46  ;;  %11739 = vmatpush3.bf16.msra.mxu0 %v13819_v21  ;;  %v4979_v48 = vld [vmem:[#allocation6 + $0x200] sm:$0xff] }
 0x2ad   : > { %2409 = vst [vmem:[#allocation3 + $0x2af] sm:$0xfe] %v2358_v50  ;;  %4179 = vst [vmem:[#allocation3 + $0x210] sm:$0xff] %v13793_v35  ;;  %10625 = vmatprep.mubr.f32.mxu1 %v13737_v14  ;;  %11995 = vmatpush3.bf16.msra.mxu1 %v13671_v10  ;;  %v13857_v10 = vld [vmem:[#allocation3 + $0x48] sm:$0xff]  ;;  %v13861_v14 = vpack.c.bf16 %v4602_v57, %v4601_v56  ;;  %v13930_v50 = vpack.c.bf16 %v4790_v1, %v4789_v41  ;;  %v13999_v57 = vld [vmem:[#allocation3 + $0x298] sm:$0xff] }
 0x2ae   : > { %4196 = vst [vmem:[#allocation3 + $0xf1] sm:$0xff] %v13793_v35  ;;  %4213 = vst [vmem:[#allocation3 + $0x32f] sm:$0xfe] %v13793_v35  ;;  %11741 = vmatprep.subr.bf16.mxu0 %v13833_v12  ;;  %11997 = vmatprep.subr.bf16.mxu1 %v13675_v20  ;;  %v4798_v56 = vld [vmem:[#allocation6 + $0x1e8] sm:$0xff] }
 0x2af   : > { %2378 = vst [vmem:[#allocation3 + $0x1a8] sm:$0xff] %v2361_v39  ;;  %2395 = vst [vmem:[#allocation3 + $0x89] sm:$0x7f] %v2361_v39  ;;  %10178 = vmatmul.mubr.f32.gmra.mrb[22].mxu0 %v13843_v0  ;;  %10626 = vmatmul.mubr.f32.gmra.mrb[22].mxu1 %v13735_v59  ;;  %v13865_v59 = vld [vmem:[#allocation3 + $0x50] sm:$0xff]  ;;  %v4980_v1 = vld [vmem:[#allocation6 + $0x208] sm:$0xff] }
 0x2b0   : > { %2412 = vst [vmem:[#allocation3 + $0x2c7] sm:$0xff] %v2361_v39  ;;  %4182 = vst [vmem:[#allocation3 + $0x228] sm:$0xff] %v4165_v62  ;;  %10180 = vmatprep.mubr.f32.mxu0 %v13851_v22  ;;  %11743 = vmatpush3.bf16.msra.mxu0 %v13833_v12  ;;  %v4794_v39 = vld [vmem:[#allocation6 + $0x1c8] sm:$0xff] }
 0x2b1   : > { %4199 = vst [vmem:[#allocation3 + $0x109] sm:$0x7f] %v4165_v62  ;;  %4216 = vst [vmem:[#allocation3 + $0x347] sm:$0xff] %v4165_v62  ;;  %10628 = vmatprep.mubr.f32.mxu1 %v13751_v54  ;;  %11999 = vmatpush3.bf16.msra.mxu1 %v13675_v20  ;;  %v13871_v20 = vld [vmem:[#allocation3 + $0x58] sm:$0xff]  ;;  %v13875_v54 = vpack.c.bf16 %v4604_v2, %v4603_v58  ;;  %v13958_v62 = vld [vmem:[#allocation3 + $0xb0] sm:$0xff]  ;;  %v13966_v27 = vpack.c.bf16 %v4794_v39, %v4793_v19 }
 0x2b2   : > { %2377 = vst [vmem:[#allocation3 + $0x1a0] sm:$0xff] %v2360_v45  ;;  %2394 = vst [vmem:[#allocation3 + $0x81] sm:$0xff] %v2360_v45  ;;  %11745 = vmatprep.subr.bf16.mxu0 %v13847_v24  ;;  %12001 = vmatprep.subr.bf16.mxu1 %v13679_v33  ;;  %v14002_v58 = vpack.c.bf16 %v4798_v56, %v4797_v18  ;;  %v4799_v2 = vld [vmem:[#allocation6 + $0x1f0] sm:$0xff]  ;;  %v4984_v56 = vld [vmem:[#allocation6 + $0x228] sm:$0xff] }
 0x2b3   : > { %2411 = vst [vmem:[#allocation3 + $0x2bf] sm:$0xfe] %v2360_v45  ;;  %4181 = vst [vmem:[#allocation3 + $0x220] sm:$0xff] %v4164_v49  ;;  %10181 = vmatmul.mubr.f32.gmra.mrb[24].mxu0 %v13857_v10  ;;  %10629 = vmatmul.mubr.f32.gmra.mrb[24].mxu1 %v13749_v34  ;;  %v13879_v34 = vld [vmem:[#allocation3 + $0x60] sm:$0xff]  ;;  %v4795_v45 = vld [vmem:[#allocation6 + $0x1d0] sm:$0xff] }
 0x2b4   : > { %4198 = vst [vmem:[#allocation3 + $0x101] sm:$0xff] %v4164_v49  ;;  %4215 = vst [vmem:[#allocation3 + $0x33f] sm:$0xfe] %v4164_v49  ;;  %10183 = vmatprep.mubr.f32.mxu0 %v13865_v59  ;;  %11747 = vmatpush3.bf16.msra.mxu0 %v13847_v24  ;;  %v13969_v49 = vld [vmem:[#allocation3 + $0xb8] sm:$0xff]  ;;  %v13984_v13 = vpack.c.bf16 %v4796_v43, %v4795_v45  ;;  %v14026_v41 = vld [vmem:[#allocation3 + $0x2b0] sm:$0xff] }
 0x2b5   : > { %10631 = vmatprep.mubr.f32.mxu1 %v13765_v51  ;;  %12003 = vmatpush3.bf16.msra.mxu1 %v13679_v33  ;;  %v13885_v33 = vld [vmem:[#allocation3 + $0x68] sm:$0xff]  ;;  %v13889_v51 = vpack.c.bf16 %v4606_v9, %v4605_v7  ;;  %v14005_v7 = vld [vmem:[#allocation3 + $0xd8] sm:$0xff]  ;;  %v14008_v9 = vld [vmem:[#allocation3 + $0x2a0] sm:$0xff] }
 0x2b6   : > { %11749 = vmatprep.subr.bf16.mxu0 %v13861_v14  ;;  %12005 = vmatprep.subr.bf16.mxu1 %v13683_v52  ;;  %v14041_v19 = vld [vmem:[#allocation3 + $0xf8] sm:$0xff]  ;;  %v4981_v45 = vld [vmem:[#allocation6 + $0x210] sm:$0xff] }
 0x2b7   : > { %10184 = vmatmul.mubr.f32.gmra.mrb[26].mxu0 %v13871_v20  ;;  %10632 = vmatmul.mubr.f32.gmra.mrb[26].mxu1 %v13763_v42  ;;  %v13893_v42 = vld [vmem:[#allocation3 + $0x70] sm:$0xff]  ;;  %v14056_v18 = vld [vmem:[#allocation3 + $0x2c8] sm:$0xff] }
 0x2b8   : > { %10186 = vmatprep.mubr.f32.mxu0 %v13879_v34  ;;  %11751 = vmatpush3.bf16.msra.mxu0 %v13861_v14 }
 0x2b9   : > { %10634 = vmatprep.mubr.f32.mxu1 %v13779_v17  ;;  %12007 = vmatpush3.bf16.msra.mxu1 %v13683_v52  ;;  %v13899_v52 = vld [vmem:[#allocation3 + $0x78] sm:$0xff]  ;;  %v13903_v17 = vpack.c.bf16 %v4786_v28, %v4785_v23  ;;  %v13916_v63 = vld [vmem:[#allocation3 + $0x88] sm:$0xff] }
 0x2ba   : > { %11753 = vmatprep.subr.bf16.mxu0 %v13875_v54  ;;  %12009 = vmatprep.subr.bf16.mxu1 %v13687_v3  ;;  %v4800_v23 = vld [vmem:[#allocation6 + $0x1f8] sm:$0xff]  ;;  %v14017_v28 = vld [vmem:[#allocation3 + $0x2a8] sm:$0xff]  ;;  %v14046_v39 = vld [vmem:[#allocation3 + $0x2c0] sm:$0xff] }
 0x2bb   : > { %10187 = vmatmul.mubr.f32.gmra.mrb[28].mxu0 %v13885_v33  ;;  %10635 = vmatmul.mubr.f32.gmra.mrb[28].mxu1 %v13777_v8  ;;  %v13907_v8 = vld [vmem:[#allocation3 + $0x80] sm:$0xff]  ;;  %v14020_v36 = vpack.c.bf16 %v4800_v23, %v4799_v2  ;;  %v14060_v2 = vld [vmem:[#allocation3 + $0x2d0] sm:$0xff] }
 0x2bc   : > { %10189 = vmatprep.mubr.f32.mxu0 %v13893_v42  ;;  %11755 = vmatpush3.bf16.msra.mxu0 %v13875_v54  ;;  %v4985_v23 = vld [vmem:[#allocation6 + $0x230] sm:$0xff] }
 0x2bd   : > { %10637 = vmatprep.mubr.f32.mxu1 %v13793_v35  ;;  %12011 = vmatpush3.bf16.msra.mxu1 %v13687_v3  ;;  %v12786_v3 = vld [vmem:[#allocation2 + $0x120] sm:$0xff]  ;;  %v4791_v35 = vld [vmem:[#allocation6 + $0x1b0] sm:$0xff] }
 0x2be   : > { %11757 = vmatprep.subr.bf16.mxu0 %v13889_v51  ;;  %12013 = vmatprep.subr.bf16.mxu1 %v13691_v31  ;;  %v13948_v11 = vpack.c.bf16 %v4792_v5, %v4791_v35  ;;  %v14035_v35 = vld [vmem:[#allocation3 + $0x2b8] sm:$0xff]  ;;  %v14038_v5 = vpack.c.bf16 %v4980_v1, %v4979_v48  ;;  %v14074_v48 = vld [vmem:[#allocation3 + $0x2e0] sm:$0xff] }
 0x2bf   : > { %10190 = vmatmul.mubr.f32.gmra.mrb[30].mxu0 %v13899_v52  ;;  %10638 = vmatmul.mubr.f32.gmra.mrb[30].mxu1 %v13791_v40  ;;  %v13927_v40 = vld [vmem:[#allocation3 + $0x258] sm:$0xff]  ;;  %v4987_v1 = vld [vmem:[#allocation6 + $0x240] sm:$0xff] }
 0x2c0   : > { %11759 = vmatpush3.bf16.msra.mxu0 %v13889_v51  ;;  %10672 = vmatprep.mubr.f32.mxu1 %v13907_v8 }
 0x2c1   : > { %12015 = vmatpush3.bf16.msra.mxu1 %v13691_v31  ;;  %10224 = vmatprep.mubr.f32.mxu0 %v12786_v3  ;;  %v13922_v31 = vld [vmem:[#allocation3 + $0x90] sm:$0xff] }
 0x2c2   : > { %11761 = vmatprep.subr.bf16.mxu0 %v13903_v17  ;;  %12017 = vmatprep.subr.bf16.mxu1 %v13695_v15 }
 0x2c3   : > { %10225 = vmatmul.mubr.f32.vlgmr.msra.gmra.mrb[16].mxu0 %v12786_v3  ;;  %v14023_v3 = vld [vmem:[#allocation3 + $0xe8] sm:$0xff] }
 0x2c4   : > { %10673 = vmatmul.mubr.f32.vlgmr.msra.gmra.mrb[16].mxu1 %v13916_v63  ;;  %10227 = vmatprep.mubr.f32.mxu0 %v13918_v37 }
 0x2c5   : > { %11763 = vmatpush3.bf16.msra.mxu0 %v13903_v17  ;;  %10675 = vmatprep.mubr.f32.mxu1 %v13922_v31 }
 0x2c6   : > { %12019 = vmatpush3.bf16.msra.mxu1 %v13695_v15  ;;  %11765 = vmatprep.subr.bf16.mxu0 %v13914_v38  ;;  %v13940_v15 = vld [vmem:[#allocation3 + $0xa0] sm:$0xff] }
 0x2c7   : > { %10228 = vmatmul.mubr.f32.gmra.mrb[18].mxu0 %v13927_v40  ;;  %12021 = vmatprep.subr.bf16.mxu1 %v13806_v16 }
 0x2c8   : > { %10676 = vmatmul.mubr.f32.gmra.mrb[18].mxu1 %v13933_v60  ;;  %10230 = vmatprep.mubr.f32.mxu0 %v13936_v61 }
 0x2c9   : > { %11767 = vmatpush3.bf16.msra.mxu0 %v13914_v38  ;;  %10678 = vmatprep.mubr.f32.mxu1 %v13940_v15 }
 0x2ca   : > { %12023 = vmatpush3.bf16.msra.mxu1 %v13806_v16  ;;  %11769 = vmatprep.subr.bf16.mxu0 %v13930_v50  ;;  %v13972_v16 = vld [vmem:[#allocation3 + $0x280] sm:$0xff] }
 0x2cb   : > { %10231 = vmatmul.mubr.f32.gmra.mrb[20].mxu0 %v13945_v6  ;;  %12025 = vmatprep.subr.bf16.mxu1 %v13819_v21 }
 0x2cc   : > { %10679 = vmatmul.mubr.f32.gmra.mrb[20].mxu1 %v13951_v25  ;;  %10233 = vmatprep.mubr.f32.mxu0 %v13954_v26 }
 0x2cd   : > { %11771 = vmatpush3.bf16.msra.mxu0 %v13930_v50  ;;  %10681 = vmatprep.mubr.f32.mxu1 %v13958_v62 }
 0x2ce   : > { %12027 = vmatpush3.bf16.msra.mxu1 %v13819_v21  ;;  %11773 = vmatprep.subr.bf16.mxu0 %v13948_v11  ;;  %v13981_v21 = vld [vmem:[#allocation3 + $0x288] sm:$0xff] }
 0x2cf   : > { %10234 = vmatmul.mubr.f32.gmra.mrb[22].mxu0 %v13963_v4  ;;  %12029 = vmatprep.subr.bf16.mxu1 %v13833_v12 }
 0x2d0   : > { %10682 = vmatmul.mubr.f32.gmra.mrb[22].mxu1 %v13969_v49  ;;  %10236 = vmatprep.mubr.f32.mxu0 %v13972_v16 }
 0x2d1   : > { %11775 = vmatpush3.bf16.msra.mxu0 %v13948_v11  ;;  %10684 = vmatprep.mubr.f32.mxu1 %v13976_v44 }
 0x2d2   : > { %12031 = vmatpush3.bf16.msra.mxu1 %v13833_v12  ;;  %11777 = vmatprep.subr.bf16.mxu0 %v13966_v27  ;;  %v13994_v12 = vld [vmem:[#allocation3 + $0xd0] sm:$0xff] }
 0x2d3   : > { %10237 = vmatmul.mubr.f32.gmra.mrb[24].mxu0 %v13981_v21  ;;  %12033 = vmatprep.subr.bf16.mxu1 %v13847_v24 }
 0x2d4   : > { %10685 = vmatmul.mubr.f32.gmra.mrb[24].mxu1 %v13987_v47  ;;  %10239 = vmatprep.mubr.f32.mxu0 %v13990_v55 }
 0x2d5   : > { %11779 = vmatpush3.bf16.msra.mxu0 %v13966_v27  ;;  %10687 = vmatprep.mubr.f32.mxu1 %v13994_v12 }
 0x2d6   : > { %12035 = vmatpush3.bf16.msra.mxu1 %v13847_v24  ;;  %11781 = vmatprep.subr.bf16.mxu0 %v13984_v13  ;;  %v14012_v24 = vld [vmem:[#allocation3 + $0xe0] sm:$0xff] }
 0x2d7   : > { %10240 = vmatmul.mubr.f32.gmra.mrb[26].mxu0 %v13999_v57  ;;  %12037 = vmatprep.subr.bf16.mxu1 %v13861_v14 }
 0x2d8   : > { %10688 = vmatmul.mubr.f32.gmra.mrb[26].mxu1 %v14005_v7  ;;  %10242 = vmatprep.mubr.f32.mxu0 %v14008_v9 }
 0x2d9   : > { %11783 = vmatpush3.bf16.msra.mxu0 %v13984_v13  ;;  %10690 = vmatprep.mubr.f32.mxu1 %v14012_v24 }
 0x2da   : > { %12039 = vmatpush3.bf16.msra.mxu1 %v13861_v14  ;;  %11785 = vmatprep.subr.bf16.mxu0 %v14002_v58  ;;  %v14030_v14 = vld [vmem:[#allocation3 + $0xf0] sm:$0xff] }
 0x2db   : > { %10243 = vmatmul.mubr.f32.gmra.mrb[28].mxu0 %v14017_v28  ;;  %12041 = vmatprep.subr.bf16.mxu1 %v13875_v54 }
 0x2dc   : > { %10691 = vmatmul.mubr.f32.gmra.mrb[28].mxu1 %v14023_v3  ;;  %10245 = vmatprep.mubr.f32.mxu0 %v14026_v41 }
 0x2dd   : > { %11787 = vmatpush3.bf16.msra.mxu0 %v14002_v58  ;;  %10693 = vmatprep.mubr.f32.mxu1 %v14030_v14 }
 0x2de   : > { %12043 = vmatpush3.bf16.msra.mxu1 %v13875_v54  ;;  %11789 = vmatprep.subr.bf16.mxu0 %v14020_v36  ;;  %v4982_v54 = vld [vmem:[#allocation6 + $0x218] sm:$0xff] }
 0x2df   : > { %10246 = vmatmul.mubr.f32.gmra.mrb[30].mxu0 %v14035_v35  ;;  %12045 = vmatprep.subr.bf16.mxu1 %v13889_v51  ;;  %v14053_v43 = vpack.c.bf16 %v4982_v54, %v4981_v45  ;;  %v14088_v45 = vld [vmem:[#allocation3 + $0x2f0] sm:$0xff] }
 0x2e0   : > { %10694 = vmatmul.mubr.f32.gmra.mrb[30].mxu1 %v14041_v19  ;;  %10280 = vmatprep.mubr.f32.mxu0 %v13809_v29  ;;  %v4983_v29 = vld [vmem:[#allocation6 + $0x220] sm:$0xff]  ;;  %v4989_v54 = vld [vmem:[#allocation6 + $0x250] sm:$0xff] }
 0x2e1   : > { %11791 = vmatpush3.bf16.msra.mxu0 %v14020_v36  ;;  %10728 = vmatprep.mubr.f32.mxu1 %v14046_v39 }
 0x2e2   : > { %12047 = vmatpush3.bf16.msra.mxu1 %v13889_v51  ;;  %11793 = vmatprep.subr.bf16.mxu0 %v14038_v5  ;;  %v14066_v51 = vpack.c.bf16 %v4984_v56, %v4983_v29  ;;  %v14102_v29 = vld [vmem:[#allocation3 + $0x300] sm:$0xff] }
 0x2e3   : > { %12049 = vmatprep.subr.bf16.mxu1 %v13903_v17  ;;  %v4991_v56 = vld [vmem:[#allocation6 + $0x260] sm:$0xff] }
 0x2e4   : > { %10281 = vmatmul.mubr.f32.vlgmr.msra.gmra.mrb[16].mxu0 %v13815_v32  ;;  %v14069_v32 = vld [vmem:[#allocation3 + $0x2d8] sm:$0xff] }
 0x2e5   : > { %10729 = vmatmul.mubr.f32.vlgmr.msra.gmra.mrb[16].mxu1 %v14056_v18  ;;  %10283 = vmatprep.mubr.f32.mxu0 %v13823_v53  ;;  %v4986_v53 = vld [vmem:[#allocation6 + $0x238] sm:$0xff] }
 0x2e6   : > { %11795 = vmatpush3.bf16.msra.mxu0 %v14038_v5  ;;  %10731 = vmatprep.mubr.f32.mxu1 %v14060_v2 }
 0x2e7   : > { %12051 = vmatpush3.bf16.msra.mxu1 %v13903_v17  ;;  %11797 = vmatprep.subr.bf16.mxu0 %v14053_v43  ;;  %v14083_v17 = vld [vmem:[#allocation3 + $0x2e8] sm:$0xff] }
 0x2e8   : > { %10284 = vmatmul.mubr.f32.gmra.mrb[18].mxu0 %v13829_v30  ;;  %12053 = vmatprep.subr.bf16.mxu1 %v13914_v38  ;;  %v14080_v30 = vpack.c.bf16 %v4986_v53, %v4985_v23  ;;  %v14116_v23 = vld [vmem:[#allocation3 + $0x310] sm:$0xff] }
 0x2e9   : > { %10732 = vmatmul.mubr.f32.gmra.mrb[18].mxu1 %v14069_v32  ;;  %10286 = vmatprep.mubr.f32.mxu0 %v13837_v46  ;;  %v4988_v46 = vld [vmem:[#allocation6 + $0x248] sm:$0xff]  ;;  %v4993_v53 = vld [vmem:[#allocation6 + $0x270] sm:$0xff] }
 0x2ea   : > { %11799 = vmatpush3.bf16.msra.mxu0 %v14053_v43  ;;  %10734 = vmatprep.mubr.f32.mxu1 %v14074_v48 }
 0x2eb   : > { %12055 = vmatpush3.bf16.msra.mxu1 %v13914_v38  ;;  %11801 = vmatprep.subr.bf16.mxu0 %v14066_v51  ;;  %v14097_v38 = vld [vmem:[#allocation3 + $0x2f8] sm:$0xff] }
 0x2ec   : > { %10287 = vmatmul.mubr.f32.gmra.mrb[20].mxu0 %v13843_v0  ;;  %12057 = vmatprep.subr.bf16.mxu1 %v13930_v50  ;;  %v14094_v0 = vpack.c.bf16 %v4988_v46, %v4987_v1  ;;  %v14130_v1 = vld [vmem:[#allocation3 + $0x320] sm:$0xff] }
 0x2ed   : > { %10735 = vmatmul.mubr.f32.gmra.mrb[20].mxu1 %v14083_v17  ;;  %10289 = vmatprep.mubr.f32.mxu0 %v13851_v22  ;;  %v4990_v22 = vld [vmem:[#allocation6 + $0x258] sm:$0xff]  ;;  %v5173_v46 = vld [vmem:[#allocation6 + $0x280] sm:$0xff] }
 0x2ee   : > { %11803 = vmatpush3.bf16.msra.mxu0 %v14066_v51  ;;  %10737 = vmatprep.mubr.f32.mxu1 %v14088_v45 }
 0x2ef   : > { %12059 = vmatpush3.bf16.msra.mxu1 %v13930_v50  ;;  %11805 = vmatprep.subr.bf16.mxu0 %v14080_v30  ;;  %v14111_v50 = vld [vmem:[#allocation3 + $0x308] sm:$0xff] }
 0x2f0   : > { %10290 = vmatmul.mubr.f32.gmra.mrb[22].mxu0 %v13857_v10  ;;  %12061 = vmatprep.subr.bf16.mxu1 %v13948_v11  ;;  %v14108_v10 = vpack.c.bf16 %v4990_v22, %v4989_v54  ;;  %v14144_v54 = vld [vmem:[#allocation3 + $0x330] sm:$0xff] }
 0x2f1   : > { %10738 = vmatmul.mubr.f32.gmra.mrb[22].mxu1 %v14097_v38  ;;  %10292 = vmatprep.mubr.f32.mxu0 %v13865_v59  ;;  %v4992_v59 = vld [vmem:[#allocation6 + $0x268] sm:$0xff]  ;;  %v4962_v22 = vld [vmem:[#allocation3 + $0x130] sm:$0xff] }
 0x2f2   : > { %11807 = vmatpush3.bf16.msra.mxu0 %v14080_v30  ;;  %10740 = vmatprep.mubr.f32.mxu1 %v14102_v29 }
 0x2f3   : > { %12063 = vmatpush3.bf16.msra.mxu1 %v13948_v11  ;;  %11809 = vmatprep.subr.bf16.mxu0 %v14094_v0  ;;  %v14125_v11 = vld [vmem:[#allocation3 + $0x318] sm:$0xff] }
 0x2f4   : > { %10293 = vmatmul.mubr.f32.gmra.mrb[24].mxu0 %v13871_v20  ;;  %12065 = vmatprep.subr.bf16.mxu1 %v13966_v27  ;;  %v14122_v20 = vpack.c.bf16 %v4992_v59, %v4991_v56  ;;  %v5176_v56 = vld [vmem:[#allocation6 + $0x298] sm:$0xff]  ;;  %v14164_v59 = vld [vmem:[#allocation3 + $0x140] sm:$0xff] }
 0x2f5   : > { %10741 = vmatmul.mubr.f32.gmra.mrb[24].mxu1 %v14111_v50  ;;  %10295 = vmatprep.mubr.f32.mxu0 %v13879_v34  ;;  %v4994_v34 = vld [vmem:[#allocation6 + $0x278] sm:$0xff] }
 0x2f6   : > { %11811 = vmatpush3.bf16.msra.mxu0 %v14094_v0  ;;  %10743 = vmatprep.mubr.f32.mxu1 %v14116_v23 }
 0x2f7   : > { %12067 = vmatpush3.bf16.msra.mxu1 %v13966_v27  ;;  %11813 = vmatprep.subr.bf16.mxu0 %v14108_v10  ;;  %v14139_v27 = vld [vmem:[#allocation3 + $0x328] sm:$0xff] }
 0x2f8   : > { %10296 = vmatmul.mubr.f32.gmra.mrb[26].mxu0 %v13885_v33  ;;  %12069 = vmatprep.subr.bf16.mxu1 %v13984_v13  ;;  %v14136_v33 = vpack.c.bf16 %v4994_v34, %v4993_v53  ;;  %v5177_v53 = vld [vmem:[#allocation6 + $0x2a0] sm:$0xff]  ;;  %v5178_v34 = vld [vmem:[#allocation6 + $0x2a8] sm:$0xff] }
 0x2f9   : > { %10744 = vmatmul.mubr.f32.gmra.mrb[26].mxu1 %v14125_v11  ;;  %10298 = vmatprep.mubr.f32.mxu0 %v13893_v42  ;;  %v5174_v42 = vld [vmem:[#allocation6 + $0x288] sm:$0xff] }
 0x2fa   : > { %11815 = vmatpush3.bf16.msra.mxu0 %v14108_v10  ;;  %10746 = vmatprep.mubr.f32.mxu1 %v14130_v1 }
 0x2fb   : > { %12071 = vmatpush3.bf16.msra.mxu1 %v13984_v13  ;;  %11817 = vmatprep.subr.bf16.mxu0 %v14122_v20  ;;  %v14153_v13 = vld [vmem:[#allocation3 + $0x338] sm:$0xff] }
 0x2fc   : > { %10299 = vmatmul.mubr.f32.gmra.mrb[28].mxu0 %v13899_v52  ;;  %12073 = vmatprep.subr.bf16.mxu1 %v14002_v58  ;;  %v14150_v52 = vpack.c.bf16 %v5174_v42, %v5173_v46  ;;  %v14178_v46 = vld [vmem:[#allocation3 + $0x150] sm:$0xff]  ;;  %v5180_v42 = vld [vmem:[#allocation6 + $0x2b8] sm:$0xff] }
 0x2fd   : > { %10747 = vmatmul.mubr.f32.gmra.mrb[28].mxu1 %v14139_v27  ;;  %10301 = vmatprep.mubr.f32.mxu0 %v13907_v8  ;;  %v5175_v8 = vld [vmem:[#allocation6 + $0x290] sm:$0xff] }
 0x2fe   : > { %11819 = vmatpush3.bf16.msra.mxu0 %v14122_v20  ;;  %10749 = vmatprep.mubr.f32.mxu1 %v14144_v54 }
 0x2ff   : > { %12075 = vmatpush3.bf16.msra.mxu1 %v14002_v58  ;;  %11821 = vmatprep.subr.bf16.mxu0 %v14136_v33  ;;  %v4963_v58 = vld [vmem:[#allocation3 + $0x138] sm:$0xff] }
 0x300   : > { %10302 = vmatmul.mubr.f32.gmra.mrb[30].mxu0 %v13916_v63  ;;  %12077 = vmatprep.subr.bf16.mxu1 %v14020_v36  ;;  %v14162_v63 = vpack.c.bf16 %v5176_v56, %v5175_v8  ;;  %v5182_v8 = vld [vmem:[#allocation6 + $0x2c8] sm:$0xff]  ;;  %v14206_v56 = vld [vmem:[#allocation3 + $0x170] sm:$0xff] }
 0x301   : > { %10750 = vmatmul.mubr.f32.gmra.mrb[30].mxu1 %v14153_v13  ;;  %10336 = vmatprep.mubr.f32.mxu0 %v4962_v22  ;;  %v14192_v22 = vld [vmem:[#allocation3 + $0x160] sm:$0xff] }
 0x302   : > { %11823 = vmatpush3.bf16.msra.mxu0 %v14136_v33  ;;  %10784 = vmatprep.mubr.f32.mxu1 %v13922_v31  ;;  %v14171_v31 = vld [vmem:[#allocation3 + $0x148] sm:$0xff] }
 0x303   : > { %12079 = vmatpush3.bf16.msra.mxu1 %v14020_v36  ;;  %11825 = vmatprep.subr.bf16.mxu0 %v14150_v52  ;;  %v14174_v36 = vpack.c.bf16 %v5178_v34, %v5177_v53  ;;  %v14220_v53 = vld [vmem:[#allocation3 + $0x180] sm:$0xff]  ;;  %v5186_v34 = vld [vmem:[#allocation6 + $0x2e8] sm:$0xff] }
 0x304   : > { %12081 = vmatprep.subr.bf16.mxu1 %v14038_v5 }
 0x305   : > { %10337 = vmatmul.mubr.f32.vlgmr.msra.gmra.mrb[16].mxu0 %v4963_v58  ;;  %v5184_v58 = vld [vmem:[#allocation6 + $0x2d8] sm:$0xff] }
 0x306   : > { %10785 = vmatmul.mubr.f32.vlgmr.msra.gmra.mrb[16].mxu1 %v13933_v60  ;;  %10339 = vmatprep.mubr.f32.mxu0 %v14164_v59  ;;  %v5179_v60 = vld [vmem:[#allocation6 + $0x2b0] sm:$0xff] }
 0x307   : > { %11827 = vmatpush3.bf16.msra.mxu0 %v14150_v52  ;;  %10787 = vmatprep.mubr.f32.mxu1 %v13940_v15  ;;  %v14185_v15 = vld [vmem:[#allocation3 + $0x158] sm:$0xff] }
 0x308   : > { %12083 = vmatpush3.bf16.msra.mxu1 %v14038_v5  ;;  %11829 = vmatprep.subr.bf16.mxu0 %v14162_v63  ;;  %v14188_v5 = vpack.c.bf16 %v5180_v42, %v5179_v60  ;;  %v14234_v60 = vld [vmem:[#allocation3 + $0x190] sm:$0xff]  ;;  %v5188_v42 = vld [vmem:[#allocation6 + $0x2f8] sm:$0xff] }
 0x309   : > { %10340 = vmatmul.mubr.f32.gmra.mrb[18].mxu0 %v14171_v31  ;;  %12085 = vmatprep.subr.bf16.mxu1 %v14053_v43 }
 0x30a   : > { %10788 = vmatmul.mubr.f32.gmra.mrb[18].mxu1 %v13951_v25  ;;  %10342 = vmatprep.mubr.f32.mxu0 %v14178_v46  ;;  %v5181_v25 = vld [vmem:[#allocation6 + $0x2c0] sm:$0xff] }
 0x30b   : > { %11831 = vmatpush3.bf16.msra.mxu0 %v14162_v63  ;;  %10790 = vmatprep.mubr.f32.mxu1 %v13958_v62  ;;  %v14199_v62 = vld [vmem:[#allocation3 + $0x168] sm:$0xff] }
 0x30c   : > { %12087 = vmatpush3.bf16.msra.mxu1 %v14053_v43  ;;  %11833 = vmatprep.subr.bf16.mxu0 %v14174_v36  ;;  %v14202_v43 = vpack.c.bf16 %v5182_v8, %v5181_v25  ;;  %v14248_v25 = vld [vmem:[#allocation3 + $0x1a0] sm:$0xff]  ;;  %v5369_v8 = vld [vmem:[#allocation6 + $0x308] sm:$0xff] }
 0x30d   : > { %10343 = vmatmul.mubr.f32.gmra.mrb[20].mxu0 %v14185_v15  ;;  %12089 = vmatprep.subr.bf16.mxu1 %v14066_v51 }
 0x30e   : > { %10791 = vmatmul.mubr.f32.gmra.mrb[20].mxu1 %v13969_v49  ;;  %10345 = vmatprep.mubr.f32.mxu0 %v14192_v22  ;;  %v5183_v49 = vld [vmem:[#allocation6 + $0x2d0] sm:$0xff] }
 0x30f   : > { %11835 = vmatpush3.bf16.msra.mxu0 %v14174_v36  ;;  %10793 = vmatprep.mubr.f32.mxu1 %v13976_v44  ;;  %v14213_v44 = vld [vmem:[#allocation3 + $0x178] sm:$0xff] }
 0x310   : > { %12091 = vmatpush3.bf16.msra.mxu1 %v14066_v51  ;;  %11837 = vmatprep.subr.bf16.mxu0 %v14188_v5  ;;  %v14216_v51 = vpack.c.bf16 %v5184_v58, %v5183_v49  ;;  %v14263_v58 = vld [vmem:[#allocation3 + $0x108] sm:$0xff] }
 0x311   : > { %10346 = vmatmul.mubr.f32.gmra.mrb[22].mxu0 %v14199_v62  ;;  %12093 = vmatprep.subr.bf16.mxu1 %v14080_v30 }
 0x312   : > { %10794 = vmatmul.mubr.f32.gmra.mrb[22].mxu1 %v13987_v47  ;;  %10348 = vmatprep.mubr.f32.mxu0 %v14206_v56  ;;  %v5185_v47 = vld [vmem:[#allocation6 + $0x2e0] sm:$0xff] }
 0x313   : > { %11839 = vmatpush3.bf16.msra.mxu0 %v14188_v5  ;;  %10796 = vmatprep.mubr.f32.mxu1 %v13994_v12  ;;  %v14227_v12 = vld [vmem:[#allocation3 + $0x188] sm:$0xff] }
 0x314   : > { %12095 = vmatpush3.bf16.msra.mxu1 %v14080_v30  ;;  %11841 = vmatprep.subr.bf16.mxu0 %v14202_v43  ;;  %v14230_v30 = vpack.c.bf16 %v5186_v34, %v5185_v47  ;;  %v5370_v47 = vld [vmem:[#allocation6 + $0x310] sm:$0xff] }
 0x315   : > { %10349 = vmatmul.mubr.f32.gmra.mrb[24].mxu0 %v14213_v44  ;;  %12097 = vmatprep.subr.bf16.mxu1 %v14094_v0 }
 0x316   : > { %10797 = vmatmul.mubr.f32.gmra.mrb[24].mxu1 %v14005_v7  ;;  %10351 = vmatprep.mubr.f32.mxu0 %v14220_v53  ;;  %v5187_v7 = vld [vmem:[#allocation6 + $0x2f0] sm:$0xff] }
 0x317   : > { %11843 = vmatpush3.bf16.msra.mxu0 %v14202_v43  ;;  %10799 = vmatprep.mubr.f32.mxu1 %v14012_v24  ;;  %v14241_v24 = vld [vmem:[#allocation3 + $0x198] sm:$0xff] }
 0x318   : > { %12099 = vmatpush3.bf16.msra.mxu1 %v14094_v0  ;;  %11845 = vmatprep.subr.bf16.mxu0 %v14216_v51  ;;  %v14244_v0 = vpack.c.bf16 %v5188_v42, %v5187_v7  ;;  %v14278_v7 = vld [vmem:[#allocation3 + $0x1b8] sm:$0xff]  ;;  %v5373_v42 = vld [vmem:[#allocation6 + $0x328] sm:$0xff] }
 0x319   : > { %10352 = vmatmul.mubr.f32.gmra.mrb[26].mxu0 %v14227_v12  ;;  %12101 = vmatprep.subr.bf16.mxu1 %v14108_v10 }
 0x31a   : > { %10800 = vmatmul.mubr.f32.gmra.mrb[26].mxu1 %v14023_v3  ;;  %10354 = vmatprep.mubr.f32.mxu0 %v14234_v60  ;;  %v5368_v3 = vld [vmem:[#allocation6 + $0x300] sm:$0xff] }
 0x31b   : > { %11847 = vmatpush3.bf16.msra.mxu0 %v14216_v51  ;;  %10802 = vmatprep.mubr.f32.mxu1 %v14030_v14  ;;  %v14252_v14 = vld [vmem:[#allocation3 + $0x100] sm:$0xff]  ;;  %v14260_v49 = vpack.c.bf16 %v5369_v8, %v5368_v3  ;;  %v5374_v8 = vld [vmem:[#allocation6 + $0x330] sm:$0xff] }
 0x31c   : > { %12103 = vmatpush3.bf16.msra.mxu1 %v14108_v10  ;;  %11849 = vmatprep.subr.bf16.mxu0 %v14230_v30  ;;  %v14257_v10 = vld [vmem:[#allocation3 + $0x1a8] sm:$0xff]  ;;  %v14282_v3 = vld [vmem:[#allocation3 + $0x1c0] sm:$0xff] }
 0x31d   : > { %10355 = vmatmul.mubr.f32.gmra.mrb[28].mxu0 %v14241_v24  ;;  %12105 = vmatprep.subr.bf16.mxu1 %v14122_v20 }
 0x31e   : > { %10803 = vmatmul.mubr.f32.gmra.mrb[28].mxu1 %v14041_v19  ;;  %10357 = vmatprep.mubr.f32.mxu0 %v14248_v25  ;;  %v14268_v19 = vld [vmem:[#allocation3 + $0x1b0] sm:$0xff] }
 0x31f   : > { %11851 = vmatpush3.bf16.msra.mxu0 %v14230_v30  ;;  %10805 = vmatprep.mubr.f32.mxu1 %v14252_v14 }
 0x320   : > { %12107 = vmatpush3.bf16.msra.mxu1 %v14122_v20  ;;  %11853 = vmatprep.subr.bf16.mxu0 %v14244_v0  ;;  %v5371_v20 = vld [vmem:[#allocation6 + $0x318] sm:$0xff] }
 0x321   : > { %10358 = vmatmul.mubr.f32.gmra.mrb[30].mxu0 %v14257_v10  ;;  %12109 = vmatprep.subr.bf16.mxu1 %v14136_v33  ;;  %v14275_v34 = vpack.c.bf16 %v5371_v20, %v5370_v47  ;;  %v14296_v47 = vld [vmem:[#allocation3 + $0x1d0] sm:$0xff]  ;;  %v5376_v20 = vld [vmem:[#allocation6 + $0x340] sm:$0xff] }
 0x322   : > { %10806 = vmatmul.mubr.f32.gmra.mrb[30].mxu1 %v14263_v58  ;;  %10392 = vmatprep.mubr.f32.mxu0 %v13918_v37  ;;  %v5372_v37 = vld [vmem:[#allocation6 + $0x320] sm:$0xff] }
 0x323   : > { %11855 = vmatpush3.bf16.msra.mxu0 %v14244_v0  ;;  %10840 = vmatprep.mubr.f32.mxu1 %v14268_v19 }
 0x324   : > { %12111 = vmatpush3.bf16.msra.mxu1 %v14136_v33  ;;  %11857 = vmatprep.subr.bf16.mxu0 %v14260_v49  ;;  %v14288_v33 = vpack.c.bf16 %v5373_v42, %v5372_v37  ;;  %v14310_v37 = vld [vmem:[#allocation3 + $0x1e0] sm:$0xff]  ;;  %v5378_v42 = vld [vmem:[#allocation6 + $0x350] sm:$0xff] }
 0x325   : > { %12113 = vmatprep.subr.bf16.mxu1 %v14150_v52 }
 0x326   : > { %10393 = vmatmul.mubr.f32.vlgmr.msra.gmra.mrb[16].mxu0 %v13927_v40  ;;  %v14291_v40 = vld [vmem:[#allocation3 + $0x1c8] sm:$0xff] }
 0x327   : > { %10841 = vmatmul.mubr.f32.vlgmr.msra.gmra.mrb[16].mxu1 %v14278_v7  ;;  %10395 = vmatprep.mubr.f32.mxu0 %v13936_v61  ;;  %v5375_v61 = vld [vmem:[#allocation6 + $0x338] sm:$0xff] }
 0x328   : > { %11859 = vmatpush3.bf16.msra.mxu0 %v14260_v49  ;;  %10843 = vmatprep.mubr.f32.mxu1 %v14282_v3 }
 0x329   : > { %12115 = vmatpush3.bf16.msra.mxu1 %v14150_v52  ;;  %11861 = vmatprep.subr.bf16.mxu0 %v14275_v34  ;;  %v14305_v52 = vld [vmem:[#allocation3 + $0x1d8] sm:$0xff] }
 0x32a   : > { %10396 = vmatmul.mubr.f32.gmra.mrb[18].mxu0 %v13945_v6  ;;  %12117 = vmatprep.subr.bf16.mxu1 %v14162_v63  ;;  %v14302_v6 = vpack.c.bf16 %v5375_v61, %v5374_v8  ;;  %v14324_v8 = vld [vmem:[#allocation3 + $0x1f0] sm:$0xff]  ;;  %v5380_v61 = vld [vmem:[#allocation6 + $0x360] sm:$0xff] }
 0x32b   : > { %10844 = vmatmul.mubr.f32.gmra.mrb[18].mxu1 %v14291_v40  ;;  %10398 = vmatprep.mubr.f32.mxu0 %v13954_v26  ;;  %v5377_v26 = vld [vmem:[#allocation6 + $0x348] sm:$0xff] }
 0x32c   : > { %11863 = vmatpush3.bf16.msra.mxu0 %v14275_v34  ;;  %10846 = vmatprep.mubr.f32.mxu1 %v14296_v47 }
 0x32d   : > { %12119 = vmatpush3.bf16.msra.mxu1 %v14162_v63  ;;  %11865 = vmatprep.subr.bf16.mxu0 %v14288_v33  ;;  %v14319_v63 = vld [vmem:[#allocation3 + $0x1e8] sm:$0xff] }
 0x32e   : > { %10399 = vmatmul.mubr.f32.gmra.mrb[20].mxu0 %v13963_v4  ;;  %12121 = vmatprep.subr.bf16.mxu1 %v14174_v36  ;;  %v14316_v4 = vpack.c.bf16 %v5377_v26, %v5376_v20  ;;  %v14338_v20 = vld [vmem:[#allocation3 + $0x200] sm:$0xff]  ;;  %v5382_v26 = vld [vmem:[#allocation6 + $0x370] sm:$0xff] }
 0x32f   : > { %10847 = vmatmul.mubr.f32.gmra.mrb[20].mxu1 %v14305_v52  ;;  %10401 = vmatprep.mubr.f32.mxu0 %v13972_v16  ;;  %v5379_v16 = vld [vmem:[#allocation6 + $0x358] sm:$0xff] }
 0x330   : > { %11867 = vmatpush3.bf16.msra.mxu0 %v14288_v33  ;;  %10849 = vmatprep.mubr.f32.mxu1 %v14310_v37 }
 0x331   : > { %12123 = vmatpush3.bf16.msra.mxu1 %v14174_v36  ;;  %11869 = vmatprep.subr.bf16.mxu0 %v14302_v6  ;;  %v14333_v36 = vld [vmem:[#allocation3 + $0x1f8] sm:$0xff] }
 0x332   : > { %10402 = vmatmul.mubr.f32.gmra.mrb[22].mxu0 %v13981_v21  ;;  %12125 = vmatprep.subr.bf16.mxu1 %v14188_v5  ;;  %v14330_v21 = vpack.c.bf16 %v5379_v16, %v5378_v42  ;;  %v14352_v42 = vld [vmem:[#allocation3 + $0x210] sm:$0xff]  ;;  %v5563_v16 = vld [vmem:[#allocation6 + $0x380] sm:$0xff] }
 0x333   : > { %10850 = vmatmul.mubr.f32.gmra.mrb[22].mxu1 %v14319_v63  ;;  %10404 = vmatprep.mubr.f32.mxu0 %v13990_v55  ;;  %v5381_v55 = vld [vmem:[#allocation6 + $0x368] sm:$0xff] }
 0x334   : > { %11871 = vmatpush3.bf16.msra.mxu0 %v14302_v6  ;;  %10852 = vmatprep.mubr.f32.mxu1 %v14324_v8 }
 0x335   : > { %12127 = vmatpush3.bf16.msra.mxu1 %v14188_v5  ;;  %11873 = vmatprep.subr.bf16.mxu0 %v14316_v4  ;;  %v14347_v5 = vld [vmem:[#allocation3 + $0x208] sm:$0xff] }
 0x336   : > { %10405 = vmatmul.mubr.f32.gmra.mrb[24].mxu0 %v13999_v57  ;;  %12129 = vmatprep.subr.bf16.mxu1 %v14202_v43  ;;  %v14344_v57 = vpack.c.bf16 %v5381_v55, %v5380_v61  ;;  %v14366_v61 = vld [vmem:[#allocation3 + $0x220] sm:$0xff] }
 0x337   : > { %10853 = vmatmul.mubr.f32.gmra.mrb[24].mxu1 %v14333_v36  ;;  %10407 = vmatprep.mubr.f32.mxu0 %v14008_v9  ;;  %v5383_v9 = vld [vmem:[#allocation6 + $0x378] sm:$0xff]  ;;  %v5351_v55 = vld [vmem:[#allocation3 + $0x20] sm:$0xff] }
 0x338   : > { %11875 = vmatpush3.bf16.msra.mxu0 %v14316_v4  ;;  %10855 = vmatprep.mubr.f32.mxu1 %v14338_v20 }
 0x339   : > { %12131 = vmatpush3.bf16.msra.mxu1 %v14202_v43  ;;  %11877 = vmatprep.subr.bf16.mxu0 %v14330_v21  ;;  %v14361_v43 = vld [vmem:[#allocation3 + $0x218] sm:$0xff] }
 0x33a   : > { %10408 = vmatmul.mubr.f32.gmra.mrb[26].mxu0 %v14017_v28  ;;  %12133 = vmatprep.subr.bf16.mxu1 %v14216_v51  ;;  %v14358_v28 = vpack.c.bf16 %v5383_v9, %v5382_v26  ;;  %v5566_v26 = vld [vmem:[#allocation6 + $0x398] sm:$0xff]  ;;  %v5353_v9 = vld [vmem:[#allocation3 + $0x30] sm:$0xff] }
 0x33b   : > { %10856 = vmatmul.mubr.f32.gmra.mrb[26].mxu1 %v14347_v5  ;;  %10410 = vmatprep.mubr.f32.mxu0 %v14026_v41  ;;  %v5564_v41 = vld [vmem:[#allocation6 + $0x388] sm:$0xff] }
 0x33c   : > { %11879 = vmatpush3.bf16.msra.mxu0 %v14330_v21  ;;  %10858 = vmatprep.mubr.f32.mxu1 %v14352_v42 }
 0x33d   : > { %12135 = vmatpush3.bf16.msra.mxu1 %v14216_v51  ;;  %11881 = vmatprep.subr.bf16.mxu0 %v14344_v57  ;;  %v14375_v51 = vld [vmem:[#allocation3 + $0x228] sm:$0xff] }
 0x33e   : > { %10411 = vmatmul.mubr.f32.gmra.mrb[28].mxu0 %v14035_v35  ;;  %12137 = vmatprep.subr.bf16.mxu1 %v14230_v30  ;;  %v14372_v35 = vpack.c.bf16 %v5564_v41, %v5563_v16  ;;  %v5567_v16 = vld [vmem:[#allocation6 + $0x3a0] sm:$0xff]  ;;  %v5568_v41 = vld [vmem:[#allocation6 + $0x3a8] sm:$0xff] }
 0x33f   : > { %10859 = vmatmul.mubr.f32.gmra.mrb[28].mxu1 %v14361_v43  ;;  %10413 = vmatprep.mubr.f32.mxu0 %v14046_v39  ;;  %v5565_v39 = vld [vmem:[#allocation6 + $0x390] sm:$0xff] }
 0x340   : > { %11883 = vmatpush3.bf16.msra.mxu0 %v14344_v57  ;;  %10861 = vmatprep.mubr.f32.mxu1 %v14366_v61 }
 0x341   : > { %12139 = vmatpush3.bf16.msra.mxu1 %v14230_v30  ;;  %11885 = vmatprep.subr.bf16.mxu0 %v14358_v28  ;;  %v5352_v30 = vld [vmem:[#allocation3 + $0x28] sm:$0xff] }
 0x342   : > { %10414 = vmatmul.mubr.f32.gmra.mrb[30].mxu0 %v14056_v18  ;;  %12141 = vmatprep.subr.bf16.mxu1 %v14244_v0  ;;  %v14384_v18 = vpack.c.bf16 %v5566_v26, %v5565_v39  ;;  %v5569_v39 = vld [vmem:[#allocation6 + $0x3b0] sm:$0xff]  ;;  %v5570_v26 = vld [vmem:[#allocation6 + $0x3b8] sm:$0xff] }
 0x343   : > { %10862 = vmatmul.mubr.f32.gmra.mrb[30].mxu1 %v14375_v51  ;;  %10448 = vmatprep.mubr.f32.mxu0 %v5351_v55  ;;  %v5355_v55 = vld [vmem:[#allocation3 + $0x40] sm:$0xff] }
 0x344   : > { %11887 = vmatpush3.bf16.msra.mxu0 %v14358_v28  ;;  %10896 = vmatprep.mubr.f32.mxu1 %v14060_v2  ;;  %v5354_v2 = vld [vmem:[#allocation3 + $0x38] sm:$0xff] }
 0x345   : > { %12143 = vmatpush3.bf16.msra.mxu1 %v14244_v0  ;;  %11889 = vmatprep.subr.bf16.mxu0 %v14372_v35  ;;  %v14391_v0 = vpack.c.bf16 %v5568_v41, %v5567_v16  ;;  %v5573_v16 = vld [vmem:[#allocation6 + $0x3d0] sm:$0xff]  ;;  %v5574_v41 = vld [vmem:[#allocation6 + $0x3d8] sm:$0xff] }
 0x346   : > { %12145 = vmatprep.subr.bf16.mxu1 %v14260_v49 }
 0x347   : > { %10449 = vmatmul.mubr.f32.vlgmr.msra.gmra.mrb[16].mxu0 %v5352_v30  ;;  %v5571_v30 = vld [vmem:[#allocation6 + $0x3c0] sm:$0xff] }
 0x348   : > { %10897 = vmatmul.mubr.f32.vlgmr.msra.gmra.mrb[16].mxu1 %v14069_v32  ;;  %10451 = vmatprep.mubr.f32.mxu0 %v5353_v9  ;;  %v5356_v32 = vld [vmem:[#allocation3 + $0x48] sm:$0xff] }
 0x349   : > { %11891 = vmatpush3.bf16.msra.mxu0 %v14372_v35  ;;  %10899 = vmatprep.mubr.f32.mxu1 %v14074_v48  ;;  %v14399_v48 = vpack.c.bf16 %v5570_v26, %v5569_v39  ;;  %v5572_v9 = vld [vmem:[#allocation6 + $0x3c8] sm:$0xff]  ;;  %v5577_v39 = vld [vmem:[#allocation6 + $0x3f0] sm:$0xff]  ;;  %v5578_v26 = vld [vmem:[#allocation6 + $0x3f8] sm:$0xff] }
 0x34a   : > { %12147 = vmatpush3.bf16.msra.mxu1 %v14260_v49  ;;  %11893 = vmatprep.subr.bf16.mxu0 %v14384_v18  ;;  %v5357_v49 = vld [vmem:[#allocation3 + $0x50] sm:$0xff] }
 0x34b   : > { %10452 = vmatmul.mubr.f32.gmra.mrb[18].mxu0 %v5354_v2  ;;  %12149 = vmatprep.subr.bf16.mxu1 %v14275_v34  ;;  %v5575_v2 = vld [vmem:[#allocation6 + $0x3e0] sm:$0xff] }
 0x34c   : > { %10900 = vmatmul.mubr.f32.gmra.mrb[18].mxu1 %v14083_v17  ;;  %10454 = vmatprep.mubr.f32.mxu0 %v5355_v55  ;;  %v5358_v17 = vld [vmem:[#allocation3 + $0x58] sm:$0xff]  ;;  %v5576_v55 = vld [vmem:[#allocation6 + $0x3e8] sm:$0xff] }
 0x34d   : > { %11895 = vmatpush3.bf16.msra.mxu0 %v14384_v18  ;;  %10902 = vmatprep.mubr.f32.mxu1 %v14088_v45  ;;  %v14407_v45 = vpack.c.bf16 %v5572_v9, %v5571_v30  ;;  %v14443_v30 = vld [vmem:[#allocation3 + $0x348] sm:$0xff]  ;;  %v5760_v9 = vld [vmem:[#allocation6 + $0x410] sm:$0xff] }
 0x34e   : > { %12151 = vmatpush3.bf16.msra.mxu1 %v14275_v34  ;;  %11897 = vmatprep.subr.bf16.mxu0 %v14391_v0  ;;  %v5359_v34 = vld [vmem:[#allocation3 + $0x60] sm:$0xff] }
 0x34f   : > { %10455 = vmatmul.mubr.f32.gmra.mrb[20].mxu0 %v5356_v32  ;;  %12153 = vmatprep.subr.bf16.mxu1 %v14288_v33  ;;  %v5758_v32 = vld [vmem:[#allocation6 + $0x400] sm:$0xff] }
 0x350   : > { %10903 = vmatmul.mubr.f32.gmra.mrb[20].mxu1 %v14097_v38  ;;  %10457 = vmatprep.mubr.f32.mxu0 %v5357_v49  ;;  %v5360_v38 = vld [vmem:[#allocation3 + $0x68] sm:$0xff] }
 0x351   : > { %11899 = vmatpush3.bf16.msra.mxu0 %v14391_v0  ;;  %10905 = vmatprep.mubr.f32.mxu1 %v14102_v29  ;;  %v14415_v29 = vpack.c.bf16 %v5574_v41, %v5573_v16  ;;  %v5759_v49 = vld [vmem:[#allocation6 + $0x408] sm:$0xff]  ;;  %v5762_v16 = vld [vmem:[#allocation6 + $0x420] sm:$0xff] }
 0x352   : > { %12155 = vmatpush3.bf16.msra.mxu1 %v14288_v33  ;;  %11901 = vmatprep.subr.bf16.mxu0 %v14399_v48  ;;  %v5361_v33 = vld [vmem:[#allocation3 + $0x70] sm:$0xff]  ;;  %v5763_v41 = vld [vmem:[#allocation6 + $0x428] sm:$0xff] }
 0x353   : > { %10458 = vmatmul.mubr.f32.gmra.mrb[22].mxu0 %v5358_v17  ;;  %12157 = vmatprep.subr.bf16.mxu1 %v14302_v6  ;;  %v5761_v17 = vld [vmem:[#allocation6 + $0x418] sm:$0xff] }
 0x354   : > { %10906 = vmatmul.mubr.f32.gmra.mrb[22].mxu1 %v14111_v50  ;;  %10460 = vmatprep.mubr.f32.mxu0 %v5359_v34  ;;  %v5362_v50 = vld [vmem:[#allocation3 + $0x78] sm:$0xff]  ;;  %v7137_v34 = vld [vmem:[#allocation3 + $0xa8] sm:$0xff] }
 0x355   : > { %11903 = vmatpush3.bf16.msra.mxu0 %v14399_v48  ;;  %10908 = vmatprep.mubr.f32.mxu1 %v14116_v23  ;;  %v14423_v23 = vpack.c.bf16 %v5576_v55, %v5575_v2  ;;  %v5766_v2 = vld [vmem:[#allocation6 + $0x440] sm:$0xff]  ;;  %v5767_v55 = vld [vmem:[#allocation6 + $0x448] sm:$0xff] }
 0x356   : > { %12159 = vmatpush3.bf16.msra.mxu1 %v14302_v6  ;;  %11905 = vmatprep.subr.bf16.mxu0 %v14407_v45  ;;  %v5363_v6 = vld [vmem:[#allocation3 + $0x80] sm:$0xff] }
 0x357   : > { %10461 = vmatmul.mubr.f32.gmra.mrb[24].mxu0 %v5360_v38  ;;  %12161 = vmatprep.subr.bf16.mxu1 %v14316_v4  ;;  %v7139_v38 = vld [vmem:[#allocation3 + $0xb8] sm:$0xff] }
 0x358   : > { %10909 = vmatmul.mubr.f32.gmra.mrb[24].mxu1 %v14125_v11  ;;  %10463 = vmatprep.mubr.f32.mxu0 %v5361_v33  ;;  %v5364_v11 = vld [vmem:[#allocation3 + $0x88] sm:$0xff]  ;;  %v5765_v33 = vld [vmem:[#allocation6 + $0x438] sm:$0xff] }
 0x359   : > { %11907 = vmatpush3.bf16.msra.mxu0 %v14407_v45  ;;  %10911 = vmatprep.mubr.f32.mxu1 %v14130_v1  ;;  %v14431_v1 = vpack.c.bf16 %v5578_v26, %v5577_v39  ;;  %v5770_v39 = vld [vmem:[#allocation6 + $0x460] sm:$0xff]  ;;  %v5771_v26 = vld [vmem:[#allocation6 + $0x468] sm:$0xff] }
 0x35a   : > { %12163 = vmatpush3.bf16.msra.mxu1 %v14316_v4  ;;  %11909 = vmatprep.subr.bf16.mxu0 %v14415_v29  ;;  %v5365_v4 = vld [vmem:[#allocation3 + $0x90] sm:$0xff] }
 0x35b   : > { %10464 = vmatmul.mubr.f32.gmra.mrb[26].mxu0 %v5362_v50  ;;  %12165 = vmatprep.subr.bf16.mxu1 %v14330_v21  ;;  %v5768_v50 = vld [vmem:[#allocation6 + $0x450] sm:$0xff] }
 0x35c   : > { %10912 = vmatmul.mubr.f32.gmra.mrb[26].mxu1 %v14139_v27  ;;  %10466 = vmatprep.mubr.f32.mxu0 %v5363_v6  ;;  %v14435_v27 = vld [vmem:[#allocation3 + $0x340] sm:$0xff]  ;;  %v5769_v6 = vld [vmem:[#allocation6 + $0x458] sm:$0xff] }
 0x35d   : > { %11911 = vmatpush3.bf16.msra.mxu0 %v14415_v29  ;;  %10914 = vmatprep.mubr.f32.mxu1 %v14144_v54  ;;  %v5366_v54 = vld [vmem:[#allocation3 + $0x98] sm:$0xff] }
 0x35e   : > { %12167 = vmatpush3.bf16.msra.mxu1 %v14330_v21  ;;  %11913 = vmatprep.subr.bf16.mxu0 %v14423_v23  ;;  %v14441_v21 = vpack.c.bf16 %v5759_v49, %v5758_v32  ;;  %v7532_v32 = vld [vmem:[#allocation3 + $0x320] sm:$0xff]  ;;  %v7533_v49 = vld [vmem:[#allocation3 + $0x328] sm:$0xff] }
 0x35f   : > { %10467 = vmatmul.mubr.f32.gmra.mrb[28].mxu0 %v5364_v11  ;;  %12169 = vmatprep.subr.bf16.mxu1 %v14344_v57  ;;  %v5772_v11 = vld [vmem:[#allocation6 + $0x470] sm:$0xff] }
 0x360   : > { %10915 = vmatmul.mubr.f32.gmra.mrb[28].mxu1 %v14153_v13  ;;  %10469 = vmatprep.mubr.f32.mxu0 %v5365_v4  ;;  %v7136_v13 = vld [vmem:[#allocation3 + $0xa0] sm:$0xff]  ;;  %v5773_v4 = vld [vmem:[#allocation6 + $0x478] sm:$0xff] }
 0x361   : > { %11915 = vmatpush3.bf16.msra.mxu0 %v14423_v23  ;;  %10917 = vmatprep.mubr.f32.mxu1 %v14435_v27 }
 0x362   : > { %12171 = vmatpush3.bf16.msra.mxu1 %v14344_v57  ;;  %11917 = vmatprep.subr.bf16.mxu0 %v14431_v1  ;;  %v14452_v57 = vpack.c.bf16 %v5761_v17, %v5760_v9  ;;  %v5959_v17 = vld [vmem:[%s13151_s28 + $0x8] sm:$0xff] }
 0x363   : > { %10470 = vmatmul.mubr.f32.gmra.mrb[30].mxu0 %v5366_v54  ;;  %12173 = vmatprep.subr.bf16.mxu1 %v14358_v28  ;;  %v7534_v54 = vld [vmem:[#allocation3 + $0x330] sm:$0xff] }
 0x364   : > { %10918 = vmatmul.mubr.f32.gmra.mrb[30].mxu1 %v14443_v30  ;;  %10504 = vmatprep.mubr.f32.mxu0 %v14164_v59  ;;  %v7138_v59 = vld [vmem:[#allocation3 + $0xb0] sm:$0xff] }
 0x365   : > { %11919 = vmatpush3.bf16.msra.mxu0 %v14431_v1  ;;  %10952 = vmatprep.mubr.f32.mxu1 %v7136_v13  ;;  %v14556_v13 = vld [vmem:[%s14700_s4] ss:$0 sm:$0xff] }
 0x366   : > { %12175 = vmatpush3.bf16.msra.mxu1 %v14358_v28  ;;  %11921 = vmatprep.subr.bf16.mxu0 %v14441_v21  ;;  %v14459_v28 = vpack.c.bf16 %v5763_v41, %v5762_v16  ;;  %v5958_v16 = vld [vmem:[%s13151_s28] sm:$0xff] }
 0x367   : > { %12177 = vmatprep.subr.bf16.mxu1 %v14372_v35 }
 0x368   : > { %10505 = vmatmul.mubr.f32.vlgmr.msra.gmra.mrb[16].mxu0 %v14171_v31  ;;  %v5764_v31 = vld [vmem:[#allocation6 + $0x430] sm:$0xff] }
 0x369   : > { %10953 = vmatmul.mubr.f32.vlgmr.msra.gmra.mrb[16].mxu1 %v7137_v34  ;;  %10507 = vmatprep.mubr.f32.mxu0 %v14178_v46  ;;  %v7140_v46 = vld [vmem:[#allocation3 + $0xc0] sm:$0xff] }
 0x36a   : > { %11923 = vmatpush3.bf16.msra.mxu0 %v14441_v21  ;;  %10955 = vmatprep.mubr.f32.mxu1 %v7138_v59 }
 0x36b   : > { %12179 = vmatpush3.bf16.msra.mxu1 %v14372_v35  ;;  %11925 = vmatprep.subr.bf16.mxu0 %v14452_v57  ;;  %v14467_v35 = vpack.c.bf16 %v5765_v33, %v5764_v31  ;;  %v5960_v33 = vld [vmem:[%s13151_s28 + $0x10] sm:$0xff] }
 0x36c   : > { %10508 = vmatmul.mubr.f32.gmra.mrb[18].mxu0 %v14185_v15  ;;  %12181 = vmatprep.subr.bf16.mxu1 %v14384_v18  ;;  %v7141_v15 = vld [vmem:[#allocation3 + $0xc8] sm:$0xff] }
 0x36d   : > { %10956 = vmatmul.mubr.f32.gmra.mrb[18].mxu1 %v7139_v38  ;;  %10510 = vmatprep.mubr.f32.mxu0 %v14192_v22  ;;  %v7142_v22 = vld [vmem:[#allocation3 + $0xd0] sm:$0xff] }
 0x36e   : > { %11927 = vmatpush3.bf16.msra.mxu0 %v14452_v57  ;;  %10958 = vmatprep.mubr.f32.mxu1 %v7140_v46 }
 0x36f   : > { %12183 = vmatpush3.bf16.msra.mxu1 %v14384_v18  ;;  %11929 = vmatprep.subr.bf16.mxu0 %v14459_v28  ;;  %v14475_v18 = vpack.c.bf16 %v5767_v55, %v5766_v2  ;;  %v5963_v55 = vld [vmem:[%s13151_s28 + $0x28] sm:$0xff] }
 0x370   : > { %10511 = vmatmul.mubr.f32.gmra.mrb[20].mxu0 %v14199_v62  ;;  %12185 = vmatprep.subr.bf16.mxu1 %v14391_v0  ;;  %v7143_v62 = vld [vmem:[#allocation3 + $0xd8] sm:$0xff] }
 0x371   : > { %10959 = vmatmul.mubr.f32.gmra.mrb[20].mxu1 %v7141_v15  ;;  %10513 = vmatprep.mubr.f32.mxu0 %v14206_v56  ;;  %v7144_v56 = vld [vmem:[#allocation3 + $0xe0] sm:$0xff] }
 0x372   : > { %11931 = vmatpush3.bf16.msra.mxu0 %v14459_v28  ;;  %10961 = vmatprep.mubr.f32.mxu1 %v7142_v22 }
 0x373   : > { %12187 = vmatpush3.bf16.msra.mxu1 %v14391_v0  ;;  %11933 = vmatprep.subr.bf16.mxu0 %v14467_v35  ;;  %v14483_v0 = vpack.c.bf16 %v5769_v6, %v5768_v50 }
 0x374   : > { %10514 = vmatmul.mubr.f32.gmra.mrb[22].mxu0 %v14213_v44  ;;  %12189 = vmatprep.subr.bf16.mxu1 %v14399_v48  ;;  %v7145_v44 = vld [vmem:[#allocation3 + $0xe8] sm:$0xff] }
 0x375   : > { %10962 = vmatmul.mubr.f32.gmra.mrb[22].mxu1 %v7143_v62  ;;  %10516 = vmatprep.mubr.f32.mxu0 %v14220_v53  ;;  %v7146_v53 = vld [vmem:[#allocation3 + $0xf0] sm:$0xff]  ;;  %v5962_v62 = vld [vmem:[%s13151_s28 + $0x20] sm:$0xff] }
 0x376   : > { %11935 = vmatpush3.bf16.msra.mxu0 %v14467_v35  ;;  %10964 = vmatprep.mubr.f32.mxu1 %v7144_v56 }
 0x377   : > { %12191 = vmatpush3.bf16.msra.mxu1 %v14399_v48  ;;  %11937 = vmatprep.subr.bf16.mxu0 %v14475_v18  ;;  %v14491_v48 = vpack.c.bf16 %v5771_v26, %v5770_v39 }
 0x378   : > { %10517 = vmatmul.mubr.f32.gmra.mrb[24].mxu0 %v14227_v12  ;;  %12193 = vmatprep.subr.bf16.mxu1 %v14407_v45  ;;  %v7147_v12 = vld [vmem:[#allocation3 + $0xf8] sm:$0xff] }
 0x379   : > { %10965 = vmatmul.mubr.f32.gmra.mrb[24].mxu1 %v7145_v44  ;;  %10519 = vmatprep.mubr.f32.mxu0 %v14234_v60  ;;  %v14500_v60 = vpack.c.bf16 %v5773_v4, %v5772_v11  ;;  %v5965_v44 = vld [vmem:[%s13151_s28 + $0x38] sm:$0xff] }
 0x37a   : > { %11939 = vmatpush3.bf16.msra.mxu0 %v14475_v18  ;;  %10967 = vmatprep.mubr.f32.mxu1 %v7146_v53  ;;  %v5964_v53 = vld [vmem:[%s13151_s28 + $0x30] sm:$0xff] }
 0x37b   : > { %12195 = vmatpush3.bf16.msra.mxu1 %v14407_v45  ;;  %11941 = vmatprep.subr.bf16.mxu0 %v14483_v0  ;;  %v7528_v45 = vld [vmem:[#allocation3 + $0x300] sm:$0xff] }
 0x37c   : > { %10520 = vmatmul.mubr.f32.gmra.mrb[26].mxu0 %v14241_v24  ;;  %12197 = vmatprep.subr.bf16.mxu1 %v14415_v29  ;;  %v14507_v24 = vld [vmem:[#allocation2 + $0x120] sm:$0xff] }
 0x37d   : > { %10968 = vmatmul.mubr.f32.gmra.mrb[26].mxu1 %v7147_v12  ;;  %10522 = vmatprep.mubr.f32.mxu0 %v14248_v25  ;;  %v5741_v25 = vld [vmem:[#allocation3 + $0x260] sm:$0xff] }
 0x37e   : > { %11943 = vmatpush3.bf16.msra.mxu0 %v14483_v0  ;;  %10970 = vmatprep.mubr.f32.mxu1 %v14252_v14  ;;  %v5742_v14 = vld [vmem:[#allocation3 + $0x268] sm:$0xff] }
 0x37f   : > { %12199 = vmatpush3.bf16.msra.mxu1 %v14415_v29  ;;  %11945 = vmatprep.subr.bf16.mxu0 %v14491_v48  ;;  %v7529_v29 = vld [vmem:[#allocation3 + $0x308] sm:$0xff] }
 0x380   : > { %10523 = vmatmul.mubr.f32.gmra.mrb[28].mxu0 %v14257_v10  ;;  %12201 = vmatprep.subr.bf16.mxu1 %v14423_v23  ;;  %v5743_v10 = vld [vmem:[#allocation3 + $0x270] sm:$0xff] }
 0x381   : > { %10971 = vmatmul.mubr.f32.gmra.mrb[28].mxu1 %v14263_v58  ;;  %10525 = vmatprep.mubr.f32.mxu0 %v14268_v19  ;;  %v5744_v58 = vld [vmem:[#allocation3 + $0x278] sm:$0xff]  ;;  %v5745_v19 = vld [vmem:[#allocation3 + $0x280] sm:$0xff] }
 0x382   : > { %11947 = vmatpush3.bf16.msra.mxu0 %v14491_v48  ;;  %10973 = vmatprep.mubr.f32.mxu1 %v14507_v24 }
 0x383   : > { %12203 = vmatpush3.bf16.msra.mxu1 %v14423_v23  ;;  %11949 = vmatprep.subr.bf16.mxu0 %v14500_v60  ;;  %v7530_v23 = vld [vmem:[#allocation3 + $0x310] sm:$0xff] }
 0x384   : > { %10526 = vmatmul.mubr.f32.gmra.mrb[30].mxu0 %v14278_v7  ;;  %12205 = vmatprep.subr.bf16.mxu1 %v14431_v1  ;;  %v5746_v7 = vld [vmem:[#allocation3 + $0x288] sm:$0xff] }
 0x385   : > { %10974 = vmatmul.mubr.f32.gmra.mrb[30].mxu1 %v14507_v24  ;;  %10560 = vmatprep.mubr.f32.mxu0 %v5741_v25 }
 0x386   : > { %11951 = vmatpush3.bf16.msra.mxu0 %v14500_v60  ;;  %11008 = vmatprep.mubr.f32.mxu1 %v14282_v3  ;;  %v5747_v3 = vld [vmem:[#allocation3 + $0x290] sm:$0xff] }
 0x387   : > { %12207 = vmatpush3.bf16.msra.mxu1 %v14431_v1  ;;  %v7531_v1 = vld [vmem:[#allocation3 + $0x318] sm:$0xff] }
 0x388   : > { %12209 = vmatprep.subr.bf16.mxu1 %v14441_v21 }
 0x389   : > { %10561 = vmatmul.mubr.f32.vlgmr.msra.gmra.mrb[16].mxu0 %v5742_v14  ;;  %v5966_v14 = vld [vmem:[%s13151_s28 + $0x40] sm:$0xff] }
 0x38a   : > { %11009 = vmatmul.mubr.f32.vlgmr.msra.gmra.mrb[16].mxu1 %v14291_v40  ;;  %10563 = vmatprep.mubr.f32.mxu0 %v5743_v10  ;;  %v5748_v40 = vld [vmem:[#allocation3 + $0x298] sm:$0xff] }
 0x38b   : > { %11011 = vmatprep.mubr.f32.mxu1 %v14296_v47  ;;  %12211 = vmatpush3.bf16.msra.mxu1 %v14441_v21  ;;  %v5749_v47 = vld [vmem:[#allocation3 + $0x2a0] sm:$0xff]  ;;  %v7535_v21 = vld [vmem:[#allocation3 + $0x338] sm:$0xff] }
 0x38c   : > { %12213 = vmatprep.subr.bf16.mxu1 %v14452_v57 }
 0x38d   : > { %10564 = vmatmul.mubr.f32.gmra.mrb[18].mxu0 %v5744_v58 }
 0x38e   : > { %11012 = vmatmul.mubr.f32.gmra.mrb[18].mxu1 %v14305_v52  ;;  %10566 = vmatprep.mubr.f32.mxu0 %v5745_v19  ;;  %v5750_v52 = vld [vmem:[#allocation3 + $0x2a8] sm:$0xff] }
 0x38f   : > { %11014 = vmatprep.mubr.f32.mxu1 %v14310_v37  ;;  %12215 = vmatpush3.bf16.msra.mxu1 %v14452_v57  ;;  %v5751_v37 = vld [vmem:[#allocation3 + $0x2b0] sm:$0xff] }
 0x390   : > { %12217 = vmatprep.subr.bf16.mxu1 %v14459_v28 }
 0x391   : > { %10567 = vmatmul.mubr.f32.gmra.mrb[20].mxu0 %v5746_v7 }
 0x392   : > { %11015 = vmatmul.mubr.f32.gmra.mrb[20].mxu1 %v14319_v63  ;;  %10569 = vmatprep.mubr.f32.mxu0 %v5747_v3  ;;  %v5752_v63 = vld [vmem:[#allocation3 + $0x2b8] sm:$0xff] }
 0x393   : > { %11017 = vmatprep.mubr.f32.mxu1 %v14324_v8  ;;  %12219 = vmatpush3.bf16.msra.mxu1 %v14459_v28  ;;  %v5753_v8 = vld [vmem:[#allocation3 + $0x2c0] sm:$0xff]  ;;  %v5961_v28 = vld [vmem:[%s13151_s28 + $0x18] sm:$0xff] }
 0x394   : > { %12221 = vmatprep.subr.bf16.mxu1 %v14467_v35  ;;  %v5969_v3 = vld [vmem:[%s13151_s28 + $0x58] sm:$0xff] }
 0x395   : > { %10570 = vmatmul.mubr.f32.gmra.mrb[22].mxu0 %v5748_v40 }
 0x396   : > { %11018 = vmatmul.mubr.f32.gmra.mrb[22].mxu1 %v14333_v36  ;;  %10572 = vmatprep.mubr.f32.mxu0 %v5749_v47  ;;  %v5754_v36 = vld [vmem:[#allocation3 + $0x2c8] sm:$0xff] }
 0x397   : > { %11020 = vmatprep.mubr.f32.mxu1 %v14338_v20  ;;  %12223 = vmatpush3.bf16.msra.mxu1 %v14467_v35  ;;  %v5755_v20 = vld [vmem:[#allocation3 + $0x2d0] sm:$0xff] }
 0x398   : > { %12225 = vmatprep.subr.bf16.mxu1 %v14475_v18 }
 0x399   : > { %10573 = vmatmul.mubr.f32.gmra.mrb[24].mxu0 %v5750_v52  ;;  %v5968_v52 = vld [vmem:[%s13151_s28 + $0x50] sm:$0xff] }
 0x39a   : > { %11021 = vmatmul.mubr.f32.gmra.mrb[24].mxu1 %v14347_v5  ;;  %10575 = vmatprep.mubr.f32.mxu0 %v5751_v37  ;;  %v5756_v5 = vld [vmem:[#allocation3 + $0x2d8] sm:$0xff] }
 0x39b   : > { %11023 = vmatprep.mubr.f32.mxu1 %v14352_v42  ;;  %12227 = vmatpush3.bf16.msra.mxu1 %v14475_v18  ;;  %v7524_v42 = vld [vmem:[#allocation3 + $0x2e0] sm:$0xff] }
 0x39c   : > { %12229 = vmatprep.subr.bf16.mxu1 %v14483_v0 }
 0x39d   : > { %10576 = vmatmul.mubr.f32.gmra.mrb[26].mxu0 %v5752_v63 }
 0x39e   : > { %11024 = vmatmul.mubr.f32.gmra.mrb[26].mxu1 %v14361_v43  ;;  %10578 = vmatprep.mubr.f32.mxu0 %v5753_v8  ;;  %v7525_v43 = vld [vmem:[#allocation3 + $0x2e8] sm:$0xff] }
 0x39f   : > { %11026 = vmatprep.mubr.f32.mxu1 %v14366_v61  ;;  %12231 = vmatpush3.bf16.msra.mxu1 %v14483_v0  ;;  %v7526_v61 = vld [vmem:[#allocation3 + $0x2f0] sm:$0xff] }
 0x3a0   : > { %12233 = vmatprep.subr.bf16.mxu1 %v14491_v48 }
 0x3a1   : > { %10579 = vmatmul.mubr.f32.gmra.mrb[28].mxu0 %v5754_v36 }
 0x3a2   : > { %11027 = vmatmul.mubr.f32.gmra.mrb[28].mxu1 %v14375_v51  ;;  %10581 = vmatprep.mubr.f32.mxu0 %v5755_v20  ;;  %v7527_v51 = vld [vmem:[#allocation3 + $0x2f8] sm:$0xff]  ;;  %v5971_v20 = vld [vmem:[%s13151_s28 + $0x68] sm:$0xff] }
 0x3a3   : > { %12235 = vmatpush3.bf16.msra.mxu1 %v14491_v48  ;;  %11029 = vmatprep.mubr.f32.mxu1 %v14507_v24 }
 0x3a4   : > { %12237 = vmatprep.subr.bf16.mxu1 %v14500_v60 }
 0x3a5   : > { %10582 = vmatmul.mubr.f32.gmra.mrb[30].mxu0 %v5756_v5 }
 0x3a6   : > { %11030 = vmatmul.mubr.f32.gmra.mrb[30].mxu1 %v14507_v24 }
 0x3a7   : > { %12239 = vmatpush3.bf16.msra.mxu1 %v14500_v60  ;;  %11064 = vmatprep.mubr.f32.mxu1 %v7524_v42  ;;  %v5967_v60 = vld [vmem:[%s13151_s28 + $0x48] sm:$0xff] }
 0x3aa   : > { %11065 = vmatmul.mubr.f32.vlgmr.msra.gmra.mrb[16].mxu1 %v7525_v43  ;;  %v5970_v43 = vld [vmem:[%s13151_s28 + $0x60] sm:$0xff] }
 0x3ab   : > { %11067 = vmatprep.mubr.f32.mxu1 %v7526_v61 }
 0x3ae   : > { %11068 = vmatmul.mubr.f32.gmra.mrb[18].mxu1 %v7527_v51 }
 0x3af   : > { %11070 = vmatprep.mubr.f32.mxu1 %v7528_v45 }
 0x3b2   : > { %11071 = vmatmul.mubr.f32.gmra.mrb[20].mxu1 %v7529_v29 }
 0x3b3   : > { %11073 = vmatprep.mubr.f32.mxu1 %v7530_v23  ;;  %v5973_v23 = vld [vmem:[%s13151_s28 + $0x78] sm:$0xff] }
 0x3b6   : > { %11074 = vmatmul.mubr.f32.gmra.mrb[22].mxu1 %v7531_v1 }
 0x3b7   : > { %11076 = vmatprep.mubr.f32.mxu1 %v7532_v32 }
 0x3ba   : > { %11077 = vmatmul.mubr.f32.gmra.mrb[24].mxu1 %v7533_v49  ;;  %v5972_v49 = vld [vmem:[%s13151_s28 + $0x70] sm:$0xff] }
 0x3bb   : > { %11079 = vmatprep.mubr.f32.mxu1 %v7534_v54 }
 0x3be   : > { %11080 = vmatmul.mubr.f32.gmra.mrb[26].mxu1 %v7535_v21 }
 0x3bf   : > { %11082 = vmatprep.mubr.f32.mxu1 %v14435_v27 }
 0x3c2   : > { %11083 = vmatmul.mubr.f32.gmra.mrb[28].mxu1 %v14443_v30 }
 0x3c3   : > { %11085 = vmatprep.mubr.f32.mxu1 %v14507_v24 }
 0x3c6   : > { %11086 = vmatmul.mubr.f32.gmra.mrb[30].mxu1 %v14507_v24 }
 0x45c   : > { %v10562_v9 = vpop.f32.mrb[16].mxu0 }
 0x45d   : > { %v5943_v57 = vadd.f32 %v10562_v9, %v14556_v13  ;;  %v5840_v34 = vpop.f32.mrb[17].mxu0 }
 0x45e   : > { %v5942_v27 = vadd.f32 %v14556_v13, %v5840_v34 }
 0x45f   : > { %v5975_v30 = vadd.f32 %v5959_v17, %v5943_v57  ;;  %v7885_v57 = vld [vmem:[%s13151_s28 + $0x88] sm:$0xff] }
 0x460   : > { %v5974_v41 = vadd.f32 %v5958_v16, %v5942_v27  ;;  %v10565_v59 = vpop.f32.mrb[18].mxu0  ;;  %v7884_v27 = vld [vmem:[%s13151_s28 + $0x80] sm:$0xff] }
 0x461   : > { %5991 = vst.msk [vmem:[%s14566_s10 + $0x8] sm:$0xff] %vm504_vm0, %v5975_v30  ;;  %v5945_v38 = vadd.f32 %v10565_v59, %v14556_v13  ;;  %v5850_v31 = vpop.f32.mrb[19].mxu0 }
 0x462   : > { %5990 = vst.msk [vmem:[%s14566_s10] sm:$0xff] %vm504_vm0, %v5974_v41  ;;  %v5944_v46 = vadd.f32 %v14556_v13, %v5850_v31 }
 0x463   : > { %v5977_v35 = vadd.f32 %v5961_v28, %v5945_v38  ;;  %v7887_v38 = vld [vmem:[%s13151_s28 + $0x98] sm:$0xff] }
 0x464   : > { %v5976_v15 = vadd.f32 %v5960_v33, %v5944_v46  ;;  %v10568_v2 = vpop.f32.mrb[20].mxu0  ;;  %v7886_v46 = vld [vmem:[%s13151_s28 + $0x90] sm:$0xff] }
 0x465   : > { %5993 = vst.msk [vmem:[%s14566_s10 + $0x18] sm:$0xff] %vm504_vm0, %v5977_v35  ;;  %v5947_v22 = vadd.f32 %v10568_v2, %v14556_v13  ;;  %v5860_v18 = vpop.f32.mrb[21].mxu0 }
 0x466   : > { %5992 = vst.msk [vmem:[%s14566_s10 + $0x10] sm:$0xff] %vm504_vm0, %v5976_v15  ;;  %v5946_v50 = vadd.f32 %v14556_v13, %v5860_v18 }
 0x467   : > { %v5979_v6 = vadd.f32 %v5963_v55, %v5947_v22  ;;  %v7889_v22 = vld [vmem:[%s13151_s28 + $0xa8] sm:$0xff] }
 0x468   : > { %v5978_v56 = vadd.f32 %v5962_v62, %v5946_v50  ;;  %v10571_v0 = vpop.f32.mrb[22].mxu0  ;;  %v7888_v50 = vld [vmem:[%s13151_s28 + $0xa0] sm:$0xff] }
 0x469   : > { %5995 = vst.msk [vmem:[%s14566_s10 + $0x28] sm:$0xff] %vm504_vm0, %v5979_v6  ;;  %v5949_v39 = vadd.f32 %v10571_v0, %v14556_v13  ;;  %v5870_v26 = vpop.f32.mrb[23].mxu0 }
 0x46a   : > { %5994 = vst.msk [vmem:[%s14566_s10 + $0x20] sm:$0xff] %vm504_vm0, %v5978_v56  ;;  %v5948_v48 = vadd.f32 %v14556_v13, %v5870_v26 }
 0x46b   : > { %v5981_v12 = vadd.f32 %v5965_v44, %v5949_v39  ;;  %v7891_v39 = vld [vmem:[%s13151_s28 + $0xb8] sm:$0xff] }
 0x46c   : > { %v5980_v11 = vadd.f32 %v5964_v53, %v5948_v48  ;;  %v10574_v4 = vpop.f32.mrb[24].mxu0  ;;  %v7890_v48 = vld [vmem:[%s13151_s28 + $0xb0] sm:$0xff] }
 0x46d   : > { %5997 = vst.msk [vmem:[%s14566_s10 + $0x38] sm:$0xff] %vm504_vm0, %v5981_v12  ;;  %v5951_v24 = vadd.f32 %v10574_v4, %v14556_v13  ;;  %v5880_v25 = vpop.f32.mrb[25].mxu0 }
 0x46e   : > { %5996 = vst.msk [vmem:[%s14566_s10 + $0x30] sm:$0xff] %vm504_vm0, %v5980_v11  ;;  %v5950_v10 = vadd.f32 %v14556_v13, %v5880_v25 }
 0x46f   : > { %v5983_v58 = vadd.f32 %v5967_v60, %v5951_v24  ;;  %v7893_v24 = vld [vmem:[%s13151_s28 + $0xc8] sm:$0xff] }
 0x470   : > { %v5982_v19 = vadd.f32 %v5966_v14, %v5950_v10  ;;  %v10577_v7 = vpop.f32.mrb[26].mxu0  ;;  %v7892_v10 = vld [vmem:[%s13151_s28 + $0xc0] sm:$0xff] }
 0x471   : > { %5999 = vst.msk [vmem:[%s14566_s10 + $0x48] sm:$0xff] %vm504_vm0, %v5983_v58  ;;  %v5953_v40 = vadd.f32 %v10577_v7, %v14556_v13  ;;  %v5890_v47 = vpop.f32.mrb[27].mxu0 }
 0x472   : > { %5998 = vst.msk [vmem:[%s14566_s10 + $0x40] sm:$0xff] %vm504_vm0, %v5982_v19  ;;  %v5952_v37 = vadd.f32 %v14556_v13, %v5890_v47 }
 0x473   : > { %v5985_v63 = vadd.f32 %v5969_v3, %v5953_v40  ;;  %v7895_v40 = vld [vmem:[%s13151_s28 + $0xd8] sm:$0xff] }
 0x474   : > { %v5984_v8 = vadd.f32 %v5968_v52, %v5952_v37  ;;  %v10580_v36 = vpop.f32.mrb[28].mxu0  ;;  %v7894_v37 = vld [vmem:[%s13151_s28 + $0xd0] sm:$0xff] }
 0x475   : > { %6001 = vst.msk [vmem:[%s14566_s10 + $0x58] sm:$0xff] %vm504_vm0, %v5985_v63  ;;  %v5955_v5 = vadd.f32 %v10580_v36, %v14556_v13  ;;  %v5900_v42 = vpop.f32.mrb[29].mxu0 }
 0x476   : > { %6000 = vst.msk [vmem:[%s14566_s10 + $0x50] sm:$0xff] %vm504_vm0, %v5984_v8  ;;  %v5954_v61 = vadd.f32 %v14556_v13, %v5900_v42 }
 0x477   : > { %v5987_v51 = vadd.f32 %v5971_v20, %v5955_v5  ;;  %v7897_v5 = vld [vmem:[%s13151_s28 + $0xe8] sm:$0xff] }
 0x478   : > { %v5986_v45 = vadd.f32 %v5970_v43, %v5954_v61  ;;  %v10583_v29 = vpop.f32.mrb[30].mxu0  ;;  %v7896_v61 = vld [vmem:[%s13151_s28 + $0xe0] sm:$0xff] }
 0x479   : > { %6003 = vst.msk [vmem:[%s14566_s10 + $0x68] sm:$0xff] %vm504_vm0, %v5987_v51  ;;  %v5957_v1 = vadd.f32 %v10583_v29, %v14556_v13  ;;  %v5910_v32 = vpop.f32.mrb[31].mxu0 }
 0x47a   : > { %6002 = vst.msk [vmem:[%s14566_s10 + $0x60] sm:$0xff] %vm504_vm0, %v5986_v45  ;;  %v5956_v54 = vadd.f32 %v14556_v13, %v5910_v32 }
 0x47b   : > { %v5989_v21 = vadd.f32 %v5973_v23, %v5957_v1  ;;  %v7899_v1 = vld [vmem:[%s13151_s28 + $0xf8] sm:$0xff] }
 0x47c   : > { %v5988_v9 = vadd.f32 %v5972_v49, %v5956_v54  ;;  %v7898_v54 = vld [vmem:[%s13151_s28 + $0xf0] sm:$0xff] }
 0x47d   : > { %6005 = vst.msk [vmem:[%s14566_s10 + $0x78] sm:$0xff] %vm504_vm0, %v5989_v21  ;;  %v11066_v17 = vpop.f32.mrb[16].mxu1 }
 0x47e   : > { %6004 = vst.msk [vmem:[%s14566_s10 + $0x70] sm:$0xff] %vm504_vm0, %v5988_v9  ;;  %v7725_v34 = vadd.f32 %v11066_v17, %v14556_v13  ;;  %v7622_v16 = vpop.f32.mrb[17].mxu1 }
 0x47f   : > { %v7724_v30 = vadd.f32 %v14556_v13, %v7622_v16 }
 0x480   : > { %v7758_v41 = vadd.f32 %v7885_v57, %v7725_v34 }
 0x481   : > { %v7757_v59 = vadd.f32 %v7884_v27, %v7724_v30  ;;  %v11069_v28 = vpop.f32.mrb[18].mxu1 }
 0x482   : > { %7901 = vst.msk [vmem:[%s14566_s10 + $0x88] sm:$0xff] %vm504_vm0, %v7758_v41  ;;  %v7727_v31 = vadd.f32 %v11069_v28, %v14556_v13  ;;  %v7632_v33 = vpop.f32.mrb[19].mxu1 }
 0x483   : > { %7900 = vst.msk [vmem:[%s14566_s10 + $0x80] sm:$0xff] %vm504_vm0, %v7757_v59  ;;  %v7726_v35 = vadd.f32 %v14556_v13, %v7632_v33 }
 0x484   : > { %v7760_v15 = vadd.f32 %v7887_v38, %v7727_v31 }
 0x485   : > { %v7759_v2 = vadd.f32 %v7886_v46, %v7726_v35  ;;  %v11072_v55 = vpop.f32.mrb[20].mxu1 }
 0x486   : > { %7903 = vst.msk [vmem:[%s14566_s10 + $0x98] sm:$0xff] %vm504_vm0, %v7760_v15  ;;  %v7729_v18 = vadd.f32 %v11072_v55, %v14556_v13  ;;  %v7642_v62 = vpop.f32.mrb[21].mxu1 }
 0x487   : > { %7902 = vst.msk [vmem:[%s14566_s10 + $0x90] sm:$0xff] %vm504_vm0, %v7759_v2  ;;  %v7728_v6 = vadd.f32 %v14556_v13, %v7642_v62 }
 0x488   : > { %v7762_v56 = vadd.f32 %v7889_v22, %v7729_v18 }
 0x489   : > { %v7761_v0 = vadd.f32 %v7888_v50, %v7728_v6  ;;  %v11075_v44 = vpop.f32.mrb[22].mxu1 }
 0x48a   : > { %7905 = vst.msk [vmem:[%s14566_s10 + $0xa8] sm:$0xff] %vm504_vm0, %v7762_v56  ;;  %v7731_v26 = vadd.f32 %v11075_v44, %v14556_v13  ;;  %v7652_v53 = vpop.f32.mrb[23].mxu1 }
 0x48b   : > { %7904 = vst.msk [vmem:[%s14566_s10 + $0xa0] sm:$0xff] %vm504_vm0, %v7761_v0  ;;  %v7730_v12 = vadd.f32 %v14556_v13, %v7652_v53 }
 0x48c   : > { %v7764_v11 = vadd.f32 %v7891_v39, %v7731_v26 }
 0x48d   : > { %v7763_v4 = vadd.f32 %v7890_v48, %v7730_v12  ;;  %v11078_v60 = vpop.f32.mrb[24].mxu1 }
 0x48e   : > { %7907 = vst.msk [vmem:[%s14566_s10 + $0xb8] sm:$0xff] %vm504_vm0, %v7764_v11  ;;  %v7733_v25 = vadd.f32 %v11078_v60, %v14556_v13  ;;  %v7662_v14 = vpop.f32.mrb[25].mxu1 }
 0x48f   : > { %7906 = vst.msk [vmem:[%s14566_s10 + $0xb0] sm:$0xff] %vm504_vm0, %v7763_v4  ;;  %v7732_v58 = vadd.f32 %v14556_v13, %v7662_v14 }
 0x490   : > { %v7766_v19 = vadd.f32 %v7893_v24, %v7733_v25 }
 0x491   : > { %v7765_v7 = vadd.f32 %v7892_v10, %v7732_v58  ;;  %v11081_v3 = vpop.f32.mrb[26].mxu1 }
 0x492   : > { %7909 = vst.msk [vmem:[%s14566_s10 + $0xc8] sm:$0xff] %vm504_vm0, %v7766_v19  ;;  %v7735_v47 = vadd.f32 %v11081_v3, %v14556_v13  ;;  %v7672_v52 = vpop.f32.mrb[27].mxu1 }
 0x493   : > { %7908 = vst.msk [vmem:[%s14566_s10 + $0xc0] sm:$0xff] %vm504_vm0, %v7765_v7  ;;  %v7734_v63 = vadd.f32 %v14556_v13, %v7672_v52 }
 0x494   : > { %v7768_v8 = vadd.f32 %v7895_v40, %v7735_v47 }
 0x495   : > { %v7767_v36 = vadd.f32 %v7894_v37, %v7734_v63  ;;  %v11084_v20 = vpop.f32.mrb[28].mxu1 }
 0x496   : > { %7911 = vst.msk [vmem:[%s14566_s10 + $0xd8] sm:$0xff] %vm504_vm0, %v7768_v8  ;;  %v7737_v42 = vadd.f32 %v11084_v20, %v14556_v13  ;;  %v7682_v43 = vpop.f32.mrb[29].mxu1 }
 0x497   : > { %7910 = vst.msk [vmem:[%s14566_s10 + $0xd0] sm:$0xff] %vm504_vm0, %v7767_v36  ;;  %v7736_v51 = vadd.f32 %v14556_v13, %v7682_v43 }
 0x498   : > { %v7770_v45 = vadd.f32 %v7897_v5, %v7737_v42 }
 0x499   : > { %v7769_v29 = vadd.f32 %v7896_v61, %v7736_v51  ;;  %v11087_v23 = vpop.f32.mrb[30].mxu1 }
 0x49a   : > { %7913 = vst.msk [vmem:[%s14566_s10 + $0xe8] sm:$0xff] %vm504_vm0, %v7770_v45  ;;  %v7739_v32 = vadd.f32 %v11087_v23, %v14556_v13  ;;  %v7692_v49 = vpop.f32.mrb[31].mxu1 }
 0x49b   : > { %7912 = vst.msk [vmem:[%s14566_s10 + $0xe0] sm:$0xff] %vm504_vm0, %v7769_v29  ;;  %v7738_v21 = vadd.f32 %v14556_v13, %v7692_v49 }
 0x49c   : > { %v7772_v9 = vadd.f32 %v7899_v1, %v7739_v32 }
 0x49d   : > { %v7771_v17 = vadd.f32 %v7898_v54, %v7738_v21 }
 0x49e   : > { %7915 = vst.msk [vmem:[%s14566_s10 + $0xf8] sm:$0xff] %vm504_vm0, %v7772_v9 }
 0x49f   : > { %7914 = vst.msk [vmem:[%s14566_s10 + $0xf0] sm:$0xff] %vm504_vm0, %v7771_v17 }
 0x4a0 PF: > { %s17_s18 = sadd.s32 1, %s12858_s18  }
 0x4a1   : > { %p14_p5 = scmp.ge.s32.totalorder %s17_s18, 4  }
 0x4a3   :  { %16 = sbr.rel (!%p14_p5) target bundleno = 2 (0x2), region = 131 }
 0x4aa   :  { %7811 = vsyncpa [#allocation5], 1 }
 0x4ab   :  { %7813 = vsyncpa [#allocation5 + $0x1], 1 }
 0x4ac   :  { %7814 = vsyncpa [#allocation7], 1 }

</bundles_post_ra>
